<compile_context>
chip_gen: v5e
topology: v5e:2x2
jax: 0.10.0
libtpu: 0.0.40
codegen_flags: <defaults>
</compile_context>

<pallas_src>
import jax
import jax.numpy as jnp
from jax.experimental import pallas as pl
from jax.experimental.pallas import tpu as pltpu

IN_DIM = 1024
HID = 512
OUT_DIM = 4
OUT_PAD = 128  # lane-dense padded output width


def _mlp_kernel(x_ref,
                wfc_ref, bfc_ref,
                w1_ref, b1_ref,
                w2_ref, b2_ref,
                w3_ref, b3_ref,
                o_ref):
    # fc: Linear(1024, 512) -- cast x tile to bf16 in-kernel (free VPU work under MXU)
    x_bf16 = x_ref[...].astype(jnp.bfloat16)
    f = jnp.dot(x_bf16, wfc_ref[...], preferred_element_type=jnp.float32)
    f = f + bfc_ref[...]

    # Linear(512, 512) with eval BatchNorm folded in, then ReLU (Dropout = identity)
    h = jnp.dot(f.astype(jnp.bfloat16), w1_ref[...],
                preferred_element_type=jnp.float32)
    h = jnp.maximum(h + b1_ref[...], 0.0)

    # Linear(512, 512) with eval BatchNorm folded in, then ReLU (Dropout = identity)
    h = jnp.dot(h.astype(jnp.bfloat16), w2_ref[...],
                preferred_element_type=jnp.float32)
    h = jnp.maximum(h + b2_ref[...], 0.0)

    # Linear(512, 4) kept in f32, zero-padded to 128 lanes for an unmasked store
    o = jnp.dot(h, w3_ref[...], preferred_element_type=jnp.float32)
    o_ref[...] = o + b3_ref[...]


def prepare_params(p):
    """Fold eval BatchNorm into preceding Linear, pad final layer to 128 lanes,
    cast hidden matmul weights to bf16 (final layer + biases stay f32)."""
    w1 = (p["w1"] * p["s1"]).astype(jnp.bfloat16)                 # per-output-column scale
    b1 = (p["b1"] * p["s1"] + p["t1"]).astype(jnp.float32)
    w2 = (p["w2"] * p["s2"]).astype(jnp.bfloat16)
    b2 = (p["b2"] * p["s2"] + p["t2"]).astype(jnp.float32)
    w3 = jnp.zeros((HID, OUT_PAD), jnp.float32).at[:, :OUT_DIM].set(p["w3"])
    b3 = jnp.zeros((1, OUT_PAD), jnp.float32).at[:, :OUT_DIM].set(p["b3"])
    return dict(
        wfc=p["wfc"].astype(jnp.bfloat16),
        bfc=p["bfc"].astype(jnp.float32),
        w1=w1, b1=b1, w2=w2, b2=b2,
        w3=w3, b3=b3,
    )


def _choose_tm(B):
    """Pick the batch tile.  Small B: round up to a sublane multiple (8 for f32).
    Large B: big tiles to amortize per-step overhead, preferring exact divisors
    (no pad copy) and >=2 grid steps (v7x megacore sharding)."""
    if B < 128:
        return max(8, ((B + 7) // 8) * 8)
    for tm in (1024, 512, 256, 128):
        if B % tm == 0 and B // tm >= 2:
            return tm
    for tm in (1024, 512, 256, 128):
        if B >= 2 * tm:
            return tm
    return 128


def _const_map(i):
    return (0, 0)


def _weight_spec(shape):
    # Weights use a constant index_map; single-buffer them to halve their VMEM footprint.
    try:
        return pl.BlockSpec(shape, _const_map, pipeline_mode=pl.Buffered(1))
    except Exception:
        return pl.BlockSpec(shape, _const_map)


def custom_model_forward(x, packed, *, tm=None):
    """x: [B, 1024] float32 features (output of the frozen base_model)."""
    B = x.shape[0]
    if tm is None:
        tm = _choose_tm(B)
    b_pad = pl.cdiv(B, tm) * tm
    if b_pad != B:
        x = jnp.pad(x, ((0, b_pad - B), (0, 0)))
    x = x.astype(jnp.float32)  # no-op for f32 inputs; bf16 cast happens in-kernel

    out = pl.pallas_call(
        _mlp_kernel,
        out_shape=jax.ShapeDtypeStruct((b_pad, OUT_PAD), jnp.float32),
        grid=(b_pad // tm,),
        in_specs=[
            pl.BlockSpec((tm, IN_DIM), lambda i: (i, 0)),     # x tile (f32)
            _weight_spec((IN_DIM, HID)),                      # wfc (bf16)
            _weight_spec((1, HID)),                           # bfc
            _weight_spec((HID, HID)),                         # w1 (BN folded, bf16)
            _weight_spec((1, HID)),                           # b1 (BN folded)
            _weight_spec((HID, HID)),                         # w2 (BN folded, bf16)
            _weight_spec((1, HID)),                           # b2 (BN folded)
            _weight_spec((HID, OUT_PAD)),                     # w3 (lane-padded, f32)
            _weight_spec((1, OUT_PAD)),                       # b3 (lane-padded)
        ],
        out_specs=pl.BlockSpec((tm, OUT_PAD), lambda i: (i, 0)),
        compiler_params=pltpu.CompilerParams(
            dimension_semantics=("parallel",),
            vmem_limit_bytes=32 * 1024 * 1024,
        ),
    )(x, packed["wfc"], packed["bfc"],
      packed["w1"], packed["b1"],
      packed["w2"], packed["b2"],
      packed["w3"], packed["b3"])
    return out[:B, :OUT_DIM]


def init_params(key):
    """Deterministic synthetic parameters matching the module's __init__ shapes."""
    ks = jax.random.split(key, 12)

    def lin(kw, kb, fan_in, fan_out):
        bound = 1.0 / jnp.sqrt(fan_in)
        # stored as [in, out] (transposed vs. torch's [out, in])
        w = jax.random.uniform(kw, (fan_in, fan_out), jnp.float32, -bound, bound)
        b = jax.random.uniform(kb, (1, fan_out), jnp.float32, -bound, bound)
        return w, b

    wfc, bfc = lin(ks[0], ks[1], IN_DIM, HID)   # nn.Linear(1024, 512)
    w1, b1 = lin(ks[2], ks[3], HID, HID)        # nn.Linear(512, 512)
    w2, b2 = lin(ks[4], ks[5], HID, HID)        # nn.Linear(512, 512)
    w3, b3 = lin(ks[6], ks[7], HID, OUT_DIM)    # nn.Linear(512, 4)

    eps = 1e-5

    def bn_fold(kg, km, dim):
        gamma = jnp.ones((1, dim), jnp.float32)
        beta = jnp.zeros((1, dim), jnp.float32)
        running_mean = 0.1 * jax.random.normal(km, (1, dim), jnp.float32)
        running_var = jnp.ones((1, dim), jnp.float32) + 0.05 * jax.nn.softplus(
            jax.random.normal(kg, (1, dim), jnp.float32))
        scale = gamma / jnp.sqrt(running_var + eps)
        shift = beta - running_mean * scale
        return scale, shift

    s1, t1 = bn_fold(ks[8], ks[9], HID)         # nn.BatchNorm1d(512) (eval)
    s2, t2 = bn_fold(ks[10], ks[11], HID)       # nn.BatchNorm1d(512) (eval)

    return dict(wfc=wfc, bfc=bfc,
                w1=w1, b1=b1, s1=s1, t1=t1,
                w2=w2, b2=b2, s2=s2, t2=t2,
                w3=w3, b3=b3)


def reference_forward(x, p):
    f = x @ p["wfc"] + p["bfc"]
    h = jnp.maximum((f @ p["w1"] + p["b1"]) * p["s1"] + p["t1"], 0.0)
    h = jnp.maximum((h @ p["w2"] + p["b2"]) * p["s2"] + p["t2"], 0.0)
    return h @ p["w3"] + p["b3"]


if __name__ == "__main__":
    key = jax.random.PRNGKey(0)
    kx, kp = jax.random.split(key)

    B = 8
    x = jax.random.normal(kx, (B, IN_DIM), jnp.float32)  # features from frozen base_model
    params = init_params(kp)
    packed = prepare_params(params)

    out = custom_model_forward(x, packed)
    out = jax.block_until_ready(out)

    ref = reference_forward(x, params)
    assert out.shape == (B, OUT_DIM)
    # bf16 MXU inputs (first 3 layers) with f32 accumulation -> small drift vs. f32 reference.
    assert jnp.allclose(out, ref, atol=2e-2, rtol=5e-2)

    print("KERNEL_OK")
</pallas_src>

<mosaic_0001>
module attributes {stable_mosaic.version = 11 : i64} {
  func.func @_mlp_kernel(%arg0: i32, %arg1: memref<8x1024xf32, #tpu.memory_space<vmem>>, %arg2: memref<1024x512xbf16, #tpu.memory_space<vmem>>, %arg3: memref<1x512xf32, #tpu.memory_space<vmem>>, %arg4: memref<512x512xbf16, #tpu.memory_space<vmem>>, %arg5: memref<1x512xf32, #tpu.memory_space<vmem>>, %arg6: memref<512x512xbf16, #tpu.memory_space<vmem>>, %arg7: memref<1x512xf32, #tpu.memory_space<vmem>>, %arg8: memref<512x128xf32, #tpu.memory_space<vmem>>, %arg9: memref<1x128xf32, #tpu.memory_space<vmem>>, %arg10: memref<8x128xf32, #tpu.memory_space<vmem>>) attributes {dimension_semantics = [#tpu.dimension_semantics<parallel>], iteration_bounds = array<i64: 1>, scalar_prefetch = 0 : i64, scratch_operands = 0 : i64, tpu.core_type = #tpu.core_type<tc>, window_params = [{transform_indices = @transform_0, window_bounds = array<i64: 8, 1024>}, {pipeline_mode = #tpu.pipeline_mode<synchronous>, transform_indices = @transform_1, window_bounds = array<i64: 1024, 512>}, {pipeline_mode = #tpu.pipeline_mode<synchronous>, transform_indices = @transform_2, window_bounds = array<i64: 1, 512>}, {pipeline_mode = #tpu.pipeline_mode<synchronous>, transform_indices = @transform_3, window_bounds = array<i64: 512, 512>}, {pipeline_mode = #tpu.pipeline_mode<synchronous>, transform_indices = @transform_4, window_bounds = array<i64: 1, 512>}, {pipeline_mode = #tpu.pipeline_mode<synchronous>, transform_indices = @transform_5, window_bounds = array<i64: 512, 512>}, {pipeline_mode = #tpu.pipeline_mode<synchronous>, transform_indices = @transform_6, window_bounds = array<i64: 1, 512>}, {pipeline_mode = #tpu.pipeline_mode<synchronous>, transform_indices = @transform_7, window_bounds = array<i64: 512, 128>}, {pipeline_mode = #tpu.pipeline_mode<synchronous>, transform_indices = @transform_8, window_bounds = array<i64: 1, 128>}, {transform_indices = @transform_9, window_bounds = array<i64: 8, 128>}]} {
    %c0 = arith.constant 0 : index
    %c0_0 = arith.constant 0 : index
    %0 = vector.load %arg1[%c0, %c0_0] : memref<8x1024xf32, #tpu.memory_space<vmem>>, vector<8x1024xf32>
    %1 = arith.truncf %0 : vector<8x1024xf32> to vector<8x1024xbf16>
    %c0_1 = arith.constant 0 : index
    %c0_2 = arith.constant 0 : index
    %2 = vector.load %arg2[%c0_1, %c0_2] : memref<1024x512xbf16, #tpu.memory_space<vmem>>, vector<1024x512xbf16>
    %cst = arith.constant dense<0.000000e+00> : vector<8x512xf32>
    %3 = tpu.matmul %1, %2, %cst {dimension_numbers = #tpu.dot_dimension_numbers<[1], [0], [0], [1], [0, 0, 1, 1], [], []>} : vector<8x1024xbf16>, vector<1024x512xbf16>, vector<8x512xf32> -> vector<8x512xf32>
    %c0_3 = arith.constant 0 : index
    %c0_4 = arith.constant 0 : index
    %4 = vector.load %arg3[%c0_3, %c0_4] : memref<1x512xf32, #tpu.memory_space<vmem>>, vector<1x512xf32>
    %5 = vector.broadcast %4 : vector<1x512xf32> to vector<8x512xf32>
    %6 = arith.addf %3, %5 : vector<8x512xf32>
    %7 = arith.truncf %6 : vector<8x512xf32> to vector<8x512xbf16>
    %c0_5 = arith.constant 0 : index
    %c0_6 = arith.constant 0 : index
    %8 = vector.load %arg4[%c0_5, %c0_6] : memref<512x512xbf16, #tpu.memory_space<vmem>>, vector<512x512xbf16>
    %cst_7 = arith.constant dense<0.000000e+00> : vector<8x512xf32>
    %9 = tpu.matmul %7, %8, %cst_7 {dimension_numbers = #tpu.dot_dimension_numbers<[1], [0], [0], [1], [0, 0, 1, 1], [], []>} : vector<8x512xbf16>, vector<512x512xbf16>, vector<8x512xf32> -> vector<8x512xf32>
    %c0_8 = arith.constant 0 : index
    %c0_9 = arith.constant 0 : index
    %10 = vector.load %arg5[%c0_8, %c0_9] : memref<1x512xf32, #tpu.memory_space<vmem>>, vector<1x512xf32>
    %11 = vector.broadcast %10 : vector<1x512xf32> to vector<8x512xf32>
    %12 = arith.addf %9, %11 : vector<8x512xf32>
    %cst_10 = arith.constant 0.000000e+00 : f32
    %13 = vector.broadcast %cst_10 : f32 to vector<8x512xf32>
    %14 = arith.maximumf %12, %13 : vector<8x512xf32>
    %15 = arith.truncf %14 : vector<8x512xf32> to vector<8x512xbf16>
    %c0_11 = arith.constant 0 : index
    %c0_12 = arith.constant 0 : index
    %16 = vector.load %arg6[%c0_11, %c0_12] : memref<512x512xbf16, #tpu.memory_space<vmem>>, vector<512x512xbf16>
    %cst_13 = arith.constant dense<0.000000e+00> : vector<8x512xf32>
    %17 = tpu.matmul %15, %16, %cst_13 {dimension_numbers = #tpu.dot_dimension_numbers<[1], [0], [0], [1], [0, 0, 1, 1], [], []>} : vector<8x512xbf16>, vector<512x512xbf16>, vector<8x512xf32> -> vector<8x512xf32>
    %c0_14 = arith.constant 0 : index
    %c0_15 = arith.constant 0 : index
    %18 = vector.load %arg7[%c0_14, %c0_15] : memref<1x512xf32, #tpu.memory_space<vmem>>, vector<1x512xf32>
    %19 = vector.broadcast %18 : vector<1x512xf32> to vector<8x512xf32>
    %20 = arith.addf %17, %19 : vector<8x512xf32>
    %cst_16 = arith.constant 0.000000e+00 : f32
    %21 = vector.broadcast %cst_16 : f32 to vector<8x512xf32>
    %22 = arith.maximumf %20, %21 : vector<8x512xf32>
    %c0_17 = arith.constant 0 : index
    %c0_18 = arith.constant 0 : index
    %23 = vector.load %arg8[%c0_17, %c0_18] : memref<512x128xf32, #tpu.memory_space<vmem>>, vector<512x128xf32>
    %cst_19 = arith.constant dense<0.000000e+00> : vector<8x128xf32>
    %24 = tpu.matmul %22, %23, %cst_19 {dimension_numbers = #tpu.dot_dimension_numbers<[1], [0], [0], [1], [0, 0, 1, 1], [], []>} : vector<8x512xf32>, vector<512x128xf32>, vector<8x128xf32> -> vector<8x128xf32>
    %c0_20 = arith.constant 0 : index
    %c0_21 = arith.constant 0 : index
    %25 = vector.load %arg9[%c0_20, %c0_21] : memref<1x128xf32, #tpu.memory_space<vmem>>, vector<1x128xf32>
    %26 = vector.broadcast %25 : vector<1x128xf32> to vector<8x128xf32>
    %27 = arith.addf %24, %26 : vector<8x128xf32>
    %c0_22 = arith.constant 0 : index
    %c0_23 = arith.constant 0 : index
    %28 = vector.load %arg10[%c0_22, %c0_23] : memref<8x128xf32, #tpu.memory_space<vmem>>, vector<8x128xf32>
    tpu.vector_store %arg10[%c0_22, %c0_23], %27 {strides = array<i32>} : memref<8x128xf32, #tpu.memory_space<vmem>>, vector<8x128xf32>,
    return
  }
  func.func @transform_0(%arg0: i32) -> (i32, i32) {
    %c0_i32 = arith.constant 0 : i32
    %c0_i32_0 = arith.constant 0 : i32
    return %arg0, %c0_i32 : i32, i32
  }
  func.func @transform_1(%arg0: i32) -> (i32, i32) {
    %c0_i32 = arith.constant 0 : i32
    %c0_i32_0 = arith.constant 0 : i32
    %c0_i32_1 = arith.constant 0 : i32
    return %c0_i32, %c0_i32_0 : i32, i32
  }
  func.func @transform_2(%arg0: i32) -> (i32, i32) {
    %c0_i32 = arith.constant 0 : i32
    %c0_i32_0 = arith.constant 0 : i32
    %c0_i32_1 = arith.constant 0 : i32
    return %c0_i32, %c0_i32_0 : i32, i32
  }
  func.func @transform_3(%arg0: i32) -> (i32, i32) {
    %c0_i32 = arith.constant 0 : i32
    %c0_i32_0 = arith.constant 0 : i32
    %c0_i32_1 = arith.constant 0 : i32
    return %c0_i32, %c0_i32_0 : i32, i32
  }
  func.func @transform_4(%arg0: i32) -> (i32, i32) {
    %c0_i32 = arith.constant 0 : i32
    %c0_i32_0 = arith.constant 0 : i32
    %c0_i32_1 = arith.constant 0 : i32
    return %c0_i32, %c0_i32_0 : i32, i32
  }
  func.func @transform_5(%arg0: i32) -> (i32, i32) {
    %c0_i32 = arith.constant 0 : i32
    %c0_i32_0 = arith.constant 0 : i32
    %c0_i32_1 = arith.constant 0 : i32
    return %c0_i32, %c0_i32_0 : i32, i32
  }
  func.func @transform_6(%arg0: i32) -> (i32, i32) {
    %c0_i32 = arith.constant 0 : i32
    %c0_i32_0 = arith.constant 0 : i32
    %c0_i32_1 = arith.constant 0 : i32
    return %c0_i32, %c0_i32_0 : i32, i32
  }
  func.func @transform_7(%arg0: i32) -> (i32, i32) {
    %c0_i32 = arith.constant 0 : i32
    %c0_i32_0 = arith.constant 0 : i32
    %c0_i32_1 = arith.constant 0 : i32
    return %c0_i32, %c0_i32_0 : i32, i32
  }
  func.func @transform_8(%arg0: i32) -> (i32, i32) {
    %c0_i32 = arith.constant 0 : i32
    %c0_i32_0 = arith.constant 0 : i32
    %c0_i32_1 = arith.constant 0 : i32
    return %c0_i32, %c0_i32_0 : i32, i32
  }
  func.func @transform_9(%arg0: i32) -> (i32, i32) {
    %c0_i32 = arith.constant 0 : i32
    %c0_i32_0 = arith.constant 0 : i32
    return %arg0, %c0_i32 : i32, i32
  }
}

</mosaic_0001>

<bundles_post_ra>
// kernel: tpu_custom_call.1
= control target key start
LH: loop header
LB: loop body
LE: loop exit
PB: predicated region body
PF: predicated region fallthrough
CT: control target
= control target key end

     0   :  { %14 = vsyncpa [#allocation3], 0  ;;  %s7334_s0 = inlined_call_operand.hbm [shape: f32[8,1024], index: 0, kind: input, shape index: {}]   ;;  %s7335_s1 = inlined_call_operand.hbm [shape: bf16[1024,512], index: 1, kind: input, shape index: {}]   ;;  %s7336_s2 = inlined_call_operand.hbm [shape: f32[1,512], index: 2, kind: input, shape index: {}]   ;;  %s7337_s3 = inlined_call_operand.hbm [shape: bf16[512,512], index: 3, kind: input, shape index: {}]   ;;  %s7338_s4 = inlined_call_operand.hbm [shape: f32[1,512], index: 4, kind: input, shape index: {}]   ;;  %s7339_s5 = inlined_call_operand.hbm [shape: bf16[512,512], index: 5, kind: input, shape index: {}]   ;;  %s7340_s6 = inlined_call_operand.vmem [shape: f32[1,512], index: 6, kind: input, shape index: {}]   ;;  %s7341_s7 = inlined_call_operand.hbm [shape: f32[512,128], index: 7, kind: input, shape index: {}]   ;;  %s7342_s8 = inlined_call_operand.vmem [shape: f32[1,128], index: 8, kind: input, shape index: {}]   ;;  %s7343_s9 = inlined_call_operand.hbm [shape: f32[8,128], index: 9, kind: output, shape index: {}]  }
   0x1   :  { %15 = vsyncpa [#allocation6], 0 }
   0x2   :  { %16 = vsyncpa [#allocation9], 0 }
   0x3   :  { %17 = vsyncpa [#allocation12], 0  ;;  %s34_s11 = sshll.u32 %s7335_s1, 4  ;;  %s35_s11 = int_to_ptr.hbm [resolvable:$true] %s34_s11 }
   0x4   :  { %18 = vsyncpa [#allocation4], 0  ;;  %s7047_s12 = smov [#allocation5]   ;;  %s58_s16 = sshll.u32 %s7337_s3, 4  ;;  %s59_s16 = int_to_ptr.hbm [resolvable:$true] %s58_s16 }
   0x5   :  { %s36_s13 = sshll.u32 %s7047_s12, 4  ;;  %s7048_s17 = smov 256   ;;  %s37_s13 = int_to_ptr.vmem [resolvable:$true] %s36_s13 }
   0x6   :  { %s7049_s18 = smov 16   ;;  %s7050_s19 = smov [#allocation8]  }
   0x7   :  { %42 = dma.hbm_to_vmem [thread:$0]  %s35_s11, 32768, %s37_s13, [#allocation6], %s7048_s17, %s7048_s17, %s7049_s18  }
   0x8   :  { %s60_s20 = sshll.u32 %s7050_s19, 4  ;;  %s82_s23 = sshll.u32 %s7339_s5, 4  ;;  %s61_s20 = int_to_ptr.vmem [resolvable:$true] %s60_s20  ;;  %s83_s23 = int_to_ptr.hbm [resolvable:$true] %s82_s23 }
   0x9   :  { %66 = dma.hbm_to_vmem [thread:$0]  %s59_s16, 16384, %s61_s20, [#allocation9], %s7048_s17, %s7048_s17, %s7049_s18  }
   0xa   :  { %s24_s25 = sshll.u32 %s7334_s0, 4  ;;  %s7051_s26 = smov [#allocation11]   ;;  %s25_s25 = int_to_ptr.hbm [resolvable:$true] %s24_s25 }
   0xb   :  { %s84_s27 = sshll.u32 %s7051_s26, 4  ;;  %s7052_s3 = smov [#allocation2]   ;;  %s85_s27 = int_to_ptr.vmem [resolvable:$true] %s84_s27 }
   0xc   :  { %90 = dma.hbm_to_vmem [thread:$0]  %s83_s23, 16384, %s85_s27, [#allocation12], %s7048_s17, %s7048_s17, %s7049_s18  }
   0xd   :  { %s26_s28 = sshll.u32 %s7052_s3, 4  ;;  %s48_s10 = sshll.u32 %s7336_s2, 4  ;;  %s27_s28 = int_to_ptr.vmem [resolvable:$true] %s26_s28  ;;  %s49_s10 = int_to_ptr.hbm [resolvable:$true] %s48_s10 }
   0xe   :  { %29 = dma.hbm_to_vmem [thread:$0]  %s25_s25, 1024, %s27_s28, [#allocation3]  }
   0xf   :  { %s72_s12 = sshll.u32 %s7338_s4, 4  ;;  %s7053_s13 = smov [#allocation7]   ;;  %s73_s12 = int_to_ptr.hbm [resolvable:$true] %s72_s12 }
  0x10   :  { %s50_s0 = sshll.u32 %s7053_s13, 4  ;;  %s7054_s14 = smov [#allocation10]   ;;  %s51_s0 = int_to_ptr.vmem [resolvable:$true] %s50_s0 }
  0x11   :  { %53 = dma.hbm_to_vmem [thread:$0]  %s49_s10, 64, %s51_s0, [#allocation6]  }
  0x12   :  { %s74_s15 = sshll.u32 %s7054_s14, 4  ;;  %s97_s18 = sshll.u32 %s7341_s7, 4  ;;  %s75_s15 = int_to_ptr.vmem [resolvable:$true] %s74_s15  ;;  %s98_s18 = int_to_ptr.hbm [resolvable:$true] %s97_s18 }
  0x13   :  { %77 = dma.hbm_to_vmem [thread:$0]  %s73_s12, 64, %s75_s15, [#allocation9]  }
  0x14   :  { %s7055_s2 = smov [#allocation13]   ;;  %s7056_s20 = smov 128  }
  0x15   :  { %s99_s19 = sshll.u32 %s7055_s2, 4  ;;  %s7057_s21 = smov 8   ;;  %s100_s19 = int_to_ptr.vmem [resolvable:$true] %s99_s19 }
  0x16   :  { %105 = dma.hbm_to_vmem [thread:$0]  %s98_s18, 8192, %s100_s19, [#allocation12], %s7056_s20, %s7056_s20, %s7057_s21  }
  0x17   :  { %7037 = dma.done.wait [#allocation3], 1024  }
  0x18   :  { %7038 = vsyncadd [#allocation3], 4294966272 }
  0x19   :  { %7039 = dma.done.wait [#allocation6], 32832  }
  0x1a   :  { %7040 = vsyncadd [#allocation6], 4294934464 }
  0x1b   :  { %7041 = dma.done.wait [#allocation9], 16448  }
  0x1c   :  { %7042 = vsyncadd [#allocation9], 4294950848 }
  0x1d   :  { %7043 = dma.done.wait [#allocation12], 24576  }
  0x1e   :  { %7044 = vsyncadd [#allocation12], 4294942720  ;;  %v4385_v0 = vld [vmem:[#allocation5 + $0xe0] sm:$0xf]  ;;  %v6349_v1 = vld [vmem:[#allocation5 + $0xec] sm:$0xf0] }
  0x1f   :  { %v4513_v2 = vld [vmem:[#allocation5 + $0x1e0] sm:$0xf]  ;;  %v4386_v3 = vor.u32 %v6349_v1, %v4385_v0  ;;  %v6381_v4 = vld [vmem:[#allocation5 + $0x1ec] sm:$0xf0]  ;;  %s7058_s23 = smov [#allocation14]   ;;  %s4258_s26 = sshll.u32 %s7343_s9, 4  ;;  %s4259_s26 = int_to_ptr.hbm [resolvable:$true] %s4258_s26 }
  0x20   :  { %v4641_v5 = vld [vmem:[#allocation5 + $0x2e0] sm:$0xf]  ;;  %v6413_v6 = vld [vmem:[#allocation5 + $0x2ec] sm:$0xf0]  ;;  %v4514_v7 = vor.u32 %v6381_v4, %v4513_v2  ;;  %s4256_s1 = sshll.u32 %s7058_s23, 4  ;;  %s4257_s1 = int_to_ptr.vmem [resolvable:$true] %s4256_s1 }
  0x21   :  { %v4642_v8 = vor.u32 %v6413_v6, %v4641_v5  ;;  %v4769_v9 = vld [vmem:[#allocation5 + $0x3e0] sm:$0xf]  ;;  %v6445_v10 = vld [vmem:[#allocation5 + $0x3ec] sm:$0xf0]  ;;  %1698 = vmatpush.bf16.msra.mxu0 %v4386_v3 }
  0x22   :  { %v4369_v11 = vld [vmem:[#allocation5 + $0xc0] sm:$0xf]  ;;  %v4770_v12 = vor.u32 %v6445_v10, %v4769_v9  ;;  %v6345_v13 = vld [vmem:[#allocation5 + $0xcc] sm:$0xf0]  ;;  %1711 = vmatpush.bf16.msra.mxu1 %v4514_v7 }
  0x23   :  { %v4497_v14 = vld [vmem:[#allocation5 + $0x1c0] sm:$0xf]  ;;  %v6377_v15 = vld [vmem:[#allocation5 + $0x1cc] sm:$0xf0]  ;;  %1724 = vmatpush.bf16.msra.mxu2 %v4642_v8  ;;  %v4370_v16 = vor.u32 %v6345_v13, %v4369_v11 }
  0x24   :  { %v4498_v17 = vor.u32 %v6377_v15, %v4497_v14  ;;  %v4625_v18 = vld [vmem:[#allocation5 + $0x2c0] sm:$0xf]  ;;  %v6409_v19 = vld [vmem:[#allocation5 + $0x2cc] sm:$0xf0]  ;;  %1737 = vmatpush.bf16.msra.mxu3 %v4770_v12 }
  0x25   :  { %v4753_v20 = vld [vmem:[#allocation5 + $0x3c0] sm:$0xf]  ;;  %v4626_v21 = vor.u32 %v6409_v19, %v4625_v18  ;;  %v6441_v22 = vld [vmem:[#allocation5 + $0x3cc] sm:$0xf0]  ;;  %1699 = vmatpush.bf16.msra.mxu0 %v4370_v16 }
  0x26   :  { %v4353_v23 = vld [vmem:[#allocation5 + $0xa0] sm:$0xf]  ;;  %v6341_v24 = vld [vmem:[#allocation5 + $0xac] sm:$0xf0]  ;;  %v4754_v25 = vor.u32 %v6441_v22, %v4753_v20  ;;  %1712 = vmatpush.bf16.msra.mxu1 %v4498_v17 }
  0x27   :  { %v4481_v26 = vld [vmem:[#allocation5 + $0x1a0] sm:$0xf]  ;;  %v6373_v27 = vld [vmem:[#allocation5 + $0x1ac] sm:$0xf0]  ;;  %v4354_v29 = vor.u32 %v6341_v24, %v4353_v23  ;;  %1725 = vmatpush.bf16.msra.mxu2 %v4626_v21 }
  0x28   :  { %v4609_v28 = vld [vmem:[#allocation5 + $0x2a0] sm:$0xf]  ;;  %v6405_v30 = vld [vmem:[#allocation5 + $0x2ac] sm:$0xf0]  ;;  %v4482_v33 = vor.u32 %v6373_v27, %v4481_v26  ;;  %1738 = vmatpush.bf16.msra.mxu3 %v4754_v25 }
  0x29   :  { %v4737_v31 = vld [vmem:[#allocation5 + $0x3a0] sm:$0xf]  ;;  %v6437_v32 = vld [vmem:[#allocation5 + $0x3ac] sm:$0xf0]  ;;  %v4610_v34 = vor.u32 %v6405_v30, %v4609_v28  ;;  %1700 = vmatpush.bf16.msra.mxu0 %v4354_v29 }
  0x2a   :  { %v4337_v35 = vld [vmem:[#allocation5 + $0x80] sm:$0xf]  ;;  %v6337_v36 = vld [vmem:[#allocation5 + $0x8c] sm:$0xf0]  ;;  %v4738_v38 = vor.u32 %v6437_v32, %v4737_v31  ;;  %1713 = vmatpush.bf16.msra.mxu1 %v4482_v33 }
  0x2b   :  { %v4465_v37 = vld [vmem:[#allocation5 + $0x180] sm:$0xf]  ;;  %v6369_v39 = vld [vmem:[#allocation5 + $0x18c] sm:$0xf0]  ;;  %v4338_v44 = vor.u32 %v6337_v36, %v4337_v35  ;;  %1726 = vmatpush.bf16.msra.mxu2 %v4610_v34 }
  0x2c   :  { %v4593_v40 = vld [vmem:[#allocation5 + $0x280] sm:$0xf]  ;;  %v6401_v41 = vld [vmem:[#allocation5 + $0x28c] sm:$0xf0]  ;;  %v4466_v45 = vor.u32 %v6369_v39, %v4465_v37  ;;  %1739 = vmatpush.bf16.msra.mxu3 %v4738_v38 }
  0x2d   :  { %v4721_v42 = vld [vmem:[#allocation5 + $0x380] sm:$0xf]  ;;  %v6433_v43 = vld [vmem:[#allocation5 + $0x38c] sm:$0xf0]  ;;  %v4594_v46 = vor.u32 %v6401_v41, %v4593_v40  ;;  %1701 = vmatpush.bf16.msra.mxu0 %v4338_v44 }
  0x2e   :  { %v4321_v47 = vld [vmem:[#allocation5 + $0x60] sm:$0xf]  ;;  %v6333_v48 = vld [vmem:[#allocation5 + $0x6c] sm:$0xf0]  ;;  %v4722_v50 = vor.u32 %v6433_v43, %v4721_v42  ;;  %1714 = vmatpush.bf16.msra.mxu1 %v4466_v45 }
  0x2f   :  { %v4449_v49 = vld [vmem:[#allocation5 + $0x160] sm:$0xf]  ;;  %v6365_v51 = vld [vmem:[#allocation5 + $0x16c] sm:$0xf0]  ;;  %v4322_v56 = vor.u32 %v6333_v48, %v4321_v47  ;;  %1727 = vmatpush.bf16.msra.mxu2 %v4594_v46 }
  0x30   :  { %v4577_v52 = vld [vmem:[#allocation5 + $0x260] sm:$0xf]  ;;  %v6397_v53 = vld [vmem:[#allocation5 + $0x26c] sm:$0xf0]  ;;  %v4450_v57 = vor.u32 %v6365_v51, %v4449_v49  ;;  %1740 = vmatpush.bf16.msra.mxu3 %v4722_v50 }
  0x31   :  { %v4705_v54 = vld [vmem:[#allocation5 + $0x360] sm:$0xf]  ;;  %v6429_v55 = vld [vmem:[#allocation5 + $0x36c] sm:$0xf0]  ;;  %v4578_v58 = vor.u32 %v6397_v53, %v4577_v52  ;;  %1702 = vmatpush.bf16.msra.mxu0 %v4322_v56 }
  0x32   :  { %v4305_v59 = vld [vmem:[#allocation5 + $0x40] sm:$0xf]  ;;  %v6329_v60 = vld [vmem:[#allocation5 + $0x4c] sm:$0xf0]  ;;  %v4706_v62 = vor.u32 %v6429_v55, %v4705_v54  ;;  %1715 = vmatpush.bf16.msra.mxu1 %v4450_v57 }
  0x33   :  { %v4433_v61 = vld [vmem:[#allocation5 + $0x140] sm:$0xf]  ;;  %v6361_v63 = vld [vmem:[#allocation5 + $0x14c] sm:$0xf0]  ;;  %v4306_v4 = vor.u32 %v6329_v60, %v4305_v59  ;;  %1728 = vmatpush.bf16.msra.mxu2 %v4578_v58 }
  0x34   :  { %v4561_v0 = vld [vmem:[#allocation5 + $0x240] sm:$0xf]  ;;  %v6393_v1 = vld [vmem:[#allocation5 + $0x24c] sm:$0xf0]  ;;  %v4434_v5 = vor.u32 %v6361_v63, %v4433_v61  ;;  %1741 = vmatpush.bf16.msra.mxu3 %v4706_v62 }
  0x35   :  { %v4689_v2 = vld [vmem:[#allocation5 + $0x340] sm:$0xf]  ;;  %v6425_v3 = vld [vmem:[#allocation5 + $0x34c] sm:$0xf0]  ;;  %v4562_v6 = vor.u32 %v6393_v1, %v4561_v0  ;;  %1703 = vmatpush.bf16.msra.mxu0 %v4306_v4 }
  0x36   :  { %v4289_v7 = vld [vmem:[#allocation5 + $0x20] sm:$0xf]  ;;  %v6325_v8 = vld [vmem:[#allocation5 + $0x2c] sm:$0xf0]  ;;  %v4690_v10 = vor.u32 %v6425_v3, %v4689_v2  ;;  %1716 = vmatpush.bf16.msra.mxu1 %v4434_v5 }
  0x37   :  { %v4417_v9 = vld [vmem:[#allocation5 + $0x120] sm:$0xf]  ;;  %v6357_v11 = vld [vmem:[#allocation5 + $0x12c] sm:$0xf0]  ;;  %v4290_v16 = vor.u32 %v6325_v8, %v4289_v7  ;;  %1729 = vmatpush.bf16.msra.mxu2 %v4562_v6 }
  0x38   :  { %v4545_v12 = vld [vmem:[#allocation5 + $0x220] sm:$0xf]  ;;  %v6389_v13 = vld [vmem:[#allocation5 + $0x22c] sm:$0xf0]  ;;  %v4418_v19 = vor.u32 %v6357_v11, %v4417_v9  ;;  %1742 = vmatpush.bf16.msra.mxu3 %v4690_v10  ;;  %v139_v10 = vld [vmem:[#allocation2 + $0x18] sm:$0xff] }
  0x39   :  { %v4673_v14 = vld [vmem:[#allocation5 + $0x320] sm:$0xf]  ;;  %v6421_v15 = vld [vmem:[#allocation5 + $0x32c] sm:$0xf0]  ;;  %v4546_v20 = vor.u32 %v6389_v13, %v4545_v12  ;;  %1704 = vmatpush.bf16.msra.mxu0 %v4290_v16 }
  0x3a   :  { %v4273_v17 = vld [vmem:[#allocation5] sm:$0xf]  ;;  %v6321_v18 = vld [vmem:[#allocation5 + $0xc] sm:$0xf0]  ;;  %v4674_v24 = vor.u32 %v6421_v15, %v4673_v14  ;;  %1717 = vmatpush.bf16.msra.mxu1 %v4418_v19  ;;  %v7134_v15 = vpack.c.bf16 %v139_v10, %v139_v10  ;;  %v137_v19 = vld [vmem:[#allocation2 + $0x8] sm:$0xff] }
  0x3b   :  { %v4401_v21 = vld [vmem:[#allocation5 + $0x100] sm:$0xf]  ;;  %v6353_v22 = vld [vmem:[#allocation5 + $0x10c] sm:$0xf0]  ;;  %v4274_v31 = vor.u32 %v6321_v18, %v4273_v17  ;;  %1730 = vmatpush.bf16.msra.mxu2 %v4546_v20  ;;  %v4515_v10 = vld [vmem:[#allocation5 + $0x1f0] sm:$0xf0] }
  0x3c   :  { %v4529_v23 = vld [vmem:[#allocation5 + $0x200] sm:$0xf]  ;;  %v6385_v25 = vld [vmem:[#allocation5 + $0x20c] sm:$0xf0]  ;;  %v4402_v35 = vor.u32 %v6353_v22, %v4401_v21  ;;  %1743 = vmatpush.bf16.msra.mxu3 %v4674_v24 }
  0x3d   :  { %v4657_v26 = vld [vmem:[#allocation5 + $0x300] sm:$0xf]  ;;  %v6417_v27 = vld [vmem:[#allocation5 + $0x30c] sm:$0xf0]  ;;  %v4530_v36 = vor.u32 %v6385_v25, %v4529_v23  ;;  %1705 = vmatpush.bf16.msra.mxu0 %v4274_v31  ;;  %v7139_v25 = vpack.c.bf16 %v137_v19, %v137_v19 }
  0x3e   :  { %v4897_v28 = vld [vmem:[#allocation5 + $0x4e0] sm:$0xf]  ;;  %v6477_v29 = vld [vmem:[#allocation5 + $0x4ec] sm:$0xf0]  ;;  %v4658_v39 = vor.u32 %v6417_v27, %v4657_v26  ;;  %1718 = vmatpush.bf16.msra.mxu1 %v4402_v35 }
  0x3f   :  { %v5025_v30 = vld [vmem:[#allocation5 + $0x5e0] sm:$0xf]  ;;  %v6509_v32 = vld [vmem:[#allocation5 + $0x5ec] sm:$0xf0]  ;;  %v4898_v40 = vor.u32 %v6477_v29, %v4897_v28  ;;  %1731 = vmatpush.bf16.msra.mxu2 %v4530_v36 }
  0x40   :  { %v5153_v33 = vld [vmem:[#allocation5 + $0x6e0] sm:$0xf]  ;;  %v6541_v34 = vld [vmem:[#allocation5 + $0x6ec] sm:$0xf0]  ;;  %v5026_v41 = vor.u32 %v6509_v32, %v5025_v30  ;;  %1744 = vmatpush.bf16.msra.mxu3 %v4658_v39 }
  0x41   :  { %v5281_v37 = vld [vmem:[#allocation5 + $0x7e0] sm:$0xf]  ;;  %v6573_v38 = vld [vmem:[#allocation5 + $0x7ec] sm:$0xf0]  ;;  %v5154_v42 = vor.u32 %v6541_v34, %v5153_v33  ;;  %1750 = vmatpush.bf16.msrb.mxu0 %v4898_v40  ;;  %1719 = vmatmul.bf16.vlgmr.msra.gmra.mxu1 %v7139_v25 }
  0x42   :  { %v4881_v43 = vld [vmem:[#allocation5 + $0x4c0] sm:$0xf]  ;;  %v6473_v44 = vld [vmem:[#allocation5 + $0x4cc] sm:$0xf0]  ;;  %v5282_v46 = vor.u32 %v6573_v38, %v5281_v37  ;;  %1763 = vmatpush.bf16.msrb.mxu1 %v5026_v41 }
  0x43   :  { %v5009_v45 = vld [vmem:[#allocation5 + $0x5c0] sm:$0xf]  ;;  %v6505_v47 = vld [vmem:[#allocation5 + $0x5cc] sm:$0xf0]  ;;  %v4882_v52 = vor.u32 %v6473_v44, %v4881_v43  ;;  %1776 = vmatpush.bf16.msrb.mxu2 %v5154_v42  ;;  %1745 = vmatmul.bf16.vlgmr.msra.gmra.mxu3 %v7134_v15 }
  0x44   :  { %v5137_v48 = vld [vmem:[#allocation5 + $0x6c0] sm:$0xf]  ;;  %v6537_v49 = vld [vmem:[#allocation5 + $0x6cc] sm:$0xf0]  ;;  %v5010_v54 = vor.u32 %v6505_v47, %v5009_v45  ;;  %1789 = vmatpush.bf16.msrb.mxu3 %v5282_v46 }
  0x45   :  { %v5265_v50 = vld [vmem:[#allocation5 + $0x7c0] sm:$0xf]  ;;  %v6569_v51 = vld [vmem:[#allocation5 + $0x7cc] sm:$0xf0]  ;;  %v5138_v55 = vor.u32 %v6537_v49, %v5137_v48  ;;  %1751 = vmatpush.bf16.msrb.mxu0 %v4882_v52 }
  0x46   :  { %v4865_v53 = vld [vmem:[#allocation5 + $0x4a0] sm:$0xf]  ;;  %v6469_v56 = vld [vmem:[#allocation5 + $0x4ac] sm:$0xf0]  ;;  %v5266_v59 = vor.u32 %v6569_v51, %v5265_v50  ;;  %1764 = vmatpush.bf16.msrb.mxu1 %v5010_v54 }
  0x47   :  { %v4993_v57 = vld [vmem:[#allocation5 + $0x5a0] sm:$0xf]  ;;  %v6501_v58 = vld [vmem:[#allocation5 + $0x5ac] sm:$0xf0]  ;;  %v4866_v0 = vor.u32 %v6469_v56, %v4865_v53  ;;  %1777 = vmatpush.bf16.msrb.mxu2 %v5138_v55 }
  0x48   :  { %v5121_v60 = vld [vmem:[#allocation5 + $0x6a0] sm:$0xf]  ;;  %v6533_v61 = vld [vmem:[#allocation5 + $0x6ac] sm:$0xf0]  ;;  %v4994_v1 = vor.u32 %v6501_v58, %v4993_v57  ;;  %1790 = vmatpush.bf16.msrb.mxu3 %v5266_v59 }
  0x49   :  { %v5249_v62 = vld [vmem:[#allocation5 + $0x7a0] sm:$0xf]  ;;  %v6565_v63 = vld [vmem:[#allocation5 + $0x7ac] sm:$0xf0]  ;;  %v5122_v5 = vor.u32 %v6533_v61, %v5121_v60  ;;  %1752 = vmatpush.bf16.msrb.mxu0 %v4866_v0 }
  0x4a   :  { %v4849_v2 = vld [vmem:[#allocation5 + $0x480] sm:$0xf]  ;;  %v138_v3 = vld [vmem:[#allocation2 + $0x10] sm:$0xff]  ;;  %v5250_v11 = vor.u32 %v6565_v63, %v5249_v62  ;;  %1765 = vmatpush.bf16.msrb.mxu1 %v4994_v1 }
  0x4b   :  { %v136_v4 = vld [vmem:[#allocation2] sm:$0xff]  ;;  %v6465_v6 = vld [vmem:[#allocation5 + $0x48c] sm:$0xf0]  ;;  %v7130_v8 = vpack.c.bf16 %v138_v3, %v138_v3  ;;  %1778 = vmatpush.bf16.msrb.mxu2 %v5122_v5  ;;  %v4387_v5 = vld [vmem:[#allocation5 + $0xf0] sm:$0xf0] }
  0x4c   :  { %v4977_v7 = vld [vmem:[#allocation5 + $0x580] sm:$0xf]  ;;  %v7132_v9 = vpack.c.bf16 %v136_v4, %v136_v4  ;;  %v6497_v12 = vld [vmem:[#allocation5 + $0x58c] sm:$0xf0]  ;;  %v4850_v18 = vor.u32 %v6465_v6, %v4849_v2  ;;  %1791 = vmatpush.bf16.msrb.mxu3 %v5250_v11  ;;  %v6347_v4 = vld [vmem:[#allocation5 + $0xe4] sm:$0xf] }
  0x4d   :  { %v5105_v13 = vld [vmem:[#allocation5 + $0x680] sm:$0xf]  ;;  %v6529_v14 = vld [vmem:[#allocation5 + $0x68c] sm:$0xf0]  ;;  %1732 = vmatmul.bf16.vlgmr.msra.gmra.mxu2 %v7130_v8  ;;  %v4978_v20 = vor.u32 %v6497_v12, %v4977_v7  ;;  %v6379_v6 = vld [vmem:[#allocation5 + $0x1e4] sm:$0xf] }
  0x4e   :  { %v5233_v16 = vld [vmem:[#allocation5 + $0x780] sm:$0xf]  ;;  %v6561_v17 = vld [vmem:[#allocation5 + $0x78c] sm:$0xf0]  ;;  %1706 = vmatmul.bf16.vlgmr.msra.gmra.mxu0 %v7132_v9  ;;  %v5106_v21 = vor.u32 %v6529_v14, %v5105_v13  ;;  %v6411_v11 = vld [vmem:[#allocation5 + $0x2e4] sm:$0xf] }
  0x4f   :  { %v4833_v22 = vld [vmem:[#allocation5 + $0x460] sm:$0xf]  ;;  %v6461_v23 = vld [vmem:[#allocation5 + $0x46c] sm:$0xf0]  ;;  %v5234_v26 = vor.u32 %v6561_v17, %v5233_v16  ;;  %1753 = vmatpush.bf16.msrb.mxu0 %v4850_v18  ;;  %1766 = vmatpush.bf16.msrb.mxu1 %v4978_v20  ;;  %v4643_v12 = vld [vmem:[#allocation5 + $0x2f0] sm:$0xf0]  ;;  %v4390_v20 = vor.u32 %v6347_v4, %v4387_v5 }
  0x50   :  { %v4961_v24 = vld [vmem:[#allocation5 + $0x560] sm:$0xf]  ;;  %v6493_v27 = vld [vmem:[#allocation5 + $0x56c] sm:$0xf0]  ;;  %v4834_v32 = vor.u32 %v6461_v23, %v4833_v22  ;;  %1779 = vmatpush.bf16.msrb.mxu2 %v5106_v21  ;;  %v6443_v16 = vld [vmem:[#allocation5 + $0x3e4] sm:$0xf] }
  0x51   :  { %v5089_v28 = vld [vmem:[#allocation5 + $0x660] sm:$0xf]  ;;  %v6525_v29 = vld [vmem:[#allocation5 + $0x66c] sm:$0xf0]  ;;  %v4962_v33 = vor.u32 %v6493_v27, %v4961_v24  ;;  %1792 = vmatpush.bf16.msrb.mxu3 %v5234_v26  ;;  %v4771_v17 = vld [vmem:[#allocation5 + $0x3f0] sm:$0xf0]  ;;  %v4518_v24 = vor.u32 %v6379_v6, %v4515_v10  ;;  %v4646_v26 = vor.u32 %v6411_v11, %v4643_v12 }
  0x52   :  { %v5217_v30 = vld [vmem:[#allocation5 + $0x760] sm:$0xf]  ;;  %v6557_v31 = vld [vmem:[#allocation5 + $0x76c] sm:$0xf0]  ;;  %v5090_v34 = vor.u32 %v6525_v29, %v5089_v28  ;;  %v6343_v21 = vld [vmem:[#allocation5 + $0xc4] sm:$0xf] }
  0x53   :  { %v4817_v35 = vld [vmem:[#allocation5 + $0x440] sm:$0xf]  ;;  %v6457_v36 = vld [vmem:[#allocation5 + $0x44c] sm:$0xf0]  ;;  %v5218_v38 = vor.u32 %v6557_v31, %v5217_v30  ;;  %1754 = vmatpush.bf16.msrb.mxu0 %v4834_v32  ;;  %1767 = vmatpush.bf16.msrb.mxu1 %v4962_v33  ;;  %v143_v23 = vld [vmem:[#allocation2 + $0x38] sm:$0xff]  ;;  %v4774_v30 = vor.u32 %v6443_v16, %v4771_v17 }
  0x54   :  { %v4945_v37 = vld [vmem:[#allocation5 + $0x540] sm:$0xf]  ;;  %v6489_v39 = vld [vmem:[#allocation5 + $0x54c] sm:$0xf0]  ;;  %v4818_v44 = vor.u32 %v6457_v36, %v4817_v35  ;;  %1780 = vmatpush.bf16.msrb.mxu2 %v5090_v34  ;;  %v4371_v27 = vld [vmem:[#allocation5 + $0xd0] sm:$0xf0] }
  0x55   :  { %v5073_v40 = vld [vmem:[#allocation5 + $0x640] sm:$0xf]  ;;  %v6521_v41 = vld [vmem:[#allocation5 + $0x64c] sm:$0xf0]  ;;  %v4946_v45 = vor.u32 %v6489_v39, %v4945_v37  ;;  %1793 = vmatpush.bf16.msrb.mxu3 %v5218_v38  ;;  %v6375_v28 = vld [vmem:[#allocation5 + $0x1c4] sm:$0xf]  ;;  %v7146_v38 = vpack.c.bf16 %v143_v23, %v143_v23  ;;  %v4374_v39 = vor.u32 %v6343_v21, %v4371_v27 }
  0x56   :  { %v5201_v42 = vld [vmem:[#allocation5 + $0x740] sm:$0xf]  ;;  %v6553_v43 = vld [vmem:[#allocation5 + $0x74c] sm:$0xf0]  ;;  %v5074_v46 = vor.u32 %v6521_v41, %v5073_v40  ;;  %v141_v29 = vld [vmem:[#allocation2 + $0x28] sm:$0xff] }
  0x57   :  { %v4801_v47 = vld [vmem:[#allocation5 + $0x420] sm:$0xf]  ;;  %v6453_v48 = vld [vmem:[#allocation5 + $0x42c] sm:$0xf0]  ;;  %v5202_v50 = vor.u32 %v6553_v43, %v5201_v42  ;;  %1755 = vmatpush.bf16.msrb.mxu0 %v4818_v44  ;;  %1768 = vmatpush.bf16.msrb.mxu1 %v4946_v45  ;;  %v4499_v31 = vld [vmem:[#allocation5 + $0x1d0] sm:$0xf0]  ;;  %v7148_v40 = vpack.c.bf16 %v141_v29, %v141_v29 }
  0x58   :  { %v4929_v49 = vld [vmem:[#allocation5 + $0x520] sm:$0xf]  ;;  %v6485_v51 = vld [vmem:[#allocation5 + $0x52c] sm:$0xf0]  ;;  %v4802_v56 = vor.u32 %v6453_v48, %v4801_v47  ;;  %1781 = vmatpush.bf16.msrb.mxu2 %v5074_v46  ;;  %v6407_v32 = vld [vmem:[#allocation5 + $0x2c4] sm:$0xf]  ;;  %v4502_v41 = vor.u32 %v6375_v28, %v4499_v31 }
  0x59   :  { %v5057_v52 = vld [vmem:[#allocation5 + $0x620] sm:$0xf]  ;;  %v6517_v53 = vld [vmem:[#allocation5 + $0x62c] sm:$0xf0]  ;;  %v4930_v59 = vor.u32 %v6485_v51, %v4929_v49  ;;  %1794 = vmatpush.bf16.msrb.mxu3 %v5202_v50  ;;  %v4627_v33 = vld [vmem:[#allocation5 + $0x2d0] sm:$0xf0] }
  0x5a   :  { %v5185_v54 = vld [vmem:[#allocation5 + $0x720] sm:$0xf]  ;;  %v6549_v55 = vld [vmem:[#allocation5 + $0x72c] sm:$0xf0]  ;;  %v5058_v60 = vor.u32 %v6517_v53, %v5057_v52  ;;  %v6439_v35 = vld [vmem:[#allocation5 + $0x3c4] sm:$0xf]  ;;  %v4630_v42 = vor.u32 %v6407_v32, %v4627_v33 }
  0x5b   :  { %v4785_v57 = vld [vmem:[#allocation5 + $0x400] sm:$0xf]  ;;  %v6449_v58 = vld [vmem:[#allocation5 + $0x40c] sm:$0xf0]  ;;  %v5186_v0 = vor.u32 %v6549_v55, %v5185_v54  ;;  %1756 = vmatpush.bf16.msrb.mxu0 %v4802_v56  ;;  %1769 = vmatpush.bf16.msrb.mxu1 %v4930_v59  ;;  %v4755_v36 = vld [vmem:[#allocation5 + $0x3d0] sm:$0xf0] }
  0x5c   :  { %v4913_v61 = vld [vmem:[#allocation5 + $0x500] sm:$0xf]  ;;  %v6481_v62 = vld [vmem:[#allocation5 + $0x50c] sm:$0xf0]  ;;  %v4786_v7 = vor.u32 %v6449_v58, %v4785_v57  ;;  %1782 = vmatpush.bf16.msrb.mxu2 %v5058_v60  ;;  %v6339_v43 = vld [vmem:[#allocation5 + $0xa4] sm:$0xf]  ;;  %v4758_v46 = vor.u32 %v6439_v35, %v4755_v36 }
  0x5d   :  { %v5041_v63 = vld [vmem:[#allocation5 + $0x600] sm:$0xf]  ;;  %v6513_v1 = vld [vmem:[#allocation5 + $0x60c] sm:$0xf0]  ;;  %v4914_v13 = vor.u32 %v6481_v62, %v4913_v61  ;;  %1795 = vmatpush.bf16.msrb.mxu3 %v5186_v0  ;;  %v4355_v44 = vld [vmem:[#allocation5 + $0xb0] sm:$0xf0] }
  0x5e   :  { %v5169_v2 = vld [vmem:[#allocation5 + $0x700] sm:$0xf]  ;;  %v6545_v3 = vld [vmem:[#allocation5 + $0x70c] sm:$0xf0]  ;;  %v5042_v14 = vor.u32 %v6513_v1, %v5041_v63  ;;  %v6371_v45 = vld [vmem:[#allocation5 + $0x1a4] sm:$0xf]  ;;  %v4358_v52 = vor.u32 %v6339_v43, %v4355_v44 }
  0x5f   :  { %v142_v18 = vld [vmem:[#allocation2 + $0x30] sm:$0xff]  ;;  %v5170_v19 = vor.u32 %v6545_v3, %v5169_v2  ;;  %v140_v22 = vld [vmem:[#allocation2 + $0x20] sm:$0xff]  ;;  %1757 = vmatpush.bf16.msrb.mxu0 %v4786_v7  ;;  %1770 = vmatpush.bf16.msrb.mxu1 %v4914_v13 }
  0x60   :  { %v7142_v34 = vpack.c.bf16 %v142_v18, %v142_v18  ;;  %1783 = vmatpush.bf16.msrb.mxu2 %v5042_v14  ;;  %v7144_v37 = vpack.c.bf16 %v140_v22, %v140_v22  ;;  %v4483_v47 = vld [vmem:[#allocation5 + $0x1b0] sm:$0xf0]  ;;  %v6403_v48 = vld [vmem:[#allocation5 + $0x2a4] sm:$0xf] }
  0x61   :  { %1796 = vmatpush.bf16.msrb.mxu3 %v5170_v19  ;;  %v4611_v49 = vld [vmem:[#allocation5 + $0x2b0] sm:$0xf0]  ;;  %v6435_v50 = vld [vmem:[#allocation5 + $0x3a4] sm:$0xf]  ;;  %v4486_v53 = vor.u32 %v6371_v45, %v4483_v47 }
  0x62   :  { %v4739_v51 = vld [vmem:[#allocation5 + $0x3b0] sm:$0xf0]  ;;  %1758 = vmatmul.bf16.vlgmr.msrb.gmra.mxu0 %v7144_v37  ;;  %1771 = vmatmul.bf16.vlgmr.msrb.gmra.mxu1 %v7148_v40  ;;  %v4614_v54 = vor.u32 %v6403_v48, %v4611_v49  ;;  %v6335_v55 = vld [vmem:[#allocation5 + $0x84] sm:$0xf] }
  0x63   :  { %1802 = vmatpush.bf16.msra.mxu0 %v4390_v20  ;;  %1815 = vmatpush.bf16.msra.mxu1 %v4518_v24  ;;  %v4339_v56 = vld [vmem:[#allocation5 + $0x90] sm:$0xf0]  ;;  %v6367_v57 = vld [vmem:[#allocation5 + $0x184] sm:$0xf]  ;;  %v4742_v58 = vor.u32 %v6435_v50, %v4739_v51 }
  0x64   :  { %1828 = vmatpush.bf16.msra.mxu2 %v4646_v26  ;;  %1797 = vmatmul.bf16.vlgmr.msrb.gmra.mxu3 %v7146_v38  ;;  %v4467_v59 = vld [vmem:[#allocation5 + $0x190] sm:$0xf0]  ;;  %v6399_v60 = vld [vmem:[#allocation5 + $0x284] sm:$0xf]  ;;  %v4342_v0 = vor.u32 %v6335_v55, %v4339_v56 }
  0x65   :  { %1841 = vmatpush.bf16.msra.mxu3 %v4774_v30  ;;  %1784 = vmatmul.bf16.vlgmr.msrb.gmra.mxu2 %v7142_v34  ;;  %v4595_v61 = vld [vmem:[#allocation5 + $0x290] sm:$0xf0]  ;;  %v6431_v62 = vld [vmem:[#allocation5 + $0x384] sm:$0xf]  ;;  %v4470_v1 = vor.u32 %v6367_v57, %v4467_v59 }
  0x66   :  { %v4723_v63 = vld [vmem:[#allocation5 + $0x390] sm:$0xf0]  ;;  %v4598_v2 = vor.u32 %v6399_v60, %v4595_v61  ;;  %v6331_v3 = vld [vmem:[#allocation5 + $0x64] sm:$0xf] }
  0x67   :  { %1803 = vmatpush.bf16.msra.mxu0 %v4374_v39  ;;  %1816 = vmatpush.bf16.msra.mxu1 %v4502_v41  ;;  %v4323_v4 = vld [vmem:[#allocation5 + $0x70] sm:$0xf0]  ;;  %v6363_v5 = vld [vmem:[#allocation5 + $0x164] sm:$0xf]  ;;  %v4726_v6 = vor.u32 %v6431_v62, %v4723_v63 }
  0x68   :  { %1829 = vmatpush.bf16.msra.mxu2 %v4630_v42  ;;  %v4451_v7 = vld [vmem:[#allocation5 + $0x170] sm:$0xf0]  ;;  %v6395_v10 = vld [vmem:[#allocation5 + $0x264] sm:$0xf]  ;;  %v4326_v14 = vor.u32 %v6331_v3, %v4323_v4 }
  0x69   :  { %1842 = vmatpush.bf16.msra.mxu3 %v4758_v46  ;;  %v4579_v11 = vld [vmem:[#allocation5 + $0x270] sm:$0xf0]  ;;  %v6427_v12 = vld [vmem:[#allocation5 + $0x364] sm:$0xf]  ;;  %v4454_v16 = vor.u32 %v6363_v5, %v4451_v7 }
  0x6a   :  { %v4707_v13 = vld [vmem:[#allocation5 + $0x370] sm:$0xf0]  ;;  %v4582_v17 = vor.u32 %v6395_v10, %v4579_v11  ;;  %v6327_v18 = vld [vmem:[#allocation5 + $0x44] sm:$0xf] }
  0x6b   :  { %1804 = vmatpush.bf16.msra.mxu0 %v4358_v52  ;;  %1817 = vmatpush.bf16.msra.mxu1 %v4486_v53  ;;  %v4307_v19 = vld [vmem:[#allocation5 + $0x50] sm:$0xf0]  ;;  %v6359_v20 = vld [vmem:[#allocation5 + $0x144] sm:$0xf]  ;;  %v4710_v21 = vor.u32 %v6427_v12, %v4707_v13 }
  0x6c   :  { %1830 = vmatpush.bf16.msra.mxu2 %v4614_v54  ;;  %v4435_v22 = vld [vmem:[#allocation5 + $0x150] sm:$0xf0]  ;;  %v6391_v23 = vld [vmem:[#allocation5 + $0x244] sm:$0xf]  ;;  %v4310_v28 = vor.u32 %v6327_v18, %v4307_v19 }
  0x6d   :  { %1843 = vmatpush.bf16.msra.mxu3 %v4742_v58  ;;  %v4563_v24 = vld [vmem:[#allocation5 + $0x250] sm:$0xf0]  ;;  %v6423_v26 = vld [vmem:[#allocation5 + $0x344] sm:$0xf]  ;;  %v4438_v29 = vor.u32 %v6359_v20, %v4435_v22 }
  0x6e   :  { %v4691_v27 = vld [vmem:[#allocation5 + $0x350] sm:$0xf0]  ;;  %v4566_v30 = vor.u32 %v6391_v23, %v4563_v24  ;;  %v6323_v31 = vld [vmem:[#allocation5 + $0x24] sm:$0xf] }
  0x6f   :  { %1805 = vmatpush.bf16.msra.mxu0 %v4342_v0  ;;  %1818 = vmatpush.bf16.msra.mxu1 %v4470_v1  ;;  %v4291_v32 = vld [vmem:[#allocation5 + $0x30] sm:$0xf0]  ;;  %v6355_v33 = vld [vmem:[#allocation5 + $0x124] sm:$0xf]  ;;  %v4694_v35 = vor.u32 %v6423_v26, %v4691_v27 }
  0x70   :  { %1831 = vmatpush.bf16.msra.mxu2 %v4598_v2  ;;  %v4419_v36 = vld [vmem:[#allocation5 + $0x130] sm:$0xf0]  ;;  %v6387_v39 = vld [vmem:[#allocation5 + $0x224] sm:$0xf]  ;;  %v4294_v44 = vor.u32 %v6323_v31, %v4291_v32 }
  0x71   :  { %1844 = vmatpush.bf16.msra.mxu3 %v4726_v6  ;;  %v4547_v41 = vld [vmem:[#allocation5 + $0x230] sm:$0xf0]  ;;  %v6419_v42 = vld [vmem:[#allocation5 + $0x324] sm:$0xf]  ;;  %v4422_v47 = vor.u32 %v6355_v33, %v4419_v36 }
  0x72   :  { %v4675_v43 = vld [vmem:[#allocation5 + $0x330] sm:$0xf0]  ;;  %v6319_v45 = vld [vmem:[#allocation5 + $0x4] sm:$0xf]  ;;  %v4550_v48 = vor.u32 %v6387_v39, %v4547_v41 }
  0x73   :  { %1806 = vmatpush.bf16.msra.mxu0 %v4326_v14  ;;  %1819 = vmatpush.bf16.msra.mxu1 %v4454_v16  ;;  %v4275_v46 = vld [vmem:[#allocation5 + $0x10] sm:$0xf0]  ;;  %v6351_v49 = vld [vmem:[#allocation5 + $0x104] sm:$0xf]  ;;  %v4678_v52 = vor.u32 %v6419_v42, %v4675_v43 }
  0x74   :  { %1832 = vmatpush.bf16.msra.mxu2 %v4582_v17  ;;  %v4403_v50 = vld [vmem:[#allocation5 + $0x110] sm:$0xf0]  ;;  %v6383_v51 = vld [vmem:[#allocation5 + $0x204] sm:$0xf]  ;;  %v4278_v59 = vor.u32 %v6319_v45, %v4275_v46 }
  0x75   :  { %1845 = vmatpush.bf16.msra.mxu3 %v4710_v21  ;;  %v4531_v53 = vld [vmem:[#allocation5 + $0x210] sm:$0xf0]  ;;  %v6415_v54 = vld [vmem:[#allocation5 + $0x304] sm:$0xf]  ;;  %v4406_v63 = vor.u32 %v6351_v49, %v4403_v50 }
  0x76   :  { %v4659_v55 = vld [vmem:[#allocation5 + $0x310] sm:$0xf0]  ;;  %v6475_v56 = vld [vmem:[#allocation5 + $0x4e4] sm:$0xf]  ;;  %v4534_v0 = vor.u32 %v6383_v51, %v4531_v53 }
  0x77   :  { %1807 = vmatpush.bf16.msra.mxu0 %v4310_v28  ;;  %1820 = vmatpush.bf16.msra.mxu1 %v4438_v29  ;;  %v4899_v57 = vld [vmem:[#allocation5 + $0x4f0] sm:$0xf0]  ;;  %v6507_v58 = vld [vmem:[#allocation5 + $0x5e4] sm:$0xf]  ;;  %v4662_v3 = vor.u32 %v6415_v54, %v4659_v55 }
  0x78   :  { %1833 = vmatpush.bf16.msra.mxu2 %v4566_v30  ;;  %v5027_v60 = vld [vmem:[#allocation5 + $0x5f0] sm:$0xf0]  ;;  %v6539_v61 = vld [vmem:[#allocation5 + $0x6e4] sm:$0xf]  ;;  %v4902_v4 = vor.u32 %v6475_v56, %v4899_v57 }
  0x79   :  { %1846 = vmatpush.bf16.msra.mxu3 %v4694_v35  ;;  %v5155_v62 = vld [vmem:[#allocation5 + $0x6f0] sm:$0xf0]  ;;  %v6571_v1 = vld [vmem:[#allocation5 + $0x7e4] sm:$0xf]  ;;  %v5030_v5 = vor.u32 %v6507_v58, %v5027_v60 }
  0x7a   :  { %v5283_v2 = vld [vmem:[#allocation5 + $0x7f0] sm:$0xf0]  ;;  %v5158_v6 = vor.u32 %v6539_v61, %v5155_v62  ;;  %v6471_v7 = vld [vmem:[#allocation5 + $0x4c4] sm:$0xf] }
  0x7b   :  { %1808 = vmatpush.bf16.msra.mxu0 %v4294_v44  ;;  %1821 = vmatpush.bf16.msra.mxu1 %v4422_v47  ;;  %v4883_v10 = vld [vmem:[#allocation5 + $0x4d0] sm:$0xf0]  ;;  %v6503_v11 = vld [vmem:[#allocation5 + $0x5c4] sm:$0xf]  ;;  %v5286_v12 = vor.u32 %v6571_v1, %v5283_v2 }
  0x7c   :  { %1834 = vmatpush.bf16.msra.mxu2 %v4550_v48  ;;  %v5011_v13 = vld [vmem:[#allocation5 + $0x5d0] sm:$0xf0]  ;;  %v6535_v14 = vld [vmem:[#allocation5 + $0x6c4] sm:$0xf]  ;;  %v4886_v19 = vor.u32 %v6471_v7, %v4883_v10 }
  0x7d   :  { %1847 = vmatpush.bf16.msra.mxu3 %v4678_v52  ;;  %v5139_v16 = vld [vmem:[#allocation5 + $0x6d0] sm:$0xf0]  ;;  %v6567_v17 = vld [vmem:[#allocation5 + $0x7c4] sm:$0xf]  ;;  %v5014_v20 = vor.u32 %v6503_v11, %v5011_v13 }
  0x7e   :  { %v5267_v18 = vld [vmem:[#allocation5 + $0x7d0] sm:$0xf0]  ;;  %v5142_v21 = vor.u32 %v6535_v14, %v5139_v16  ;;  %v6467_v22 = vld [vmem:[#allocation5 + $0x4a4] sm:$0xf] }
  0x7f   :  { %1809 = vmatpush.bf16.msra.mxu0 %v4278_v59  ;;  %1822 = vmatpush.bf16.msra.mxu1 %v4406_v63  ;;  %v4867_v23 = vld [vmem:[#allocation5 + $0x4b0] sm:$0xf0]  ;;  %v6499_v24 = vld [vmem:[#allocation5 + $0x5a4] sm:$0xf]  ;;  %v5270_v26 = vor.u32 %v6567_v17, %v5267_v18 }
  0x80   :  { %1835 = vmatpush.bf16.msra.mxu2 %v4534_v0  ;;  %v4995_v27 = vld [vmem:[#allocation5 + $0x5b0] sm:$0xf0]  ;;  %v6531_v28 = vld [vmem:[#allocation5 + $0x6a4] sm:$0xf]  ;;  %v4870_v32 = vor.u32 %v6467_v22, %v4867_v23 }
  0x81   :  { %1848 = vmatpush.bf16.msra.mxu3 %v4662_v3  ;;  %v5123_v29 = vld [vmem:[#allocation5 + $0x6b0] sm:$0xf0]  ;;  %v6563_v30 = vld [vmem:[#allocation5 + $0x7a4] sm:$0xf]  ;;  %v4998_v33 = vor.u32 %v6499_v24, %v4995_v27 }
  0x82   :  { %v5251_v31 = vld [vmem:[#allocation5 + $0x7b0] sm:$0xf0]  ;;  %1810 = vmatmul.bf16.vlgmr.msra.gmra.mxu0 %v7132_v9  ;;  %1823 = vmatmul.bf16.vlgmr.msra.gmra.mxu1 %v7139_v25  ;;  %v5126_v35 = vor.u32 %v6531_v28, %v5123_v29  ;;  %v6463_v36 = vld [vmem:[#allocation5 + $0x484] sm:$0xf] }
  0x83   :  { %1854 = vmatpush.bf16.msrb.mxu0 %v4902_v4  ;;  %1867 = vmatpush.bf16.msrb.mxu1 %v5030_v5  ;;  %v4851_v39 = vld [vmem:[#allocation5 + $0x490] sm:$0xf0]  ;;  %v6495_v41 = vld [vmem:[#allocation5 + $0x584] sm:$0xf]  ;;  %v5254_v42 = vor.u32 %v6563_v30, %v5251_v31 }
  0x84   :  { %1880 = vmatpush.bf16.msrb.mxu2 %v5158_v6  ;;  %1849 = vmatmul.bf16.vlgmr.msra.gmra.mxu3 %v7134_v15  ;;  %v4979_v43 = vld [vmem:[#allocation5 + $0x590] sm:$0xf0]  ;;  %v6527_v44 = vld [vmem:[#allocation5 + $0x684] sm:$0xf]  ;;  %v4854_v48 = vor.u32 %v6463_v36, %v4851_v39  ;;  %v4393_v39 = vld [vmem:[#allocation5 + $0xe8] sm:$0xf] }
  0x85   :  { %1893 = vmatpush.bf16.msrb.mxu3 %v5286_v12  ;;  %1836 = vmatmul.bf16.vlgmr.msra.gmra.mxu2 %v7130_v8  ;;  %v5107_v45 = vld [vmem:[#allocation5 + $0x690] sm:$0xf0]  ;;  %v6559_v46 = vld [vmem:[#allocation5 + $0x784] sm:$0xf]  ;;  %v4982_v49 = vor.u32 %v6495_v41, %v4979_v43  ;;  %v6350_v41 = vld [vmem:[#allocation5 + $0xf4] sm:$0xf0] }
  0x86   :  { %v5235_v47 = vld [vmem:[#allocation5 + $0x790] sm:$0xf0]  ;;  %v5110_v50 = vor.u32 %v6527_v44, %v5107_v45  ;;  %v6459_v51 = vld [vmem:[#allocation5 + $0x464] sm:$0xf]  ;;  %v6382_v44 = vld [vmem:[#allocation5 + $0x1f4] sm:$0xf0] }
  0x87   :  { %1855 = vmatpush.bf16.msrb.mxu0 %v4886_v19  ;;  %1868 = vmatpush.bf16.msrb.mxu1 %v5014_v20  ;;  %v4835_v52 = vld [vmem:[#allocation5 + $0x470] sm:$0xf0]  ;;  %v6491_v53 = vld [vmem:[#allocation5 + $0x564] sm:$0xf]  ;;  %v5238_v54 = vor.u32 %v6559_v46, %v5235_v47  ;;  %v4649_v45 = vld [vmem:[#allocation5 + $0x2e8] sm:$0xf] }
  0x88   :  { %1881 = vmatpush.bf16.msrb.mxu2 %v5142_v21  ;;  %v4963_v55 = vld [vmem:[#allocation5 + $0x570] sm:$0xf0]  ;;  %v6523_v56 = vld [vmem:[#allocation5 + $0x664] sm:$0xf]  ;;  %v4838_v60 = vor.u32 %v6459_v51, %v4835_v52  ;;  %v6414_v46 = vld [vmem:[#allocation5 + $0x2f4] sm:$0xf0]  ;;  %v4394_v52 = vor.u32 %v6350_v41, %v4393_v39 }
  0x89   :  { %1894 = vmatpush.bf16.msrb.mxu3 %v5270_v26  ;;  %v5091_v57 = vld [vmem:[#allocation5 + $0x670] sm:$0xf0]  ;;  %v6555_v58 = vld [vmem:[#allocation5 + $0x764] sm:$0xf]  ;;  %v4966_v61 = vor.u32 %v6491_v53, %v4963_v55  ;;  %v4377_v55 = vld [vmem:[#allocation5 + $0xc8] sm:$0xf] }
  0x8a   :  { %v5219_v59 = vld [vmem:[#allocation5 + $0x770] sm:$0xf0]  ;;  %v5094_v62 = vor.u32 %v6523_v56, %v5091_v57  ;;  %v6455_v63 = vld [vmem:[#allocation5 + $0x444] sm:$0xf]  ;;  %v6346_v56 = vld [vmem:[#allocation5 + $0xd4] sm:$0xf0] }
  0x8b   :  { %1856 = vmatpush.bf16.msrb.mxu0 %v4870_v32  ;;  %1869 = vmatpush.bf16.msrb.mxu1 %v4998_v33  ;;  %v4819_v0 = vld [vmem:[#allocation5 + $0x450] sm:$0xf0]  ;;  %v6487_v1 = vld [vmem:[#allocation5 + $0x544] sm:$0xf]  ;;  %v5222_v2 = vor.u32 %v6555_v58, %v5219_v59  ;;  %v4505_v57 = vld [vmem:[#allocation5 + $0x1c8] sm:$0xf] }
  0x8c   :  { %1882 = vmatpush.bf16.msrb.mxu2 %v5126_v35  ;;  %v4947_v3 = vld [vmem:[#allocation5 + $0x550] sm:$0xf0]  ;;  %v6519_v4 = vld [vmem:[#allocation5 + $0x644] sm:$0xf]  ;;  %v4822_v10 = vor.u32 %v6455_v63, %v4819_v0  ;;  %v6378_v59 = vld [vmem:[#allocation5 + $0x1d4] sm:$0xf0]  ;;  %v4378_v0 = vor.u32 %v6346_v56, %v4377_v55 }
  0x8d   :  { %1895 = vmatpush.bf16.msrb.mxu3 %v5254_v42  ;;  %v5075_v5 = vld [vmem:[#allocation5 + $0x650] sm:$0xf0]  ;;  %v6551_v6 = vld [vmem:[#allocation5 + $0x744] sm:$0xf]  ;;  %v4950_v11 = vor.u32 %v6487_v1, %v4947_v3  ;;  %v4521_v42 = vld [vmem:[#allocation5 + $0x1e8] sm:$0xf]  ;;  %v4506_v1 = vor.u32 %v6378_v59, %v4505_v57 }
  0x8e   :  { %v5203_v7 = vld [vmem:[#allocation5 + $0x750] sm:$0xf0]  ;;  %v5078_v12 = vor.u32 %v6519_v4, %v5075_v5  ;;  %v6451_v13 = vld [vmem:[#allocation5 + $0x424] sm:$0xf]  ;;  %v4522_v53 = vor.u32 %v6382_v44, %v4521_v42  ;;  %v6442_v63 = vld [vmem:[#allocation5 + $0x3d4] sm:$0xf0] }
  0x8f   :  { %1857 = vmatpush.bf16.msrb.mxu0 %v4854_v48  ;;  %1870 = vmatpush.bf16.msrb.mxu1 %v4982_v49  ;;  %v4803_v14 = vld [vmem:[#allocation5 + $0x430] sm:$0xf0]  ;;  %v6483_v16 = vld [vmem:[#allocation5 + $0x524] sm:$0xf]  ;;  %v5206_v17 = vor.u32 %v6551_v6, %v5203_v7  ;;  %v4777_v49 = vld [vmem:[#allocation5 + $0x3e8] sm:$0xf] }
  0x90   :  { %1883 = vmatpush.bf16.msrb.mxu2 %v5110_v50  ;;  %v4931_v18 = vld [vmem:[#allocation5 + $0x530] sm:$0xf0]  ;;  %v6515_v19 = vld [vmem:[#allocation5 + $0x624] sm:$0xf]  ;;  %v4806_v23 = vor.u32 %v6451_v13, %v4803_v14  ;;  %v6446_v50 = vld [vmem:[#allocation5 + $0x3f4] sm:$0xf0] }
  0x91   :  { %1896 = vmatpush.bf16.msrb.mxu3 %v5238_v54  ;;  %v5059_v20 = vld [vmem:[#allocation5 + $0x630] sm:$0xf0]  ;;  %v6547_v21 = vld [vmem:[#allocation5 + $0x724] sm:$0xf]  ;;  %v4934_v27 = vor.u32 %v6483_v16, %v4931_v18  ;;  %v4650_v54 = vor.u32 %v6414_v46, %v4649_v45  ;;  %v4778_v58 = vor.u32 %v6446_v50, %v4777_v49  ;;  %v4361_v3 = vld [vmem:[#allocation5 + $0xa8] sm:$0xf] }
  0x92   :  { %v5187_v22 = vld [vmem:[#allocation5 + $0x730] sm:$0xf0]  ;;  %v6447_v24 = vld [vmem:[#allocation5 + $0x404] sm:$0xf]  ;;  %v5062_v28 = vor.u32 %v6515_v19, %v5059_v20  ;;  %v6342_v4 = vld [vmem:[#allocation5 + $0xb4] sm:$0xf0] }
  0x93   :  { %1858 = vmatpush.bf16.msrb.mxu0 %v4838_v60  ;;  %1871 = vmatpush.bf16.msrb.mxu1 %v4966_v61  ;;  %v4787_v26 = vld [vmem:[#allocation5 + $0x410] sm:$0xf0]  ;;  %v6479_v29 = vld [vmem:[#allocation5 + $0x504] sm:$0xf]  ;;  %v5190_v32 = vor.u32 %v6547_v21, %v5187_v22  ;;  %v4633_v60 = vld [vmem:[#allocation5 + $0x2c8] sm:$0xf]  ;;  %v4362_v14 = vor.u32 %v6342_v4, %v4361_v3 }
  0x94   :  { %1884 = vmatpush.bf16.msrb.mxu2 %v5094_v62  ;;  %v4915_v30 = vld [vmem:[#allocation5 + $0x510] sm:$0xf0]  ;;  %v6511_v31 = vld [vmem:[#allocation5 + $0x604] sm:$0xf]  ;;  %v4790_v43 = vor.u32 %v6447_v24, %v4787_v26  ;;  %v6410_v61 = vld [vmem:[#allocation5 + $0x2d4] sm:$0xf0] }
  0x95   :  { %1897 = vmatpush.bf16.msrb.mxu3 %v5222_v2  ;;  %v5043_v33 = vld [vmem:[#allocation5 + $0x610] sm:$0xf0]  ;;  %v6543_v35 = vld [vmem:[#allocation5 + $0x704] sm:$0xf]  ;;  %v4918_v47 = vor.u32 %v6479_v29, %v4915_v30  ;;  %v4761_v62 = vld [vmem:[#allocation5 + $0x3c8] sm:$0xf]  ;;  %v4634_v2 = vor.u32 %v6410_v61, %v4633_v60 }
  0x96   :  { %v5171_v36 = vld [vmem:[#allocation5 + $0x710] sm:$0xf0]  ;;  %v5046_v48 = vor.u32 %v6511_v31, %v5043_v33  ;;  %v4489_v5 = vld [vmem:[#allocation5 + $0x1a8] sm:$0xf]  ;;  %v4762_v6 = vor.u32 %v6442_v63, %v4761_v62  ;;  %v6374_v7 = vld [vmem:[#allocation5 + $0x1b4] sm:$0xf0] }
  0x97   :  { %1859 = vmatpush.bf16.msrb.mxu0 %v4822_v10  ;;  %1872 = vmatpush.bf16.msrb.mxu1 %v4950_v11  ;;  %v5174_v51 = vor.u32 %v6543_v35, %v5171_v36  ;;  %v4617_v10 = vld [vmem:[#allocation5 + $0x2a8] sm:$0xf]  ;;  %v6406_v11 = vld [vmem:[#allocation5 + $0x2b4] sm:$0xf0]  ;;  %v4490_v16 = vor.u32 %v6374_v7, %v4489_v5 }
  0x98   :  { %1885 = vmatpush.bf16.msrb.mxu2 %v5078_v12  ;;  %v4745_v12 = vld [vmem:[#allocation5 + $0x3a8] sm:$0xf]  ;;  %v6438_v13 = vld [vmem:[#allocation5 + $0x3b4] sm:$0xf0] }
  0x99   :  { %1898 = vmatpush.bf16.msrb.mxu3 %v5206_v17  ;;  %v4618_v17 = vor.u32 %v6406_v11, %v4617_v10  ;;  %v4345_v18 = vld [vmem:[#allocation5 + $0x88] sm:$0xf]  ;;  %v6338_v19 = vld [vmem:[#allocation5 + $0x94] sm:$0xf0]  ;;  %v4746_v21 = vor.u32 %v6438_v13, %v4745_v12 }
  0x9a   :  { %v4473_v20 = vld [vmem:[#allocation5 + $0x188] sm:$0xf]  ;;  %v6370_v22 = vld [vmem:[#allocation5 + $0x194] sm:$0xf0] }
  0x9b   :  { %1860 = vmatpush.bf16.msrb.mxu0 %v4806_v23  ;;  %1873 = vmatpush.bf16.msrb.mxu1 %v4934_v27  ;;  %v4601_v23 = vld [vmem:[#allocation5 + $0x288] sm:$0xf]  ;;  %v6402_v24 = vld [vmem:[#allocation5 + $0x294] sm:$0xf0]  ;;  %v4474_v29 = vor.u32 %v6370_v22, %v4473_v20 }
  0x9c   :  { %1886 = vmatpush.bf16.msrb.mxu2 %v5062_v28  ;;  %v4729_v26 = vld [vmem:[#allocation5 + $0x388] sm:$0xf]  ;;  %v6434_v27 = vld [vmem:[#allocation5 + $0x394] sm:$0xf0]  ;;  %v4346_v28 = vor.u32 %v6338_v19, %v4345_v18  ;;  %v4602_v30 = vor.u32 %v6402_v24, %v4601_v23 }
  0x9d   :  { %1899 = vmatpush.bf16.msrb.mxu3 %v5190_v32  ;;  %v4329_v31 = vld [vmem:[#allocation5 + $0x68] sm:$0xf]  ;;  %v6334_v32 = vld [vmem:[#allocation5 + $0x74] sm:$0xf0]  ;;  %v4730_v35 = vor.u32 %v6434_v27, %v4729_v26 }
  0x9e   :  { %v4457_v33 = vld [vmem:[#allocation5 + $0x168] sm:$0xf]  ;;  %v6366_v36 = vld [vmem:[#allocation5 + $0x174] sm:$0xf0]  ;;  %v4330_v44 = vor.u32 %v6334_v32, %v4329_v31 }
  0x9f   :  { %1861 = vmatpush.bf16.msrb.mxu0 %v4790_v43  ;;  %1874 = vmatpush.bf16.msrb.mxu1 %v4918_v47  ;;  %v4585_v39 = vld [vmem:[#allocation5 + $0x268] sm:$0xf]  ;;  %v6398_v41 = vld [vmem:[#allocation5 + $0x274] sm:$0xf0]  ;;  %v4458_v45 = vor.u32 %v6366_v36, %v4457_v33 }
  0xa0   :  { %1887 = vmatpush.bf16.msrb.mxu2 %v5046_v48  ;;  %v4713_v42 = vld [vmem:[#allocation5 + $0x368] sm:$0xf]  ;;  %v6430_v43 = vld [vmem:[#allocation5 + $0x374] sm:$0xf0]  ;;  %v4586_v46 = vor.u32 %v6398_v41, %v4585_v39 }
  0xa1   :  { %1900 = vmatpush.bf16.msrb.mxu3 %v5174_v51  ;;  %v4313_v47 = vld [vmem:[#allocation5 + $0x48] sm:$0xf]  ;;  %v6330_v48 = vld [vmem:[#allocation5 + $0x54] sm:$0xf0]  ;;  %v4714_v50 = vor.u32 %v6430_v43, %v4713_v42 }
  0xa2   :  { %1862 = vmatmul.bf16.vlgmr.msrb.gmra.mxu0 %v7144_v37  ;;  %1875 = vmatmul.bf16.vlgmr.msrb.gmra.mxu1 %v7148_v40  ;;  %v4441_v49 = vld [vmem:[#allocation5 + $0x148] sm:$0xf]  ;;  %v6362_v51 = vld [vmem:[#allocation5 + $0x154] sm:$0xf0]  ;;  %v4314_v56 = vor.u32 %v6330_v48, %v4313_v47 }
  0xa3   :  { %1906 = vmatpush.bf16.msra.mxu0 %v4394_v52  ;;  %1919 = vmatpush.bf16.msra.mxu1 %v4522_v53  ;;  %v4569_v52 = vld [vmem:[#allocation5 + $0x248] sm:$0xf]  ;;  %v6394_v53 = vld [vmem:[#allocation5 + $0x254] sm:$0xf0]  ;;  %v4442_v57 = vor.u32 %v6362_v51, %v4441_v49 }
  0xa4   :  { %1932 = vmatpush.bf16.msra.mxu2 %v4650_v54  ;;  %1901 = vmatmul.bf16.vlgmr.msrb.gmra.mxu3 %v7146_v38  ;;  %v4697_v54 = vld [vmem:[#allocation5 + $0x348] sm:$0xf]  ;;  %v6426_v55 = vld [vmem:[#allocation5 + $0x354] sm:$0xf0] }
  0xa5   :  { %1945 = vmatpush.bf16.msra.mxu3 %v4778_v58  ;;  %1888 = vmatmul.bf16.vlgmr.msrb.gmra.mxu2 %v7142_v34  ;;  %v4570_v58 = vor.u32 %v6394_v53, %v4569_v52  ;;  %v4297_v59 = vld [vmem:[#allocation5 + $0x28] sm:$0xf]  ;;  %v6326_v60 = vld [vmem:[#allocation5 + $0x34] sm:$0xf0]  ;;  %v4698_v62 = vor.u32 %v6426_v55, %v4697_v54 }
  0xa6   :  { %v4425_v61 = vld [vmem:[#allocation5 + $0x128] sm:$0xf]  ;;  %v6358_v63 = vld [vmem:[#allocation5 + $0x134] sm:$0xf0]  ;;  %v4298_v4 = vor.u32 %v6326_v60, %v4297_v59 }
  0xa7   :  { %1907 = vmatpush.bf16.msra.mxu0 %v4378_v0  ;;  %1920 = vmatpush.bf16.msra.mxu1 %v4506_v1  ;;  %v4553_v0 = vld [vmem:[#allocation5 + $0x228] sm:$0xf]  ;;  %v6390_v1 = vld [vmem:[#allocation5 + $0x234] sm:$0xf0]  ;;  %v4426_v7 = vor.u32 %v6358_v63, %v4425_v61 }
  0xa8   :  { %1933 = vmatpush.bf16.msra.mxu2 %v4634_v2  ;;  %v4681_v2 = vld [vmem:[#allocation5 + $0x328] sm:$0xf]  ;;  %v6422_v3 = vld [vmem:[#allocation5 + $0x334] sm:$0xf0]  ;;  %v4554_v10 = vor.u32 %v6390_v1, %v4553_v0 }
  0xa9   :  { %1946 = vmatpush.bf16.msra.mxu3 %v4762_v6  ;;  %v4281_v5 = vld [vmem:[#allocation5 + $0x8] sm:$0xf]  ;;  %v6322_v6 = vld [vmem:[#allocation5 + $0x14] sm:$0xf0] }
  0xaa   :  { %v4409_v11 = vld [vmem:[#allocation5 + $0x108] sm:$0xf]  ;;  %v6354_v12 = vld [vmem:[#allocation5 + $0x114] sm:$0xf0]  ;;  %v4282_v22 = vor.u32 %v6322_v6, %v4281_v5  ;;  %v7166_v6 = vld [vmem:[#allocation7] sm:$0xf] }
  0xab   :  { %1908 = vmatpush.bf16.msra.mxu0 %v4362_v14  ;;  %1921 = vmatpush.bf16.msra.mxu1 %v4490_v16  ;;  %v4537_v13 = vld [vmem:[#allocation5 + $0x208] sm:$0xf]  ;;  %v4682_v14 = vor.u32 %v6422_v3, %v4681_v2  ;;  %v6386_v16 = vld [vmem:[#allocation5 + $0x214] sm:$0xf0]  ;;  %v4410_v27 = vor.u32 %v6354_v12, %v4409_v11 }
  0xac   :  { %1934 = vmatpush.bf16.msra.mxu2 %v4618_v17  ;;  %v4665_v17 = vld [vmem:[#allocation5 + $0x308] sm:$0xf]  ;;  %v6418_v18 = vld [vmem:[#allocation5 + $0x314] sm:$0xf0] }
  0xad   :  { %1947 = vmatpush.bf16.msra.mxu3 %v4746_v21  ;;  %v4905_v19 = vld [vmem:[#allocation5 + $0x4e8] sm:$0xf]  ;;  %v6478_v20 = vld [vmem:[#allocation5 + $0x4f4] sm:$0xf0]  ;;  %v4666_v31 = vor.u32 %v6418_v18, %v4665_v17  ;;  %v410_v18 = vperm.slane %v7166_v6, 0 }
  0xae   :  { %v5033_v21 = vld [vmem:[#allocation5 + $0x5e8] sm:$0xf]  ;;  %v6510_v23 = vld [vmem:[#allocation5 + $0x5f4] sm:$0xf0]  ;;  %v4906_v32 = vor.u32 %v6478_v20, %v4905_v19 }
  0xaf   :  { %1909 = vmatpush.bf16.msra.mxu0 %v4346_v28  ;;  %1922 = vmatpush.bf16.msra.mxu1 %v4474_v29  ;;  %v5161_v24 = vld [vmem:[#allocation5 + $0x6e8] sm:$0xf]  ;;  %v6542_v26 = vld [vmem:[#allocation5 + $0x6f4] sm:$0xf0]  ;;  %v4538_v28 = vor.u32 %v6386_v16, %v4537_v13  ;;  %v5034_v33 = vor.u32 %v6510_v23, %v5033_v21 }
  0xb0   :  { %1935 = vmatpush.bf16.msra.mxu2 %v4602_v30  ;;  %v5289_v29 = vld [vmem:[#allocation5 + $0x7e8] sm:$0xf]  ;;  %v6574_v30 = vld [vmem:[#allocation5 + $0x7f4] sm:$0xf0] }
  0xb1   :  { %1948 = vmatpush.bf16.msra.mxu3 %v4730_v35  ;;  %v5162_v35 = vor.u32 %v6542_v26, %v5161_v24  ;;  %v4889_v36 = vld [vmem:[#allocation5 + $0x4c8] sm:$0xf]  ;;  %v6474_v39 = vld [vmem:[#allocation5 + $0x4d4] sm:$0xf0]  ;;  %v5290_v42 = vor.u32 %v6574_v30, %v5289_v29 }
  0xb2   :  { %v5017_v41 = vld [vmem:[#allocation5 + $0x5c8] sm:$0xf]  ;;  %v6506_v43 = vld [vmem:[#allocation5 + $0x5d4] sm:$0xf0]  ;;  %v4890_v48 = vor.u32 %v6474_v39, %v4889_v36 }
  0xb3   :  { %1910 = vmatpush.bf16.msra.mxu0 %v4330_v44  ;;  %1923 = vmatpush.bf16.msra.mxu1 %v4458_v45  ;;  %v5145_v44 = vld [vmem:[#allocation5 + $0x6c8] sm:$0xf]  ;;  %v6538_v45 = vld [vmem:[#allocation5 + $0x6d4] sm:$0xf0]  ;;  %v5018_v49 = vor.u32 %v6506_v43, %v5017_v41 }
  0xb4   :  { %1936 = vmatpush.bf16.msra.mxu2 %v4586_v46  ;;  %v5273_v46 = vld [vmem:[#allocation5 + $0x7c8] sm:$0xf]  ;;  %v6570_v47 = vld [vmem:[#allocation5 + $0x7d4] sm:$0xf0] }
  0xb5   :  { %1949 = vmatpush.bf16.msra.mxu3 %v4714_v50  ;;  %v5146_v50 = vor.u32 %v6538_v45, %v5145_v44  ;;  %v4873_v51 = vld [vmem:[#allocation5 + $0x4a8] sm:$0xf]  ;;  %v6470_v52 = vld [vmem:[#allocation5 + $0x4b4] sm:$0xf0]  ;;  %v5274_v54 = vor.u32 %v6570_v47, %v5273_v46 }
  0xb6   :  { %v5001_v53 = vld [vmem:[#allocation5 + $0x5a8] sm:$0xf]  ;;  %v6502_v55 = vld [vmem:[#allocation5 + $0x5b4] sm:$0xf0]  ;;  %v4874_v60 = vor.u32 %v6470_v52, %v4873_v51 }
  0xb7   :  { %1911 = vmatpush.bf16.msra.mxu0 %v4314_v56  ;;  %1924 = vmatpush.bf16.msra.mxu1 %v4442_v57  ;;  %v5129_v56 = vld [vmem:[#allocation5 + $0x6a8] sm:$0xf]  ;;  %v6534_v57 = vld [vmem:[#allocation5 + $0x6b4] sm:$0xf0] }
  0xb8   :  { %1937 = vmatpush.bf16.msra.mxu2 %v4570_v58  ;;  %v5257_v58 = vld [vmem:[#allocation5 + $0x7a8] sm:$0xf]  ;;  %v6566_v59 = vld [vmem:[#allocation5 + $0x7b4] sm:$0xf0]  ;;  %v5130_v63 = vor.u32 %v6534_v57, %v5129_v56 }
  0xb9   :  { %1950 = vmatpush.bf16.msra.mxu3 %v4698_v62  ;;  %v4857_v61 = vld [vmem:[#allocation5 + $0x488] sm:$0xf]  ;;  %v5002_v62 = vor.u32 %v6502_v55, %v5001_v53  ;;  %v6466_v0 = vld [vmem:[#allocation5 + $0x494] sm:$0xf0]  ;;  %v5258_v3 = vor.u32 %v6566_v59, %v5257_v58 }
  0xba   :  { %v4985_v1 = vld [vmem:[#allocation5 + $0x588] sm:$0xf]  ;;  %v6498_v2 = vld [vmem:[#allocation5 + $0x594] sm:$0xf0]  ;;  %v4858_v11 = vor.u32 %v6466_v0, %v4857_v61 }
  0xbb   :  { %1912 = vmatpush.bf16.msra.mxu0 %v4298_v4  ;;  %1925 = vmatpush.bf16.msra.mxu1 %v4426_v7  ;;  %v5113_v4 = vld [vmem:[#allocation5 + $0x688] sm:$0xf]  ;;  %v6530_v5 = vld [vmem:[#allocation5 + $0x694] sm:$0xf0]  ;;  %v4986_v13 = vor.u32 %v6498_v2, %v4985_v1 }
  0xbc   :  { %1938 = vmatpush.bf16.msra.mxu2 %v4554_v10  ;;  %v5241_v7 = vld [vmem:[#allocation5 + $0x788] sm:$0xf]  ;;  %v6562_v10 = vld [vmem:[#allocation5 + $0x794] sm:$0xf0] }
  0xbd   :  { %1951 = vmatpush.bf16.msra.mxu3 %v4682_v14  ;;  %v4841_v12 = vld [vmem:[#allocation5 + $0x468] sm:$0xf]  ;;  %v5114_v14 = vor.u32 %v6530_v5, %v5113_v4  ;;  %v6462_v16 = vld [vmem:[#allocation5 + $0x474] sm:$0xf0]  ;;  %v5242_v19 = vor.u32 %v6562_v10, %v5241_v7 }
  0xbe   :  { %v4969_v17 = vld [vmem:[#allocation5 + $0x568] sm:$0xf]  ;;  %v6494_v20 = vld [vmem:[#allocation5 + $0x574] sm:$0xf0]  ;;  %v4842_v26 = vor.u32 %v6462_v16, %v4841_v12  ;;  %v1720_v45 = vpop.f32.mrf.mxu1  ;;  %v4395_v16 = vld [vmem:[#allocation5 + $0xf8] sm:$0xf0] }
  0xbf   :  { %1913 = vmatpush.bf16.msra.mxu0 %v4282_v22  ;;  %1926 = vmatpush.bf16.msra.mxu1 %v4410_v27  ;;  %v5097_v21 = vld [vmem:[#allocation5 + $0x668] sm:$0xf]  ;;  %v6526_v22 = vld [vmem:[#allocation5 + $0x674] sm:$0xf0] }
  0xc0   :  { %1939 = vmatpush.bf16.msra.mxu2 %v4538_v28  ;;  %v5225_v23 = vld [vmem:[#allocation5 + $0x768] sm:$0xf]  ;;  %v6558_v24 = vld [vmem:[#allocation5 + $0x774] sm:$0xf0]  ;;  %v4970_v28 = vor.u32 %v6494_v20, %v4969_v17  ;;  %v5098_v29 = vor.u32 %v6526_v22, %v5097_v21  ;;  %v6380_v17 = vld [vmem:[#allocation5 + $0x1ec] sm:$0xf] }
  0xc1   :  { %1952 = vmatpush.bf16.msra.mxu3 %v4666_v31  ;;  %v4825_v30 = vld [vmem:[#allocation5 + $0x448] sm:$0xf]  ;;  %v6458_v31 = vld [vmem:[#allocation5 + $0x454] sm:$0xf0]  ;;  %v6412_v20 = vld [vmem:[#allocation5 + $0x2ec] sm:$0xf] }
  0xc2   :  { %1914 = vmatmul.bf16.vlgmr.msra.gmra.mxu0 %v7132_v9  ;;  %1927 = vmatmul.bf16.vlgmr.msra.gmra.mxu1 %v7139_v25  ;;  %v6490_v36 = vld [vmem:[#allocation5 + $0x554] sm:$0xf0]  ;;  %v5081_v39 = vld [vmem:[#allocation5 + $0x648] sm:$0xf]  ;;  %v4826_v44 = vor.u32 %v6458_v31, %v4825_v30  ;;  %v4651_v21 = vld [vmem:[#allocation5 + $0x2f8] sm:$0xf0] }
  0xc3   :  { %1958 = vmatpush.bf16.msrb.mxu0 %v4906_v32  ;;  %1971 = vmatpush.bf16.msrb.mxu1 %v5034_v33  ;;  %v4953_v32 = vld [vmem:[#allocation5 + $0x548] sm:$0xf]  ;;  %v6522_v41 = vld [vmem:[#allocation5 + $0x654] sm:$0xf0] }
  0xc4   :  { %1984 = vmatpush.bf16.msrb.mxu2 %v5162_v35  ;;  %1953 = vmatmul.bf16.vlgmr.msra.gmra.mxu3 %v7134_v15  ;;  %v5226_v35 = vor.u32 %v6558_v24, %v5225_v23  ;;  %v6554_v43 = vld [vmem:[#allocation5 + $0x754] sm:$0xf0]  ;;  %v4954_v46 = vor.u32 %v6490_v36, %v4953_v32  ;;  %v5082_v47 = vor.u32 %v6522_v41, %v5081_v39  ;;  %v5193_v57 = vld [vmem:[#allocation5 + $0x728] sm:$0xf]  ;;  %v6376_v36 = vld [vmem:[#allocation5 + $0x1cc] sm:$0xf] }
  0xc5   :  { %1997 = vmatpush.bf16.msrb.mxu3 %v5290_v42  ;;  %1940 = vmatmul.bf16.vlgmr.msra.gmra.mxu2 %v7130_v8  ;;  %v5209_v42 = vld [vmem:[#allocation5 + $0x748] sm:$0xf]  ;;  %v6486_v53 = vld [vmem:[#allocation5 + $0x534] sm:$0xf0]  ;;  %v4654_v32 = vor.u32 %v6412_v20, %v4651_v21 }
  0xc6   :  { %v5210_v52 = vor.u32 %v6554_v43, %v5209_v42  ;;  %v6518_v55 = vld [vmem:[#allocation5 + $0x634] sm:$0xf0]  ;;  %v5049_v5 = vld [vmem:[#allocation5 + $0x608] sm:$0xf]  ;;  %v1722_v22 = vpop.f32.mrf.mxu1  ;;  %v4507_v42 = vld [vmem:[#allocation5 + $0x1d8] sm:$0xf0] }
  0xc7   :  { %1959 = vmatpush.bf16.msrb.mxu0 %v4890_v48  ;;  %1972 = vmatpush.bf16.msrb.mxu1 %v5018_v49  ;;  %v4809_v48 = vld [vmem:[#allocation5 + $0x428] sm:$0xf]  ;;  %v6454_v49 = vld [vmem:[#allocation5 + $0x434] sm:$0xf0]  ;;  %v6408_v43 = vld [vmem:[#allocation5 + $0x2cc] sm:$0xf] }
  0xc8   :  { %1985 = vmatpush.bf16.msrb.mxu2 %v5146_v50  ;;  %v4937_v50 = vld [vmem:[#allocation5 + $0x528] sm:$0xf]  ;;  %v6550_v58 = vld [vmem:[#allocation5 + $0x734] sm:$0xf0]  ;;  %v4810_v61 = vor.u32 %v6454_v49, %v4809_v48  ;;  %v4510_v48 = vor.u32 %v6376_v36, %v4507_v42  ;;  %v4459_v22 = vld [vmem:[#allocation5 + $0x178] sm:$0xf0] }
  0xc9   :  { %1998 = vmatpush.bf16.msrb.mxu3 %v5274_v54  ;;  %v5065_v54 = vld [vmem:[#allocation5 + $0x628] sm:$0xf]  ;;  %v4938_v1 = vor.u32 %v6486_v53, %v4937_v50  ;;  %v6482_v4 = vld [vmem:[#allocation5 + $0x514] sm:$0xf0]  ;;  %v5194_v10 = vor.u32 %v6550_v58, %v5193_v57  ;;  %v6340_v50 = vld [vmem:[#allocation5 + $0xac] sm:$0xf] }
  0xca   :  { %v5066_v2 = vor.u32 %v6518_v55, %v5065_v54  ;;  %v5177_v12 = vld [vmem:[#allocation5 + $0x708] sm:$0xf]  ;;  %v4491_v54 = vld [vmem:[#allocation5 + $0x1b8] sm:$0xf0]  ;;  %v6404_v55 = vld [vmem:[#allocation5 + $0x2ac] sm:$0xf] }
  0xcb   :  { %1960 = vmatpush.bf16.msrb.mxu0 %v4874_v60  ;;  %1973 = vmatpush.bf16.msrb.mxu1 %v5002_v62  ;;  %v1707_v27 = vpop.f32.mrf.mxu0  ;;  %v1746_v60 = vpop.f32.mrf.mxu3  ;;  %v4793_v62 = vld [vmem:[#allocation5 + $0x408] sm:$0xf]  ;;  %v6436_v57 = vld [vmem:[#allocation5 + $0x3ac] sm:$0xf]  ;;  %v4747_v58 = vld [vmem:[#allocation5 + $0x3b8] sm:$0xf0] }
  0xcc   :  { %1986 = vmatpush.bf16.msrb.mxu2 %v5130_v63  ;;  %v1708_v33 = vadd.f32 %v1707_v27, %v410_v18  ;;  %v6450_v63 = vld [vmem:[#allocation5 + $0x414] sm:$0xf0]  ;;  %v4779_v27 = vld [vmem:[#allocation5 + $0x3f8] sm:$0xf0] }
  0xcd   :  { %1999 = vmatpush.bf16.msrb.mxu3 %v5258_v3  ;;  %v4921_v3 = vld [vmem:[#allocation5 + $0x508] sm:$0xf]  ;;  %v4794_v18 = vor.u32 %v6450_v63, %v4793_v62  ;;  %v6336_v62 = vld [vmem:[#allocation5 + $0x8c] sm:$0xf]  ;;  %v4347_v63 = vld [vmem:[#allocation5 + $0x98] sm:$0xf0] }
  0xce   :  { %v1721_v51 = vadd.f32 %v1720_v45, %v1708_v33  ;;  %v4922_v23 = vor.u32 %v6482_v4, %v4921_v3  ;;  %v6344_v33 = vld [vmem:[#allocation5 + $0xcc] sm:$0xf]  ;;  %v4603_v4 = vld [vmem:[#allocation5 + $0x298] sm:$0xf0] }
  0xcf   :  { %1961 = vmatpush.bf16.msrb.mxu0 %v4858_v11  ;;  %1974 = vmatpush.bf16.msrb.mxu1 %v4986_v13  ;;  %v6514_v11 = vld [vmem:[#allocation5 + $0x614] sm:$0xf0]  ;;  %v6440_v45 = vld [vmem:[#allocation5 + $0x3cc] sm:$0xf]  ;;  %v4571_v42 = vld [vmem:[#allocation5 + $0x258] sm:$0xf0] }
  0xd0   :  { %1987 = vmatpush.bf16.msrb.mxu2 %v5114_v14  ;;  %v1733_v56 = vpop.f32.mrf.mxu2  ;;  %v6546_v13 = vld [vmem:[#allocation5 + $0x714] sm:$0xf0]  ;;  %v6348_v14 = vld [vmem:[#allocation5 + $0xec] sm:$0xf]  ;;  %v5050_v24 = vor.u32 %v6514_v11, %v5049_v5  ;;  %v4350_v11 = vor.u32 %v6336_v62, %v4347_v63 }
  0xd1   :  { %2000 = vmatpush.bf16.msrb.mxu3 %v5242_v19  ;;  %v1734_v59 = vadd.f32 %v1733_v56, %v1721_v51  ;;  %v4523_v19 = vld [vmem:[#allocation5 + $0x1f8] sm:$0xf0]  ;;  %v6400_v3 = vld [vmem:[#allocation5 + $0x28c] sm:$0xf] }
  0xd2   :  { %v4526_v31 = vor.u32 %v6380_v17, %v4523_v19  ;;  %v4363_v51 = vld [vmem:[#allocation5 + $0xb8] sm:$0xf0]  ;;  %v6432_v5 = vld [vmem:[#allocation5 + $0x38c] sm:$0xf] }
  0xd3   :  { %1962 = vmatpush.bf16.msrb.mxu0 %v4842_v26  ;;  %1975 = vmatpush.bf16.msrb.mxu1 %v4970_v28  ;;  %v1709_v0 = vpop.f32.mrf.mxu0  ;;  %v7169_v7 = vadd.f32 %v1746_v60, %v1734_v59  ;;  %v6444_v26 = vld [vmem:[#allocation5 + $0x3ec] sm:$0xf]  ;;  %v5178_v28 = vor.u32 %v6546_v13, %v5177_v12  ;;  %v1748_v39 = vpop.f32.mrf.mxu3  ;;  %v4619_v56 = vld [vmem:[#allocation5 + $0x2b8] sm:$0xf0]  ;;  %v4366_v59 = vor.u32 %v6340_v50, %v4363_v51 }
  0xd4   :  { %1988 = vmatpush.bf16.msrb.mxu2 %v5098_v29  ;;  %v4398_v29 = vor.u32 %v6348_v14, %v4395_v16  ;;  %v4782_v41 = vor.u32 %v6444_v26, %v4779_v27  ;;  %v6368_v0 = vld [vmem:[#allocation5 + $0x18c] sm:$0xf]  ;;  %v4606_v14 = vor.u32 %v6400_v3, %v4603_v4  ;;  %v4331_v17 = vld [vmem:[#allocation5 + $0x78] sm:$0xf0] }
  0xd5   :  { %2001 = vmatpush.bf16.msrb.mxu3 %v5226_v35  ;;  %v4379_v35 = vld [vmem:[#allocation5 + $0xd8] sm:$0xf0]  ;;  %v6332_v16 = vld [vmem:[#allocation5 + $0x6c] sm:$0xf] }
  0xd6   :  { %v6428_v26 = vld [vmem:[#allocation5 + $0x36c] sm:$0xf]  ;;  %v4715_v27 = vld [vmem:[#allocation5 + $0x378] sm:$0xf0] }
  0xd7   :  { %1963 = vmatpush.bf16.msrb.mxu0 %v4826_v44  ;;  %1976 = vmatpush.bf16.msrb.mxu1 %v4954_v46  ;;  %v4635_v44 = vld [vmem:[#allocation5 + $0x2d8] sm:$0xf0]  ;;  %v6320_v63 = vld [vmem:[#allocation5 + $0xc] sm:$0xf] }
  0xd8   :  { %1989 = vmatpush.bf16.msrb.mxu2 %v5082_v47  ;;  %v1735_v30 = vpop.f32.mrf.mxu2  ;;  %v4763_v46 = vld [vmem:[#allocation5 + $0x3d8] sm:$0xf0]  ;;  %v4382_v47 = vor.u32 %v6344_v33, %v4379_v35  ;;  %v4638_v49 = vor.u32 %v6408_v43, %v4635_v44  ;;  %v6360_v35 = vld [vmem:[#allocation5 + $0x14c] sm:$0xf] }
  0xd9   :  { %2002 = vmatpush.bf16.msrb.mxu3 %v5210_v52  ;;  %v6372_v52 = vld [vmem:[#allocation5 + $0x1ac] sm:$0xf]  ;;  %v4766_v53 = vor.u32 %v6440_v45, %v4763_v46  ;;  %v4315_v33 = vld [vmem:[#allocation5 + $0x58] sm:$0xf0] }
  0xda   :  { %v4494_v60 = vor.u32 %v6372_v52, %v4491_v54  ;;  %v4443_v39 = vld [vmem:[#allocation5 + $0x158] sm:$0xf0]  ;;  %v6424_v45 = vld [vmem:[#allocation5 + $0x34c] sm:$0xf] }
  0xdb   :  { %1964 = vmatpush.bf16.msrb.mxu0 %v4810_v61  ;;  %1977 = vmatpush.bf16.msrb.mxu1 %v4938_v1  ;;  %v4622_v61 = vor.u32 %v6404_v55, %v4619_v56  ;;  %v4750_v1 = vor.u32 %v6436_v57, %v4747_v58  ;;  %v4699_v46 = vld [vmem:[#allocation5 + $0x358] sm:$0xf0]  ;;  %v4446_v50 = vor.u32 %v6360_v35, %v4443_v39  ;;  %v6324_v52 = vld [vmem:[#allocation5 + $0x2c] sm:$0xf] }
  0xdc   :  { %1990 = vmatpush.bf16.msrb.mxu2 %v5066_v2  ;;  %v4475_v2 = vld [vmem:[#allocation5 + $0x198] sm:$0xf0]  ;;  %v6356_v54 = vld [vmem:[#allocation5 + $0x12c] sm:$0xf]  ;;  %v4702_v56 = vor.u32 %v6424_v45, %v4699_v46 }
  0xdd   :  { %2003 = vmatpush.bf16.msrb.mxu3 %v5194_v10  ;;  %v4731_v10 = vld [vmem:[#allocation5 + $0x398] sm:$0xf0]  ;;  %v4478_v13 = vor.u32 %v6368_v0, %v4475_v2  ;;  %v6388_v58 = vld [vmem:[#allocation5 + $0x22c] sm:$0xf] }
  0xde   :  { %v4734_v21 = vor.u32 %v6432_v5, %v4731_v10  ;;  %v4427_v57 = vld [vmem:[#allocation5 + $0x138] sm:$0xf0]  ;;  %v6352_v3 = vld [vmem:[#allocation5 + $0x10c] sm:$0xf] }
  0xdf   :  { %1965 = vmatpush.bf16.msrb.mxu0 %v4794_v18  ;;  %1978 = vmatpush.bf16.msrb.mxu1 %v4922_v23  ;;  %v1759_v12 = vpop.f32.mrf.mxu0  ;;  %v6364_v18 = vld [vmem:[#allocation5 + $0x16c] sm:$0xf]  ;;  %v1772_v20 = vpop.f32.mrf.mxu1  ;;  %v4283_v0 = vld [vmem:[#allocation5 + $0x18] sm:$0xf0] }
  0xe0   :  { %1991 = vmatpush.bf16.msrb.mxu2 %v5050_v24  ;;  %v1760_v19 = vadd.f32 %v1759_v12, %v7169_v7  ;;  %v6396_v23 = vld [vmem:[#allocation5 + $0x26c] sm:$0xf]  ;;  %v4587_v24 = vld [vmem:[#allocation5 + $0x278] sm:$0xf0]  ;;  %v4462_v30 = vor.u32 %v6364_v18, %v4459_v22  ;;  %v4718_v7 = vor.u32 %v6428_v26, %v4715_v27 }
  0xe1   :  { %2004 = vmatpush.bf16.msrb.mxu3 %v5178_v28  ;;  %v4411_v4 = vld [vmem:[#allocation5 + $0x118] sm:$0xf0]  ;;  %v6384_v5 = vld [vmem:[#allocation5 + $0x20c] sm:$0xf] }
  0xe2   :  { %1966 = vmatmul.bf16.vlgmr.msrb.gmra.mxu0 %v7144_v37  ;;  %1979 = vmatmul.bf16.vlgmr.msrb.gmra.mxu1 %v7148_v40  ;;  %v1773_v28 = vadd.f32 %v1772_v20, %v1760_v19  ;;  %v4539_v12 = vld [vmem:[#allocation5 + $0x218] sm:$0xf0]  ;;  %v6508_v19 = vld [vmem:[#allocation5 + $0x5ec] sm:$0xf]  ;;  %v4286_v20 = vor.u32 %v6320_v63, %v4283_v0 }
  0xe3   :  { %2010 = vmatpush.bf16.msra.mxu0 %v4398_v29  ;;  %2023 = vmatpush.bf16.msra.mxu1 %v4526_v31  ;;  %v4334_v29 = vor.u32 %v6332_v16, %v4331_v17  ;;  %v4590_v31 = vor.u32 %v6396_v23, %v4587_v24  ;;  %v6476_v17 = vld [vmem:[#allocation5 + $0x4ec] sm:$0xf]  ;;  %v4907_v18 = vld [vmem:[#allocation5 + $0x4f8] sm:$0xf0]  ;;  %v4414_v24 = vor.u32 %v6352_v3, %v4411_v4 }
  0xe4   :  { %2036 = vmatpush.bf16.msra.mxu2 %v4654_v32  ;;  %2005 = vmatmul.bf16.vlgmr.msrb.gmra.mxu3 %v7146_v38  ;;  %v6328_v32 = vld [vmem:[#allocation5 + $0x4c] sm:$0xf]  ;;  %v5163_v23 = vld [vmem:[#allocation5 + $0x6f8] sm:$0xf0]  ;;  %v4542_v26 = vor.u32 %v6384_v5, %v4539_v12 }
  0xe5   :  { %2049 = vmatpush.bf16.msra.mxu3 %v4782_v41  ;;  %1992 = vmatmul.bf16.vlgmr.msrb.gmra.mxu2 %v7142_v34  ;;  %v6392_v41 = vld [vmem:[#allocation5 + $0x24c] sm:$0xf]  ;;  %v4891_v35 = vld [vmem:[#allocation5 + $0x4d8] sm:$0xf0] }
  0xe6   :  { %v4574_v51 = vor.u32 %v6392_v41, %v4571_v42  ;;  %v6540_v22 = vld [vmem:[#allocation5 + $0x6ec] sm:$0xf]  ;;  %v5019_v39 = vld [vmem:[#allocation5 + $0x5d8] sm:$0xf0] }
  0xe7   :  { %2011 = vmatpush.bf16.msra.mxu0 %v4382_v47  ;;  %2024 = vmatpush.bf16.msra.mxu1 %v4510_v48  ;;  %v1798_v44 = vpop.f32.mrf.mxu3  ;;  %v4318_v47 = vor.u32 %v6328_v32, %v4315_v33  ;;  %v1774_v55 = vpop.f32.mrf.mxu1  ;;  %v6572_v27 = vld [vmem:[#allocation5 + $0x7ec] sm:$0xf]  ;;  %v5166_v32 = vor.u32 %v6540_v22, %v5163_v23  ;;  %v5147_v42 = vld [vmem:[#allocation5 + $0x6d8] sm:$0xf0] }
  0xe8   :  { %2037 = vmatpush.bf16.msra.mxu2 %v4638_v49  ;;  %v1785_v36 = vpop.f32.mrf.mxu2  ;;  %v1761_v49 = vpop.f32.mrf.mxu0  ;;  %v6472_v33 = vld [vmem:[#allocation5 + $0x4cc] sm:$0xf]  ;;  %v5131_v55 = vld [vmem:[#allocation5 + $0x6b8] sm:$0xf0] }
  0xe9   :  { %2050 = vmatpush.bf16.msra.mxu3 %v4766_v53  ;;  %v1786_v43 = vadd.f32 %v1785_v36, %v1773_v28  ;;  %v4299_v53 = vld [vmem:[#allocation5 + $0x38] sm:$0xf0]  ;;  %v6504_v36 = vld [vmem:[#allocation5 + $0x5cc] sm:$0xf]  ;;  %v4894_v45 = vor.u32 %v6472_v33, %v4891_v35 }
  0xea   :  { %v4302_v62 = vor.u32 %v6324_v52, %v4299_v53  ;;  %v5291_v28 = vld [vmem:[#allocation5 + $0x7f8] sm:$0xf0]  ;;  %v6536_v41 = vld [vmem:[#allocation5 + $0x6cc] sm:$0xf]  ;;  %v5022_v46 = vor.u32 %v6504_v36, %v5019_v39 }
  0xeb   :  { %2012 = vmatpush.bf16.msra.mxu0 %v4366_v59  ;;  %2025 = vmatpush.bf16.msra.mxu1 %v4494_v60  ;;  %v7176_v48 = vadd.f32 %v1798_v44, %v1786_v43  ;;  %v4555_v59 = vld [vmem:[#allocation5 + $0x238] sm:$0xf0]  ;;  %v6420_v60 = vld [vmem:[#allocation5 + $0x32c] sm:$0xf] }
  0xec   :  { %2038 = vmatpush.bf16.msra.mxu2 %v4622_v61  ;;  %v4683_v61 = vld [vmem:[#allocation5 + $0x338] sm:$0xf0]  ;;  %v4558_v2 = vor.u32 %v6388_v58, %v4555_v59  ;;  %v6568_v43 = vld [vmem:[#allocation5 + $0x7cc] sm:$0xf] }
  0xed   :  { %2051 = vmatpush.bf16.msra.mxu3 %v4750_v1  ;;  %v4430_v1 = vor.u32 %v6356_v54, %v4427_v57  ;;  %v5275_v44 = vld [vmem:[#allocation5 + $0x7d8] sm:$0xf0]  ;;  %v6468_v49 = vld [vmem:[#allocation5 + $0x4ac] sm:$0xf] }
  0xee   :  { %v5278_v52 = vor.u32 %v6568_v43, %v5275_v44  ;;  %v5003_v53 = vld [vmem:[#allocation5 + $0x5b8] sm:$0xf0]  ;;  %v6532_v54 = vld [vmem:[#allocation5 + $0x6ac] sm:$0xf] }
  0xef   :  { %2013 = vmatpush.bf16.msra.mxu0 %v4350_v11  ;;  %2026 = vmatpush.bf16.msra.mxu1 %v4478_v13  ;;  %v4686_v11 = vor.u32 %v6420_v60, %v4683_v61  ;;  %v6416_v13 = vld [vmem:[#allocation5 + $0x30c] sm:$0xf]  ;;  %v1800_v16 = vpop.f32.mrf.mxu3  ;;  %v5259_v57 = vld [vmem:[#allocation5 + $0x7b8] sm:$0xf0]  ;;  %v5134_v60 = vor.u32 %v6532_v54, %v5131_v55 }
  0xf0   :  { %2039 = vmatpush.bf16.msra.mxu2 %v4606_v14  ;;  %v1787_v10 = vpop.f32.mrf.mxu2  ;;  %v4667_v14 = vld [vmem:[#allocation5 + $0x318] sm:$0xf0]  ;;  %v6464_v61 = vld [vmem:[#allocation5 + $0x48c] sm:$0xf] }
  0xf1   :  { %2052 = vmatpush.bf16.msra.mxu3 %v4734_v21  ;;  %v5035_v21 = vld [vmem:[#allocation5 + $0x5f8] sm:$0xf0]  ;;  %v6560_v3 = vld [vmem:[#allocation5 + $0x78c] sm:$0xf] }
  0xf2   :  { %v4987_v0 = vld [vmem:[#allocation5 + $0x598] sm:$0xf0]  ;;  %v6460_v10 = vld [vmem:[#allocation5 + $0x46c] sm:$0xf] }
  0xf3   :  { %2014 = vmatpush.bf16.msra.mxu0 %v4334_v29  ;;  %2027 = vmatpush.bf16.msra.mxu1 %v4462_v30  ;;  %v4670_v29 = vor.u32 %v6416_v13, %v4667_v14  ;;  %v4910_v30 = vor.u32 %v6476_v17, %v4907_v18  ;;  %v6492_v12 = vld [vmem:[#allocation5 + $0x56c] sm:$0xf]  ;;  %v4971_v16 = vld [vmem:[#allocation5 + $0x578] sm:$0xf0] }
  0xf4   :  { %2040 = vmatpush.bf16.msra.mxu2 %v4590_v31  ;;  %v5038_v31 = vor.u32 %v6508_v19, %v5035_v21  ;;  %v6524_v17 = vld [vmem:[#allocation5 + $0x66c] sm:$0xf]  ;;  %v5099_v18 = vld [vmem:[#allocation5 + $0x678] sm:$0xf0]  ;;  %v4974_v22 = vor.u32 %v6492_v12, %v4971_v16 }
  0xf5   :  { %2053 = vmatpush.bf16.msra.mxu3 %v4718_v7  ;;  %v5294_v7 = vor.u32 %v6572_v27, %v5291_v28  ;;  %v6556_v19 = vld [vmem:[#allocation5 + $0x76c] sm:$0xf]  ;;  %v5102_v23 = vor.u32 %v6524_v17, %v5099_v18  ;;  %v5211_v36 = vld [vmem:[#allocation5 + $0x758] sm:$0xf0]  ;;  %v5665_v18 = vld [vmem:[#allocation8 + $0x2e0] sm:$0xf] }
  0xf6   :  { %v6488_v27 = vld [vmem:[#allocation5 + $0x54c] sm:$0xf]  ;;  %v4811_v44 = vld [vmem:[#allocation5 + $0x438] sm:$0xf0] }
  0xf7   :  { %2015 = vmatpush.bf16.msra.mxu0 %v4318_v47  ;;  %2028 = vmatpush.bf16.msra.mxu1 %v4446_v50  ;;  %v5150_v47 = vor.u32 %v6536_v41, %v5147_v42  ;;  %v4875_v50 = vld [vmem:[#allocation5 + $0x4b8] sm:$0xf0]  ;;  %v6552_v35 = vld [vmem:[#allocation5 + $0x74c] sm:$0xf] }
  0xf8   :  { %2041 = vmatpush.bf16.msra.mxu2 %v4574_v51  ;;  %v6500_v51 = vld [vmem:[#allocation5 + $0x5ac] sm:$0xf]  ;;  %v4878_v58 = vor.u32 %v6468_v49, %v4875_v50  ;;  %v4939_v49 = vld [vmem:[#allocation5 + $0x538] sm:$0xf0] }
  0xf9   :  { %2054 = vmatpush.bf16.msra.mxu3 %v4702_v56  ;;  %v6564_v56 = vld [vmem:[#allocation5 + $0x7ac] sm:$0xf]  ;;  %v5006_v59 = vor.u32 %v6500_v51, %v5003_v53  ;;  %v5067_v51 = vld [vmem:[#allocation5 + $0x638] sm:$0xf0] }
  0xfa   :  { %v5262_v63 = vor.u32 %v6564_v56, %v5259_v57  ;;  %v6452_v43 = vld [vmem:[#allocation5 + $0x42c] sm:$0xf]  ;;  %v5195_v53 = vld [vmem:[#allocation5 + $0x738] sm:$0xf0] }
  0xfb   :  { %2016 = vmatpush.bf16.msra.mxu0 %v4302_v62  ;;  %2029 = vmatpush.bf16.msra.mxu1 %v4430_v1  ;;  %v4859_v62 = vld [vmem:[#allocation5 + $0x498] sm:$0xf0]  ;;  %v6528_v1 = vld [vmem:[#allocation5 + $0x68c] sm:$0xf]  ;;  %v4814_v54 = vor.u32 %v6452_v43, %v4811_v44  ;;  %v5361_v43 = vld [vmem:[#allocation8 + $0x80] sm:$0xf] }
  0xfc   :  { %2042 = vmatpush.bf16.msra.mxu2 %v4558_v2  ;;  %v5115_v2 = vld [vmem:[#allocation5 + $0x698] sm:$0xf0]  ;;  %v6516_v50 = vld [vmem:[#allocation5 + $0x62c] sm:$0xf]  ;;  %v6593_v44 = vld [vmem:[#allocation8 + $0x8c] sm:$0xf0] }
  0xfd   :  { %2055 = vmatpush.bf16.msra.mxu3 %v4686_v11  ;;  %v5118_v5 = vor.u32 %v6528_v1, %v5115_v2  ;;  %v4843_v11 = vld [vmem:[#allocation5 + $0x478] sm:$0xf0]  ;;  %v6448_v55 = vld [vmem:[#allocation5 + $0x40c] sm:$0xf]  ;;  %v411_v1 = vperm.slane %v7166_v6, 1 }
  0xfe   :  { %v4846_v21 = vor.u32 %v6460_v10, %v4843_v11  ;;  %v4795_v56 = vld [vmem:[#allocation5 + $0x418] sm:$0xf0]  ;;  %v6637_v10 = vld [vmem:[#allocation8 + $0x1ec] sm:$0xf0] }
  0xff   :  { %2017 = vmatpush.bf16.msra.mxu0 %v4286_v20  ;;  %2030 = vmatpush.bf16.msra.mxu1 %v4414_v24  ;;  %v7182_v4 = vpop.f32.mrf.mxu0  ;;  %v7184_v13 = vpop.f32.mrf.mxu1  ;;  %v5227_v20 = vld [vmem:[#allocation5 + $0x778] sm:$0xf0]  ;;  %v6456_v24 = vld [vmem:[#allocation5 + $0x44c] sm:$0xf] }
 0x100   :  { %2043 = vmatpush.bf16.msra.mxu2 %v4542_v26  ;;  %v4827_v26 = vld [vmem:[#allocation5 + $0x458] sm:$0xf0]  ;;  %v1812_v17 = vadd.f32 %v7182_v4, %v411_v1 }
 0x101   :  { %2056 = vmatpush.bf16.msra.mxu3 %v4670_v29  ;;  %v5230_v29 = vor.u32 %v6556_v19, %v5227_v20  ;;  %v6669_v19 = vld [vmem:[#allocation8 + $0x2ec] sm:$0xf0]  ;;  %v5393_v20 = vld [vmem:[#allocation8 + $0xc0] sm:$0xf] }
 0x102   :  { %2018 = vmatmul.bf16.vlgmr.msra.gmra.mxu0 %v7132_v9  ;;  %2031 = vmatmul.bf16.vlgmr.msra.gmra.mxu1 %v7139_v25  ;;  %v5243_v9 = vld [vmem:[#allocation5 + $0x798] sm:$0xf0] }
 0x103   :  { %2062 = vmatpush.bf16.msrb.mxu0 %v4910_v30  ;;  %2075 = vmatpush.bf16.msrb.mxu1 %v5038_v31  ;;  %v5246_v14 = vor.u32 %v6560_v3, %v5243_v9  ;;  %v4955_v30 = vld [vmem:[#allocation5 + $0x558] sm:$0xf0]  ;;  %v6520_v31 = vld [vmem:[#allocation5 + $0x64c] sm:$0xf]  ;;  %v5409_v9 = vld [vmem:[#allocation8 + $0xe0] sm:$0xf] }
 0x104   :  { %2088 = vmatpush.bf16.msrb.mxu2 %v5166_v32  ;;  %2057 = vmatmul.bf16.vlgmr.msra.gmra.mxu3 %v7134_v15  ;;  %v4862_v15 = vor.u32 %v6464_v61, %v4859_v62  ;;  %v5083_v32 = vld [vmem:[#allocation5 + $0x658] sm:$0xf0]  ;;  %v4958_v41 = vor.u32 %v6488_v27, %v4955_v30  ;;  %v6512_v61 = vld [vmem:[#allocation5 + $0x60c] sm:$0xf]  ;;  %v1825_v27 = vadd.f32 %v7184_v13, %v1812_v17  ;;  %v6665_v30 = vld [vmem:[#allocation8 + $0x2cc] sm:$0xf0] }
 0x105   :  { %2101 = vmatpush.bf16.msrb.mxu3 %v5294_v7  ;;  %2044 = vmatmul.bf16.vlgmr.msra.gmra.mxu2 %v7130_v8  ;;  %v6496_v8 = vld [vmem:[#allocation5 + $0x58c] sm:$0xf]  ;;  %v4830_v7 = vor.u32 %v6456_v24, %v4827_v26  ;;  %v5086_v42 = vor.u32 %v6520_v31, %v5083_v32  ;;  %v5179_v3 = vld [vmem:[#allocation5 + $0x718] sm:$0xf0]  ;;  %v5666_v24 = vor.u32 %v6669_v19, %v5665_v18  ;;  %v5377_v31 = vld [vmem:[#allocation8 + $0xa0] sm:$0xf] }
 0x106   :  { %v4990_v25 = vor.u32 %v6496_v8, %v4987_v0  ;;  %v6544_v0 = vld [vmem:[#allocation5 + $0x70c] sm:$0xf]  ;;  %v6597_v32 = vld [vmem:[#allocation8 + $0xac] sm:$0xf0] }
 0x107   :  { %2063 = vmatpush.bf16.msrb.mxu0 %v4894_v45  ;;  %2076 = vmatpush.bf16.msrb.mxu1 %v5022_v46  ;;  %v7188_v33 = vpop.f32.mrf.mxu3  ;;  %v1813_v39 = vpop.f32.mrf.mxu0  ;;  %v6484_v45 = vld [vmem:[#allocation5 + $0x52c] sm:$0xf]  ;;  %v6613_v17 = vld [vmem:[#allocation8 + $0x12c] sm:$0xf0] }
 0x108   :  { %2089 = vmatpush.bf16.msrb.mxu2 %v5150_v47  ;;  %v7186_v28 = vpop.f32.mrf.mxu2  ;;  %v1826_v46 = vpop.f32.mrf.mxu1  ;;  %v5214_v47 = vor.u32 %v6552_v35, %v5211_v36  ;;  %v4942_v57 = vor.u32 %v6484_v45, %v4939_v49  ;;  %v5505_v35 = vld [vmem:[#allocation8 + $0x1a0] sm:$0xf]  ;;  %v6629_v36 = vld [vmem:[#allocation8 + $0x1ac] sm:$0xf0]  ;;  %v5378_v39 = vor.u32 %v6597_v32, %v5377_v31  ;;  %v6635_v32 = vld [vmem:[#allocation8 + $0x1e4] sm:$0xf] }
 0x109   :  { %2102 = vmatpush.bf16.msrb.mxu3 %v5278_v52  ;;  %v6548_v52 = vld [vmem:[#allocation5 + $0x72c] sm:$0xf]  ;;  %v1838_v13 = vadd.f32 %v7186_v28, %v1825_v27  ;;  %v5489_v45 = vld [vmem:[#allocation8 + $0x180] sm:$0xf] }
 0x10a   :  { %v5198_v8 = vor.u32 %v6548_v52, %v5195_v53  ;;  %v5617_v49 = vld [vmem:[#allocation8 + $0x280] sm:$0xf]  ;;  %v6589_v52 = vld [vmem:[#allocation8 + $0x6c] sm:$0xf0] }
 0x10b   :  { %2064 = vmatpush.bf16.msrb.mxu0 %v4878_v58  ;;  %2077 = vmatpush.bf16.msrb.mxu1 %v5006_v59  ;;  %v5070_v58 = vor.u32 %v6516_v50, %v5067_v51  ;;  %v6480_v59 = vld [vmem:[#allocation5 + $0x50c] sm:$0xf]  ;;  %v1851_v46 = vadd.f32 %v7188_v33, %v1838_v13  ;;  %v6657_v50 = vld [vmem:[#allocation8 + $0x28c] sm:$0xf0]  ;;  %v5345_v51 = vld [vmem:[#allocation8 + $0x60] sm:$0xf] }
 0x10c   :  { %2090 = vmatpush.bf16.msrb.mxu2 %v5134_v60  ;;  %v4923_v60 = vld [vmem:[#allocation5 + $0x518] sm:$0xf0] }
 0x10d   :  { %2103 = vmatpush.bf16.msrb.mxu3 %v5262_v63  ;;  %v5051_v63 = vld [vmem:[#allocation5 + $0x618] sm:$0xf0]  ;;  %v4926_v11 = vor.u32 %v6480_v59, %v4923_v60  ;;  %v5601_v59 = vld [vmem:[#allocation8 + $0x260] sm:$0xf]  ;;  %v6653_v60 = vld [vmem:[#allocation8 + $0x26c] sm:$0xf0] }
 0x10e   :  { %v5054_v12 = vor.u32 %v6512_v61, %v5051_v63  ;;  %v5329_v61 = vld [vmem:[#allocation8 + $0x40] sm:$0xf] }
 0x10f   :  { %2065 = vmatpush.bf16.msrb.mxu0 %v4862_v15  ;;  %2078 = vmatpush.bf16.msrb.mxu1 %v4990_v25  ;;  %v1852_v2 = vpop.f32.mrf.mxu3  ;;  %v6605_v15 = vld [vmem:[#allocation8 + $0xec] sm:$0xf0]  ;;  %v4798_v25 = vor.u32 %v6448_v55, %v4795_v56  ;;  %v5618_v56 = vor.u32 %v6657_v50, %v5617_v49  ;;  %v5457_v63 = vld [vmem:[#allocation8 + $0x140] sm:$0xf] }
 0x110   :  { %2091 = vmatpush.bf16.msrb.mxu2 %v5118_v5  ;;  %v1839_v62 = vpop.f32.mrf.mxu2  ;;  %v5537_v5 = vld [vmem:[#allocation8 + $0x1e0] sm:$0xf]  ;;  %v5410_v16 = vor.u32 %v6605_v15, %v5409_v9  ;;  %v6621_v55 = vld [vmem:[#allocation8 + $0x16c] sm:$0xf0]  ;;  %v5602_v2 = vor.u32 %v6653_v60, %v5601_v59  ;;  %v6659_v60 = vld [vmem:[#allocation8 + $0x2a4] sm:$0xf] }
 0x111   :  { %2104 = vmatpush.bf16.msrb.mxu3 %v5246_v14  ;;  %v5182_v14 = vor.u32 %v6544_v0, %v5179_v3  ;;  %v5538_v6 = vor.u32 %v6637_v10, %v5537_v5  ;;  %v6585_v62 = vld [vmem:[#allocation8 + $0x4c] sm:$0xf0] }
 0x112   :  { %v6617_v0 = vld [vmem:[#allocation8 + $0x14c] sm:$0xf0]  ;;  %v5330_v3 = vor.u32 %v6585_v62, %v5329_v61  ;;  %v6591_v62 = vld [vmem:[#allocation8 + $0x84] sm:$0xf] }
 0x113   :  { %2066 = vmatpush.bf16.msrb.mxu0 %v4846_v21  ;;  %2079 = vmatpush.bf16.msrb.mxu1 %v4974_v22  ;;  %v6601_v21 = vld [vmem:[#allocation8 + $0xcc] sm:$0xf0]  ;;  %v5521_v22 = vld [vmem:[#allocation8 + $0x1c0] sm:$0xf]  ;;  %v5458_v10 = vor.u32 %v6617_v0, %v5457_v63  ;;  %v6623_v63 = vld [vmem:[#allocation8 + $0x184] sm:$0xf] }
 0x114   :  { %2092 = vmatpush.bf16.msrb.mxu2 %v5102_v23  ;;  %v6633_v23 = vld [vmem:[#allocation8 + $0x1cc] sm:$0xf0]  ;;  %v5394_v26 = vor.u32 %v6601_v21, %v5393_v20  ;;  %v5569_v20 = vld [vmem:[#allocation8 + $0x220] sm:$0xf]  ;;  %v5491_v0 = vld [vmem:[#allocation8 + $0x190] sm:$0xf0] }
 0x115   :  { %2105 = vmatpush.bf16.msrb.mxu3 %v5230_v29  ;;  %v5649_v29 = vld [vmem:[#allocation8 + $0x2c0] sm:$0xf]  ;;  %v5522_v4 = vor.u32 %v6633_v23, %v5521_v22  ;;  %v6649_v5 = vld [vmem:[#allocation8 + $0x24c] sm:$0xf0] }
 0x116   :  { %v6645_v21 = vld [vmem:[#allocation8 + $0x22c] sm:$0xf0]  ;;  %v5297_v23 = vld [vmem:[#allocation8] sm:$0xf] }
 0x117   :  { %2067 = vmatpush.bf16.msrb.mxu0 %v4830_v7  ;;  %2080 = vmatpush.bf16.msrb.mxu1 %v4958_v41  ;;  %v5650_v7 = vor.u32 %v6665_v30, %v5649_v29  ;;  %v5633_v41 = vld [vmem:[#allocation8 + $0x2a0] sm:$0xf]  ;;  %v6609_v29 = vld [vmem:[#allocation8 + $0x10c] sm:$0xf0]  ;;  %v6603_v30 = vld [vmem:[#allocation8 + $0xe4] sm:$0xf] }
 0x118   :  { %2093 = vmatpush.bf16.msrb.mxu2 %v5086_v42  ;;  %v6661_v42 = vld [vmem:[#allocation8 + $0x2ac] sm:$0xf0] }
 0x119   :  { %2106 = vmatpush.bf16.msrb.mxu3 %v5214_v47 }
 0x11b   :  { %2068 = vmatpush.bf16.msrb.mxu0 %v4814_v54  ;;  %2081 = vmatpush.bf16.msrb.mxu1 %v4942_v57  ;;  %v5473_v54 = vld [vmem:[#allocation8 + $0x160] sm:$0xf]  ;;  %v5346_v57 = vor.u32 %v6589_v52, %v5345_v51  ;;  %v6663_v52 = vld [vmem:[#allocation8 + $0x2c4] sm:$0xf] }
 0x11c   :  { %2094 = vmatpush.bf16.msrb.mxu2 %v5070_v58  ;;  %v5474_v33 = vor.u32 %v6621_v55, %v5473_v54  ;;  %v6595_v55 = vld [vmem:[#allocation8 + $0xa4] sm:$0xf] }
 0x11d   :  { %2107 = vmatpush.bf16.msrb.mxu3 %v5198_v8 }
 0x11f   :  { %2069 = vmatpush.bf16.msrb.mxu0 %v4798_v25  ;;  %2082 = vmatpush.bf16.msrb.mxu1 %v4926_v11  ;;  %v1863_v47 = vpop.f32.mrf.mxu0  ;;  %v1876_v53 = vpop.f32.mrf.mxu1  ;;  %v5585_v25 = vld [vmem:[#allocation8 + $0x240] sm:$0xf] }
 0x120   :  { %2095 = vmatpush.bf16.msrb.mxu2 %v5054_v12  ;;  %v1864_v58 = vadd.f32 %v1863_v47, %v1851_v46  ;;  %v5313_v11 = vld [vmem:[#allocation8 + $0x20] sm:$0xf]  ;;  %v6581_v12 = vld [vmem:[#allocation8 + $0x2c] sm:$0xf0]  ;;  %v5586_v18 = vor.u32 %v6649_v5, %v5585_v25  ;;  %v6631_v46 = vld [vmem:[#allocation8 + $0x1c4] sm:$0xf] }
 0x121   :  { %2108 = vmatpush.bf16.msrb.mxu3 %v5182_v14  ;;  %v6587_v25 = vld [vmem:[#allocation8 + $0x64] sm:$0xf]  ;;  %v5347_v5 = vld [vmem:[#allocation8 + $0x70] sm:$0xf0] }
 0x122   :  { %2070 = vmatmul.bf16.vlgmr.msrb.gmra.mxu0 %v7144_v37  ;;  %2083 = vmatmul.bf16.vlgmr.msrb.gmra.mxu1 %v7148_v40  ;;  %v5506_v37 = vor.u32 %v6629_v36, %v5505_v35  ;;  %v6625_v40 = vld [vmem:[#allocation8 + $0x18c] sm:$0xf0]  ;;  %v1877_v9 = vadd.f32 %v1876_v53, %v1864_v58  ;;  %v5539_v35 = vld [vmem:[#allocation8 + $0x1f0] sm:$0xf0]  ;;  %v5570_v36 = vor.u32 %v6645_v21, %v5569_v20  ;;  %v6583_v20 = vld [vmem:[#allocation8 + $0x44] sm:$0xf] }
 0x123   :  { %2896 = vmatpush.bf16.msra.mxu0 %v5410_v16  ;;  %2909 = vmatpush.bf16.msra.mxu1 %v5538_v6  ;;  %v5490_v28 = vor.u32 %v6625_v40, %v5489_v45  ;;  %v5441_v16 = vld [vmem:[#allocation8 + $0x120] sm:$0xf]  ;;  %v5314_v6 = vor.u32 %v6581_v12, %v5313_v11  ;;  %v5542_v45 = vor.u32 %v6635_v32, %v5539_v35  ;;  %v6599_v40 = vld [vmem:[#allocation8 + $0xc4] sm:$0xf]  ;;  %v5651_v53 = vld [vmem:[#allocation8 + $0x2d0] sm:$0xf0] }
 0x124   :  { %2096 = vmatmul.bf16.vlgmr.msrb.gmra.mxu2 %v7142_v34  ;;  %2109 = vmatmul.bf16.vlgmr.msrb.gmra.mxu3 %v7146_v38  ;;  %v5634_v34 = vor.u32 %v6661_v42, %v5633_v41  ;;  %v5362_v38 = vor.u32 %v6593_v44, %v5361_v43  ;;  %v5442_v22 = vor.u32 %v6613_v17, %v5441_v16  ;;  %v6641_v41 = vld [vmem:[#allocation8 + $0x20c] sm:$0xf0]  ;;  %v6667_v43 = vld [vmem:[#allocation8 + $0x2e4] sm:$0xf]  ;;  %v5667_v44 = vld [vmem:[#allocation8 + $0x2f0] sm:$0xf0] }
 0x125   :  { %2922 = vmatpush.bf16.msra.mxu2 %v5666_v24  ;;  %v6577_v24 = vld [vmem:[#allocation8 + $0xc] sm:$0xf0]  ;;  %v5670_v50 = vor.u32 %v6667_v43, %v5667_v44  ;;  %v5507_v58 = vld [vmem:[#allocation8 + $0x1b0] sm:$0xf0]  ;;  %v5654_v59 = vor.u32 %v6663_v52, %v5651_v53  ;;  %v6619_v11 = vld [vmem:[#allocation8 + $0x164] sm:$0xf]  ;;  %v5350_v17 = vor.u32 %v6587_v25, %v5347_v5 }
 0x126   :  { %v5298_v13 = vor.u32 %v6577_v24, %v5297_v23  ;;  %v5475_v12 = vld [vmem:[#allocation8 + $0x170] sm:$0xf0]  ;;  %v6579_v32 = vld [vmem:[#allocation8 + $0x24] sm:$0xf]  ;;  %v5793_v44 = vld [vmem:[#allocation8 + $0x3e0] sm:$0xf] }
 0x127   :  { %2897 = vmatpush.bf16.msra.mxu0 %v5394_v26  ;;  %2910 = vmatpush.bf16.msra.mxu1 %v5522_v4  ;;  %v1902_v1 = vpop.f32.mrf.mxu3  ;;  %v1865_v15 = vpop.f32.mrf.mxu0  ;;  %v5425_v26 = vld [vmem:[#allocation8 + $0x100] sm:$0xf]  ;;  %v5411_v4 = vld [vmem:[#allocation8 + $0xf0] sm:$0xf0]  ;;  %v5417_v53 = vld [vmem:[#allocation8 + $0xe8] sm:$0xf] }
 0x128   :  { %v1889_v8 = vpop.f32.mrf.mxu2  ;;  %v1878_v14 = vpop.f32.mrf.mxu1  ;;  %v5426_v42 = vor.u32 %v6609_v29, %v5425_v26  ;;  %v5494_v15 = vor.u32 %v6623_v63, %v5491_v0  ;;  %v5331_v21 = vld [vmem:[#allocation8 + $0x50] sm:$0xf0]  ;;  %v6634_v25 = vld [vmem:[#allocation8 + $0x1d4] sm:$0xf0] }
 0x129   :  { %2923 = vmatpush.bf16.msra.mxu2 %v5650_v7  ;;  %v1890_v19 = vadd.f32 %v1889_v8, %v1877_v9  ;;  %v5363_v8 = vld [vmem:[#allocation8 + $0x90] sm:$0xf0]  ;;  %v5334_v29 = vor.u32 %v6583_v20, %v5331_v21  ;;  %v5513_v20 = vld [vmem:[#allocation8 + $0x1a8] sm:$0xf]  ;;  %v6630_v21 = vld [vmem:[#allocation8 + $0x1b4] sm:$0xf0] }
 0x12a   :  { %v5619_v9 = vld [vmem:[#allocation8 + $0x290] sm:$0xf0] }
 0x12b   :  { %2898 = vmatpush.bf16.msra.mxu0 %v5378_v39  ;;  %2911 = vmatpush.bf16.msra.mxu1 %v5506_v37  ;;  %v1903_v7 = vadd.f32 %v1902_v1, %v1890_v19  ;;  %v5553_v39 = vld [vmem:[#allocation8 + $0x200] sm:$0xf]  ;;  %v5414_v37 = vor.u32 %v6603_v30, %v5411_v4  ;;  %v5603_v19 = vld [vmem:[#allocation8 + $0x270] sm:$0xf0]  ;;  %v6647_v30 = vld [vmem:[#allocation8 + $0x244] sm:$0xf] }
 0x12c   :  { %v5554_v47 = vor.u32 %v6641_v41, %v5553_v39  ;;  %v5459_v23 = vld [vmem:[#allocation8 + $0x150] sm:$0xf0]  ;;  %v7213_v39 = vld [vmem:[#allocation7] sm:$0xf] }
 0x12d   :  { %2924 = vmatpush.bf16.msra.mxu2 %v5634_v34  ;;  %v5395_v34 = vld [vmem:[#allocation8 + $0xd0] sm:$0xf0]  ;;  %v7199_v49 = vpack.c.bf16 %v1903_v7, %v1903_v7  ;;  %v6611_v7 = vld [vmem:[#allocation8 + $0x124] sm:$0xf]  ;;  %v412_v41 = vperm.slane %v7213_v39, 2 }
 0x12e   :  { %v5398_v51 = vor.u32 %v6599_v40, %v5395_v34  ;;  %v5587_v4 = vld [vmem:[#allocation8 + $0x250] sm:$0xf0] }
 0x12f   :  { %2899 = vmatpush.bf16.msra.mxu0 %v5362_v38  ;;  %2912 = vmatpush.bf16.msra.mxu1 %v5490_v28  ;;  %v1904_v31 = vpop.f32.mrf.mxu3  ;;  %v5523_v38 = vld [vmem:[#allocation8 + $0x1d0] sm:$0xf0]  ;;  %v7203_v28 = vpack.c.bf16 %v7176_v48, %v7176_v48  ;;  %v5590_v43 = vor.u32 %v6647_v30, %v5587_v4  ;;  %v5514_v30 = vor.u32 %v6630_v21, %v5513_v20  ;;  %v5369_v4 = vld [vmem:[#allocation8 + $0x88] sm:$0xf]  ;;  %v6578_v20 = vld [vmem:[#allocation8 + $0x14] sm:$0xf0] }
 0x130   :  { %v1891_v27 = vpop.f32.mrf.mxu2  ;;  %v5526_v54 = vor.u32 %v6631_v46, %v5523_v38  ;;  %v5315_v35 = vld [vmem:[#allocation8 + $0x30] sm:$0xf0]  ;;  %v6643_v46 = vld [vmem:[#allocation8 + $0x224] sm:$0xf]  ;;  %v5657_v21 = vld [vmem:[#allocation8 + $0x2c8] sm:$0xf] }
 0x131   :  { %2925 = vmatpush.bf16.msra.mxu2 %v5618_v56  ;;  %v5379_v56 = vld [vmem:[#allocation8 + $0xb0] sm:$0xf0]  ;;  %v5318_v40 = vor.u32 %v6579_v32, %v5315_v35  ;;  %v5497_v32 = vld [vmem:[#allocation8 + $0x188] sm:$0xf]  ;;  %v6626_v35 = vld [vmem:[#allocation8 + $0x194] sm:$0xf0] }
 0x132   :  { %v5382_v48 = vor.u32 %v6595_v55, %v5379_v56  ;;  %v5299_v34 = vld [vmem:[#allocation8 + $0x10] sm:$0xf0]  ;;  %v5777_v56 = vld [vmem:[#allocation8 + $0x3c0] sm:$0xf] }
 0x133   :  { %2900 = vmatpush.bf16.msra.mxu0 %v5346_v57  ;;  %2913 = vmatpush.bf16.msra.mxu1 %v5474_v33  ;;  %v6627_v57 = vld [vmem:[#allocation8 + $0x1a4] sm:$0xf]  ;;  %v5635_v33 = vld [vmem:[#allocation8 + $0x2b0] sm:$0xf0] }
 0x134   :  { %v5510_v61 = vor.u32 %v6627_v57, %v5507_v58  ;;  %v5638_v1 = vor.u32 %v6659_v60, %v5635_v33  ;;  %v5571_v38 = vld [vmem:[#allocation8 + $0x230] sm:$0xf0]  ;;  %v6697_v57 = vld [vmem:[#allocation8 + $0x3cc] sm:$0xf0]  ;;  %v5545_v58 = vld [vmem:[#allocation8 + $0x1e8] sm:$0xf] }
 0x135   :  { %2926 = vmatpush.bf16.msra.mxu2 %v5602_v2  ;;  %v5366_v2 = vor.u32 %v6591_v62, %v5363_v8  ;;  %v5427_v52 = vld [vmem:[#allocation8 + $0x110] sm:$0xf0]  ;;  %v5574_v60 = vor.u32 %v6643_v46, %v5571_v38  ;;  %v5778_v33 = vor.u32 %v6697_v57, %v5777_v56  ;;  %v6639_v8 = vld [vmem:[#allocation8 + $0x204] sm:$0xf]  ;;  %v6681_v46 = vld [vmem:[#allocation8 + $0x34c] sm:$0xf0] }
 0x136   :  { %v5555_v63 = vld [vmem:[#allocation8 + $0x210] sm:$0xf0]  ;;  %v6618_v56 = vld [vmem:[#allocation8 + $0x154] sm:$0xf0]  ;;  %v5697_v57 = vld [vmem:[#allocation8 + $0x320] sm:$0xf] }
 0x137   :  { %2901 = vmatpush.bf16.msra.mxu0 %v5330_v3  ;;  %2914 = vmatpush.bf16.msra.mxu1 %v5458_v10  ;;  %v6655_v3 = vld [vmem:[#allocation8 + $0x284] sm:$0xf]  ;;  %v5558_v5 = vor.u32 %v6639_v8, %v5555_v63  ;;  %v6670_v8 = vld [vmem:[#allocation8 + $0x2f4] sm:$0xf0] }
 0x138   :  { %v5622_v16 = vor.u32 %v6655_v3, %v5619_v9  ;;  %v5401_v3 = vld [vmem:[#allocation8 + $0xc8] sm:$0xf]  ;;  %v6602_v9 = vld [vmem:[#allocation8 + $0xd4] sm:$0xf0] }
 0x139   :  { %2927 = vmatpush.bf16.msra.mxu2 %v5586_v18  ;;  %v6651_v18 = vld [vmem:[#allocation8 + $0x264] sm:$0xf] }
 0x13a   :  { %v5606_v27 = vor.u32 %v6651_v18, %v5603_v19  ;;  %v5385_v19 = vld [vmem:[#allocation8 + $0xa8] sm:$0xf] }
 0x13b   :  { %2902 = vmatpush.bf16.msra.mxu0 %v5314_v6  ;;  %2915 = vmatpush.bf16.msra.mxu1 %v5442_v22  ;;  %v5478_v6 = vor.u32 %v6619_v11, %v5475_v12  ;;  %v6615_v22 = vld [vmem:[#allocation8 + $0x144] sm:$0xf]  ;;  %v5761_v11 = vld [vmem:[#allocation8 + $0x3a0] sm:$0xf]  ;;  %v6693_v12 = vld [vmem:[#allocation8 + $0x3ac] sm:$0xf0] }
 0x13c   :  { %v5462_v31 = vor.u32 %v6615_v22, %v5459_v23  ;;  %v5745_v22 = vld [vmem:[#allocation8 + $0x380] sm:$0xf]  ;;  %v6689_v23 = vld [vmem:[#allocation8 + $0x38c] sm:$0xf0] }
 0x13d   :  { %2928 = vmatpush.bf16.msra.mxu2 %v5570_v36 }
 0x13f   :  { %2903 = vmatpush.bf16.msra.mxu0 %v5298_v13  ;;  %2916 = vmatpush.bf16.msra.mxu1 %v5426_v42  ;;  %v1915_v10 = vpop.f32.mrf.mxu0  ;;  %v7207_v14 = vpop.f32.mrf.mxu1  ;;  %v5443_v13 = vld [vmem:[#allocation8 + $0x130] sm:$0xf0] }
 0x141   :  { %2929 = vmatpush.bf16.msra.mxu2 %v5554_v47 }
 0x142   :  { %2904 = vmatmul.bf16.vlgmr.msra.gmra.mxu0 %v7203_v28  ;;  %2917 = vmatmul.bf16.vlgmr.msra.gmra.mxu1 %v7199_v49 }
 0x143   :  { %2948 = vmatpush.bf16.msrb.mxu0 %v5414_v37  ;;  %2961 = vmatpush.bf16.msrb.mxu1 %v5542_v45  ;;  %v6575_v37 = vld [vmem:[#allocation8 + $0x4] sm:$0xf]  ;;  %v6701_v45 = vld [vmem:[#allocation8 + $0x3ec] sm:$0xf0] }
 0x144   :  { %v5794_v47 = vor.u32 %v6701_v45, %v5793_v44  ;;  %v5302_v62 = vor.u32 %v6575_v37, %v5299_v34  ;;  %v5353_v37 = vld [vmem:[#allocation8 + $0x68] sm:$0xf]  ;;  %v5713_v34 = vld [vmem:[#allocation8 + $0x340] sm:$0xf] }
 0x145   :  { %2974 = vmatpush.bf16.msrb.mxu2 %v5670_v50  ;;  %v5446_v50 = vor.u32 %v6611_v7, %v5443_v13  ;;  %v6685_v7 = vld [vmem:[#allocation8 + $0x36c] sm:$0xf0]  ;;  %v5481_v44 = vld [vmem:[#allocation8 + $0x168] sm:$0xf] }
 0x146   :  { %2935 = vmatpush.bf16.msra.mxu3 %v5794_v47 }
 0x147   :  { %2949 = vmatpush.bf16.msrb.mxu0 %v5398_v51  ;;  %2962 = vmatpush.bf16.msrb.mxu1 %v5526_v54  ;;  %v7211_v26 = vpop.f32.mrf.mxu3  ;;  %v1917_v36 = vpop.f32.mrf.mxu0  ;;  %v6607_v51 = vld [vmem:[#allocation8 + $0x104] sm:$0xf]  ;;  %v6606_v54 = vld [vmem:[#allocation8 + $0xf4] sm:$0xf0] }
 0x148   :  { %v7209_v24 = vpop.f32.mrf.mxu2  ;;  %v1930_v42 = vpop.f32.mrf.mxu1  ;;  %v5430_v0 = vor.u32 %v6607_v51, %v5427_v52  ;;  %v5729_v36 = vld [vmem:[#allocation8 + $0x360] sm:$0xf] }
 0x149   :  { %2975 = vmatpush.bf16.msrb.mxu2 %v5654_v59  ;;  %v6638_v59 = vld [vmem:[#allocation8 + $0x1f4] sm:$0xf0] }
 0x14a   :  { %2936 = vmatpush.bf16.msra.mxu3 %v5778_v33 }
 0x14b   :  { %2950 = vmatpush.bf16.msrb.mxu0 %v5382_v48  ;;  %2963 = vmatpush.bf16.msrb.mxu1 %v5510_v61  ;;  %v1916_v61 = vadd.f32 %v1915_v10, %v412_v41  ;;  %v5762_v10 = vor.u32 %v6693_v12, %v5761_v11  ;;  %v5730_v41 = vor.u32 %v6685_v7, %v5729_v36  ;;  %v5305_v12 = vld [vmem:[#allocation8 + $0x8] sm:$0xf]  ;;  %v6636_v36 = vld [vmem:[#allocation8 + $0x1ec] sm:$0xf]  ;;  %v5547_v7 = vld [vmem:[#allocation8 + $0x1f8] sm:$0xf0] }
 0x14d   :  { %2976 = vmatpush.bf16.msrb.mxu2 %v5638_v1  ;;  %v5418_v1 = vor.u32 %v6606_v54, %v5417_v53  ;;  %v5337_v53 = vld [vmem:[#allocation8 + $0x48] sm:$0xf]  ;;  %v6586_v54 = vld [vmem:[#allocation8 + $0x54] sm:$0xf0] }
 0x14e   :  { %2937 = vmatpush.bf16.msra.mxu3 %v5762_v10 }
 0x14f   :  { %2951 = vmatpush.bf16.msrb.mxu0 %v5366_v2  ;;  %2964 = vmatpush.bf16.msrb.mxu1 %v5494_v15  ;;  %v1956_v48 = vpop.f32.mrf.mxu3  ;;  %v5546_v2 = vor.u32 %v6638_v59, %v5545_v58  ;;  %v5529_v15 = vld [vmem:[#allocation8 + $0x1c8] sm:$0xf]  ;;  %v6677_v58 = vld [vmem:[#allocation8 + $0x32c] sm:$0xf0] }
 0x150   :  { %v1943_v55 = vpop.f32.mrf.mxu2  ;;  %v5530_v18 = vor.u32 %v6634_v25, %v5529_v15  ;;  %v5698_v48 = vor.u32 %v6677_v58, %v5697_v57  ;;  %v5681_v25 = vld [vmem:[#allocation8 + $0x300] sm:$0xf]  ;;  %v5747_v57 = vld [vmem:[#allocation8 + $0x390] sm:$0xf0] }
 0x151   :  { %2977 = vmatpush.bf16.msrb.mxu2 %v5622_v16  ;;  %v1929_v16 = vadd.f32 %v7207_v14, %v1916_v61  ;;  %v5746_v14 = vor.u32 %v6689_v23, %v5745_v22  ;;  %v5465_v55 = vld [vmem:[#allocation8 + $0x148] sm:$0xf]  ;;  %v5338_v61 = vor.u32 %v6586_v54, %v5337_v53  ;;  %v6666_v22 = vld [vmem:[#allocation8 + $0x2d4] sm:$0xf0] }
 0x152   :  { %v5466_v63 = vor.u32 %v6618_v56, %v5465_v55  ;;  %v6658_v53 = vld [vmem:[#allocation8 + $0x294] sm:$0xf0]  ;;  %v6687_v56 = vld [vmem:[#allocation8 + $0x384] sm:$0xf] }
 0x153   :  { %2952 = vmatpush.bf16.msrb.mxu0 %v5350_v17  ;;  %2965 = vmatpush.bf16.msrb.mxu1 %v5478_v6  ;;  %v5402_v17 = vor.u32 %v6602_v9, %v5401_v3  ;;  %v6598_v6 = vld [vmem:[#allocation8 + $0xb4] sm:$0xf0] }
 0x154   :  { %2938 = vmatpush.bf16.msra.mxu3 %v5746_v14  ;;  %v6614_v9 = vld [vmem:[#allocation8 + $0x134] sm:$0xf0]  ;;  %v5433_v14 = vld [vmem:[#allocation8 + $0x108] sm:$0xf] }
 0x155   :  { %2978 = vmatpush.bf16.msrb.mxu2 %v5606_v27  ;;  %v1942_v27 = vadd.f32 %v7209_v24, %v1929_v16  ;;  %v5498_v24 = vor.u32 %v6626_v35, %v5497_v32  ;;  %v5779_v32 = vld [vmem:[#allocation8 + $0x3d0] sm:$0xf0]  ;;  %v5658_v35 = vor.u32 %v6666_v22, %v5657_v21  ;;  %v6620_v21 = vld [vmem:[#allocation8 + $0x16c] sm:$0xf] }
 0x157   :  { %2953 = vmatpush.bf16.msrb.mxu0 %v5334_v29  ;;  %2966 = vmatpush.bf16.msrb.mxu1 %v5462_v31  ;;  %v5386_v29 = vor.u32 %v6598_v6, %v5385_v19  ;;  %v6594_v31 = vld [vmem:[#allocation8 + $0x94] sm:$0xf0]  ;;  %v1955_v13 = vadd.f32 %v7211_v26, %v1942_v27 }
 0x158   :  { %v5370_v42 = vor.u32 %v6594_v31, %v5369_v4  ;;  %2939 = vmatpush.bf16.msra.mxu3 %v5730_v41  ;;  %v5419_v4 = vld [vmem:[#allocation8 + $0xf8] sm:$0xf0]  ;;  %v6695_v31 = vld [vmem:[#allocation8 + $0x3c4] sm:$0xf] }
 0x159   :  { %2979 = vmatpush.bf16.msrb.mxu2 %v5590_v43  ;;  %v6590_v43 = vld [vmem:[#allocation8 + $0x74] sm:$0xf0]  ;;  %v5782_v41 = vor.u32 %v6695_v31, %v5779_v32 }
 0x15a   :  { %v5354_v51 = vor.u32 %v6590_v43, %v5353_v37  ;;  %v6662_v37 = vld [vmem:[#allocation8 + $0x2b4] sm:$0xf0] }
 0x15b   :  { %2954 = vmatpush.bf16.msrb.mxu0 %v5318_v40  ;;  %2967 = vmatpush.bf16.msrb.mxu1 %v5446_v50  ;;  %v6622_v40 = vld [vmem:[#allocation8 + $0x174] sm:$0xf0]  ;;  %v5714_v50 = vor.u32 %v6681_v46, %v5713_v34  ;;  %v6600_v34 = vld [vmem:[#allocation8 + $0xcc] sm:$0xf]  ;;  %v5403_v46 = vld [vmem:[#allocation8 + $0xd8] sm:$0xf0] }
 0x15c   :  { %v5482_v52 = vor.u32 %v6622_v40, %v5481_v44  ;;  %v5550_v40 = vor.u32 %v6636_v36, %v5547_v7  ;;  %v5406_v55 = vor.u32 %v6600_v34, %v5403_v46  ;;  %v6584_v7 = vld [vmem:[#allocation8 + $0x4c] sm:$0xf] }
 0x15d   :  { %2980 = vmatpush.bf16.msrb.mxu2 %v5574_v60  ;;  %2940 = vmatpush.bf16.msra.mxu3 %v5714_v50  ;;  %v5531_v50 = vld [vmem:[#allocation8 + $0x1d8] sm:$0xf0] }
 0x15f   :  { %2955 = vmatpush.bf16.msrb.mxu0 %v5302_v62  ;;  %2968 = vmatpush.bf16.msrb.mxu1 %v5430_v0  ;;  %v1967_v45 = vpop.f32.mrf.mxu0  ;;  %v1980_v47 = vpop.f32.mrf.mxu1  ;;  %v5673_v62 = vld [vmem:[#allocation8 + $0x2e8] sm:$0xf] }
 0x160   :  { %v1968_v38 = vadd.f32 %v1967_v45, %v1955_v13  ;;  %v5321_v0 = vld [vmem:[#allocation8 + $0x28] sm:$0xf]  ;;  %v5674_v11 = vor.u32 %v6670_v8, %v5673_v62  ;;  %v5515_v62 = vld [vmem:[#allocation8 + $0x1b8] sm:$0xf0] }
 0x161   :  { %2981 = vmatpush.bf16.msrb.mxu2 %v5558_v5  ;;  %2941 = vmatpush.bf16.msra.mxu3 %v5698_v48  ;;  %v6673_v5 = vld [vmem:[#allocation8 + $0x30c] sm:$0xf0]  ;;  %v5387_v48 = vld [vmem:[#allocation8 + $0xb8] sm:$0xf0]  ;;  %v5609_v8 = vld [vmem:[#allocation8 + $0x268] sm:$0xf] }
 0x162   :  { %2956 = vmatmul.bf16.vlgmr.msrb.gmra.mxu0 %v7203_v28  ;;  %2969 = vmatmul.bf16.vlgmr.msrb.gmra.mxu1 %v7199_v49  ;;  %v1981_v26 = vadd.f32 %v1980_v47, %v1968_v38  ;;  %v5682_v10 = vor.u32 %v6673_v5, %v5681_v25  ;;  %v6632_v38 = vld [vmem:[#allocation8 + $0x1cc] sm:$0xf]  ;;  %v5499_v25 = vld [vmem:[#allocation8 + $0x198] sm:$0xf0]  ;;  %v6683_v5 = vld [vmem:[#allocation8 + $0x364] sm:$0xf] }
 0x163   :  { %3000 = vmatpush.bf16.msra.mxu0 %v5418_v1  ;;  %3013 = vmatpush.bf16.msra.mxu1 %v5546_v2  ;;  %v6582_v1 = vld [vmem:[#allocation8 + $0x34] sm:$0xf0]  ;;  %v5449_v2 = vld [vmem:[#allocation8 + $0x128] sm:$0xf]  ;;  %v5534_v58 = vor.u32 %v6632_v38, %v5531_v50  ;;  %v6668_v38 = vld [vmem:[#allocation8 + $0x2ec] sm:$0xf] }
 0x164   :  { %v5322_v6 = vor.u32 %v6582_v1, %v5321_v0  ;;  %v5450_v27 = vor.u32 %v6614_v9, %v5449_v2  ;;  %v6592_v2 = vld [vmem:[#allocation8 + $0x8c] sm:$0xf] }
 0x165   :  { %2942 = vmatpush.bf16.msra.mxu3 %v5682_v10  ;;  %v6624_v9 = vld [vmem:[#allocation8 + $0x18c] sm:$0xf] }
 0x167   :  { %3001 = vmatpush.bf16.msra.mxu0 %v5402_v17  ;;  %3014 = vmatpush.bf16.msra.mxu1 %v5530_v18  ;;  %v2006_v33 = vpop.f32.mrf.mxu3  ;;  %v1969_v15 = vpop.f32.mrf.mxu0  ;;  %v6699_v17 = vld [vmem:[#allocation8 + $0x3e4] sm:$0xf]  ;;  %v5795_v18 = vld [vmem:[#allocation8 + $0x3f0] sm:$0xf0] }
 0x168   :  { %v1993_v59 = vpop.f32.mrf.mxu2  ;;  %v1982_v16 = vpop.f32.mrf.mxu1  ;;  %v5798_v23 = vor.u32 %v6699_v17, %v5795_v18  ;;  %v5502_v18 = vor.u32 %v6624_v9, %v5499_v25 }
 0x169   :  { %v1994_v60 = vadd.f32 %v1993_v59, %v1981_v26  ;;  %v5763_v26 = vld [vmem:[#allocation8 + $0x3b0] sm:$0xf0]  ;;  %v6596_v59 = vld [vmem:[#allocation8 + $0xac] sm:$0xf]  ;;  %v6650_v16 = vld [vmem:[#allocation8 + $0x254] sm:$0xf0] }
 0x16a   :  { %2987 = vmatpush.bf16.msrb.mxu3 %v5798_v23  ;;  %v5390_v0 = vor.u32 %v6596_v59, %v5387_v48  ;;  %v5483_v23 = vld [vmem:[#allocation8 + $0x178] sm:$0xf0] }
 0x16b   :  { %3002 = vmatpush.bf16.msra.mxu0 %v5386_v29  ;;  %3015 = vmatpush.bf16.msra.mxu1 %v5514_v30  ;;  %v2007_v3 = vadd.f32 %v2006_v33, %v1994_v60  ;;  %v6610_v29 = vld [vmem:[#allocation8 + $0x114] sm:$0xf0]  ;;  %v6604_v30 = vld [vmem:[#allocation8 + $0xec] sm:$0xf]  ;;  %v5750_v60 = vor.u32 %v6687_v56, %v5747_v57  ;;  %v5486_v36 = vor.u32 %v6620_v21, %v5483_v23  ;;  %v6671_v56 = vld [vmem:[#allocation8 + $0x304] sm:$0xf] }
 0x16c   :  { %v5434_v44 = vor.u32 %v6610_v29, %v5433_v14  ;;  %v5422_v45 = vor.u32 %v6604_v30, %v5419_v4  ;;  %v5715_v14 = vld [vmem:[#allocation8 + $0x350] sm:$0xf0]  ;;  %v5577_v30 = vld [vmem:[#allocation8 + $0x228] sm:$0xf]  ;;  %v6646_v4 = vld [vmem:[#allocation8 + $0x234] sm:$0xf0] }
 0x16d   :  { %v7221_v19 = vpack.c.bf16 %v2007_v3, %v2007_v3  ;;  %v5371_v3 = vld [vmem:[#allocation8 + $0x98] sm:$0xf0]  ;;  %v5683_v57 = vld [vmem:[#allocation8 + $0x310] sm:$0xf0]  ;;  %v6652_v21 = vld [vmem:[#allocation8 + $0x26c] sm:$0xf] }
 0x16e   :  { %2988 = vmatpush.bf16.msrb.mxu3 %v5782_v41  ;;  %v5374_v17 = vor.u32 %v6592_v2, %v5371_v3  ;;  %v6616_v41 = vld [vmem:[#allocation8 + $0x14c] sm:$0xf]  ;;  %v5686_v48 = vor.u32 %v6671_v56, %v5683_v57  ;;  %v5435_v2 = vld [vmem:[#allocation8 + $0x118] sm:$0xf0]  ;;  %v413_v3 = vperm.slane %v7213_v39, 3 }
 0x16f   :  { %3003 = vmatpush.bf16.msra.mxu0 %v5370_v42  ;;  %3016 = vmatpush.bf16.msra.mxu1 %v5498_v24  ;;  %v5306_v42 = vor.u32 %v6578_v20, %v5305_v12  ;;  %v5641_v24 = vld [vmem:[#allocation8 + $0x2a8] sm:$0xf]  ;;  %v2008_v43 = vpop.f32.mrf.mxu3  ;;  %v5355_v20 = vld [vmem:[#allocation8 + $0x78] sm:$0xf0] }
 0x170   :  { %2930 = vmatmul.bf16.vlgmr.msra.gmra.mxu2 %v7221_v19  ;;  %v1995_v13 = vpop.f32.mrf.mxu2  ;;  %v5642_v47 = vor.u32 %v6662_v37, %v5641_v24  ;;  %v5593_v12 = vld [vmem:[#allocation8 + $0x248] sm:$0xf]  ;;  %v5467_v24 = vld [vmem:[#allocation8 + $0x158] sm:$0xf0]  ;;  %v6675_v37 = vld [vmem:[#allocation8 + $0x324] sm:$0xf] }
 0x171   :  { %3026 = vmatpush.bf16.msra.mxu2 %v5674_v11  ;;  %v5731_v11 = vld [vmem:[#allocation8 + $0x370] sm:$0xf0]  ;;  %v5594_v22 = vor.u32 %v6650_v16, %v5593_v12  ;;  %v5339_v13 = vld [vmem:[#allocation8 + $0x58] sm:$0xf0]  ;;  %v5470_v50 = vor.u32 %v6616_v41, %v5467_v24  ;;  %v5753_v57 = vld [vmem:[#allocation8 + $0x388] sm:$0xf] }
 0x172   :  { %v5734_v10 = vor.u32 %v6683_v5, %v5731_v11  ;;  %v5699_v43 = vld [vmem:[#allocation8 + $0x330] sm:$0xf0]  ;;  %v5342_v34 = vor.u32 %v6584_v7, %v5339_v13  ;;  %v6660_v5 = vld [vmem:[#allocation8 + $0x2ac] sm:$0xf]  ;;  %v5643_v11 = vld [vmem:[#allocation8 + $0x2b8] sm:$0xf0] }
 0x173   :  { %3004 = vmatpush.bf16.msra.mxu0 %v5354_v51  ;;  %3017 = vmatpush.bf16.msra.mxu1 %v5482_v52  ;;  %v6691_v51 = vld [vmem:[#allocation8 + $0x3a4] sm:$0xf]  ;;  %v5625_v52 = vld [vmem:[#allocation8 + $0x288] sm:$0xf]  ;;  %v6640_v13 = vld [vmem:[#allocation8 + $0x20c] sm:$0xf] }
 0x174   :  { %v5766_v54 = vor.u32 %v6691_v51, %v5763_v26  ;;  %v5626_v33 = vor.u32 %v6658_v53, %v5625_v52  ;;  %v6580_v26 = vld [vmem:[#allocation8 + $0x2c] sm:$0xf]  ;;  %v5323_v52 = vld [vmem:[#allocation8 + $0x38] sm:$0xf0] }
 0x175   :  { %3027 = vmatpush.bf16.msra.mxu2 %v5658_v35  ;;  %v6612_v53 = vld [vmem:[#allocation8 + $0x12c] sm:$0xf]  ;;  %v5563_v41 = vld [vmem:[#allocation8 + $0x218] sm:$0xf0] }
 0x176   :  { %2989 = vmatpush.bf16.msrb.mxu3 %v5766_v54 }
 0x177   :  { %3005 = vmatpush.bf16.msra.mxu0 %v5338_v61  ;;  %3018 = vmatpush.bf16.msra.mxu1 %v5466_v63  ;;  %v6628_v61 = vld [vmem:[#allocation8 + $0x1ac] sm:$0xf]  ;;  %v6654_v63 = vld [vmem:[#allocation8 + $0x274] sm:$0xf0] }
 0x178   :  { %v5518_v1 = vor.u32 %v6628_v61, %v5515_v62  ;;  %v5610_v15 = vor.u32 %v6654_v63, %v5609_v8  ;;  %v6664_v61 = vld [vmem:[#allocation8 + $0x2cc] sm:$0xf]  ;;  %v5659_v62 = vld [vmem:[#allocation8 + $0x2d8] sm:$0xf0] }
 0x179   :  { %3028 = vmatpush.bf16.msra.mxu2 %v5642_v47  ;;  %v5675_v47 = vld [vmem:[#allocation8 + $0x2f8] sm:$0xf0]  ;;  %v6576_v63 = vld [vmem:[#allocation8 + $0xc] sm:$0xf]  ;;  %v5662_v9 = vor.u32 %v6664_v61, %v5659_v62 }
 0x17a   :  { %2990 = vmatpush.bf16.msrb.mxu3 %v5750_v60  ;;  %v5326_v60 = vor.u32 %v6580_v26, %v5323_v52 }
 0x17b   :  { %3006 = vmatpush.bf16.msra.mxu0 %v5322_v6  ;;  %3019 = vmatpush.bf16.msra.mxu1 %v5450_v27  ;;  %v6588_v6 = vld [vmem:[#allocation8 + $0x6c] sm:$0xf]  ;;  %v6679_v27 = vld [vmem:[#allocation8 + $0x344] sm:$0xf] }
 0x17c   :  { %v5718_v31 = vor.u32 %v6679_v27, %v5715_v14  ;;  %v5358_v32 = vor.u32 %v6588_v6, %v5355_v20  ;;  %v5627_v6 = vld [vmem:[#allocation8 + $0x298] sm:$0xf0]  ;;  %v6648_v14 = vld [vmem:[#allocation8 + $0x24c] sm:$0xf] }
 0x17d   :  { %3029 = vmatpush.bf16.msra.mxu2 %v5626_v33 }
 0x17e   :  { %2991 = vmatpush.bf16.msrb.mxu3 %v5734_v10 }
 0x17f   :  { %3007 = vmatpush.bf16.msra.mxu0 %v5306_v42  ;;  %3020 = vmatpush.bf16.msra.mxu1 %v5434_v44  ;;  %v7227_v29 = vpop.f32.mrf.mxu0  ;;  %v7229_v35 = vpop.f32.mrf.mxu1  ;;  %v5578_v42 = vor.u32 %v6646_v4, %v5577_v30  ;;  %v5561_v44 = vld [vmem:[#allocation8 + $0x208] sm:$0xf] }
 0x180   :  { %2982 = vmatmul.bf16.vlgmr.msrb.gmra.mxu2 %v7221_v19  ;;  %v2020_v10 = vadd.f32 %v7227_v29, %v413_v3  ;;  %v5595_v29 = vld [vmem:[#allocation8 + $0x258] sm:$0xf0]  ;;  %v5705_v3 = vld [vmem:[#allocation8 + $0x328] sm:$0xf] }
 0x181   :  { %3030 = vmatpush.bf16.msra.mxu2 %v5610_v15 }
 0x182   :  { %3008 = vmatmul.bf16.vlgmr.msra.gmra.mxu0 %v7203_v28  ;;  %3021 = vmatmul.bf16.vlgmr.msra.gmra.mxu1 %v7199_v49  ;;  %v2033_v39 = vadd.f32 %v7229_v35, %v2020_v10  ;;  %v5579_v35 = vld [vmem:[#allocation8 + $0x238] sm:$0xf0] }
 0x183   :  { %3052 = vmatpush.bf16.msrb.mxu0 %v5422_v45  ;;  %3065 = vmatpush.bf16.msrb.mxu1 %v5550_v40  ;;  %v6642_v45 = vld [vmem:[#allocation8 + $0x214] sm:$0xf0]  ;;  %v5702_v40 = vor.u32 %v6675_v37, %v5699_v43 }
 0x184   :  { %2992 = vmatpush.bf16.msrb.mxu3 %v5718_v31  ;;  %v5562_v54 = vor.u32 %v6642_v45, %v5561_v44  ;;  %v5598_v31 = vor.u32 %v6648_v14, %v5595_v29  ;;  %v5566_v44 = vor.u32 %v6640_v13, %v5563_v41  ;;  %v5801_v45 = vld [vmem:[#allocation8 + $0x3e8] sm:$0xf]  ;;  %v6688_v14 = vld [vmem:[#allocation8 + $0x38c] sm:$0xf]  ;;  %v5755_v29 = vld [vmem:[#allocation8 + $0x398] sm:$0xf0] }
 0x185   :  { %3031 = vmatpush.bf16.msra.mxu2 %v5594_v22  ;;  %v5611_v22 = vld [vmem:[#allocation8 + $0x278] sm:$0xf0]  ;;  %v5921_v13 = vld [vmem:[#allocation11 + $0xe0] sm:$0xf]  ;;  %v6733_v41 = vld [vmem:[#allocation11 + $0xec] sm:$0xf0] }
 0x186   :  { %v5614_v27 = vor.u32 %v6652_v21, %v5611_v22  ;;  %v6692_v22 = vld [vmem:[#allocation8 + $0x3ac] sm:$0xf] }
 0x187   :  { %3053 = vmatpush.bf16.msrb.mxu0 %v5406_v55  ;;  %3066 = vmatpush.bf16.msrb.mxu1 %v5534_v58  ;;  %v2058_v51 = vpop.f32.mrf.mxu3  ;;  %v5451_v55 = vld [vmem:[#allocation8 + $0x138] sm:$0xf0]  ;;  %v5678_v58 = vor.u32 %v6668_v38, %v5675_v47  ;;  %v2021_v59 = vpop.f32.mrf.mxu0 }
 0x188   :  { %v2045_v46 = vpop.f32.mrf.mxu2  ;;  %2993 = vmatpush.bf16.msrb.mxu3 %v5702_v40  ;;  %v2034_v33 = vpop.f32.mrf.mxu1  ;;  %v5454_v8 = vor.u32 %v6612_v53, %v5451_v55  ;;  %v6702_v40 = vld [vmem:[#allocation8 + $0x3f4] sm:$0xf0] }
 0x189   :  { %3032 = vmatpush.bf16.msra.mxu2 %v5578_v42  ;;  %v2046_v23 = vadd.f32 %v2045_v46, %v2033_v39  ;;  %v5802_v38 = vor.u32 %v6702_v40, %v5801_v45  ;;  %v6694_v55 = vld [vmem:[#allocation8 + $0x3b4] sm:$0xf0]  ;;  %v6696_v39 = vld [vmem:[#allocation8 + $0x3cc] sm:$0xf] }
 0x18a   :  { %v6686_v33 = vld [vmem:[#allocation8 + $0x374] sm:$0xf0] }
 0x18b   :  { %3054 = vmatpush.bf16.msrb.mxu0 %v5390_v0  ;;  %3067 = vmatpush.bf16.msrb.mxu1 %v5518_v1  ;;  %v5307_v0 = vld [vmem:[#allocation8 + $0x18] sm:$0xf0]  ;;  %v6608_v1 = vld [vmem:[#allocation8 + $0x10c] sm:$0xf]  ;;  %v2059_v30 = vadd.f32 %v2058_v51, %v2046_v23  ;;  %v6698_v51 = vld [vmem:[#allocation8 + $0x3d4] sm:$0xf0] }
 0x18c   :  { %2994 = vmatpush.bf16.msrb.mxu3 %v5686_v48  ;;  %v5310_v15 = vor.u32 %v6576_v63, %v5307_v0  ;;  %v5438_v12 = vor.u32 %v6608_v1, %v5435_v2  ;;  %v7241_v48 = vld [vmem:[#allocation10] sm:$0xf]  ;;  %v5771_v23 = vld [vmem:[#allocation8 + $0x3b8] sm:$0xf0] }
 0x18d   :  { %3033 = vmatpush.bf16.msra.mxu2 %v5562_v54  ;;  %v5769_v54 = vld [vmem:[#allocation8 + $0x3a8] sm:$0xf]  ;;  %v2248_v61 = vperm.slane %v7241_v48, 0 }
 0x18e   :  { %v5770_v56 = vor.u32 %v6694_v55, %v5769_v54 }
 0x18f   :  { %3055 = vmatpush.bf16.msrb.mxu0 %v5374_v17  ;;  %3068 = vmatpush.bf16.msrb.mxu1 %v5502_v18  ;;  %v2060_v16 = vpop.f32.mrf.mxu3  ;;  %v5646_v17 = vor.u32 %v6660_v5, %v5643_v11  ;;  %v6656_v18 = vld [vmem:[#allocation8 + $0x28c] sm:$0xf]  ;;  %v5689_v5 = vld [vmem:[#allocation8 + $0x308] sm:$0xf]  ;;  %v6674_v11 = vld [vmem:[#allocation8 + $0x314] sm:$0xf0] }
 0x190   :  { %v2047_v25 = vpop.f32.mrf.mxu2  ;;  %3034 = vmatmul.bf16.vlgmr.msra.gmra.mxu2 %v7221_v19  ;;  %v5630_v20 = vor.u32 %v6656_v18, %v5627_v6  ;;  %v5803_v16 = vld [vmem:[#allocation8 + $0x3f8] sm:$0xf0]  ;;  %v5690_v18 = vor.u32 %v6674_v11, %v5689_v5  ;;  %v6709_v5 = vld [vmem:[#allocation11 + $0x2c] sm:$0xf0]  ;;  %v6017_v11 = vld [vmem:[#allocation11 + $0x1a0] sm:$0xf] }
 0x191   :  { %3078 = vmatpush.bf16.msrb.mxu2 %v5678_v58  ;;  %v6690_v58 = vld [vmem:[#allocation8 + $0x394] sm:$0xf0] }
 0x192   :  { %v5754_v59 = vor.u32 %v6690_v58, %v5753_v57  ;;  %v5873_v57 = vld [vmem:[#allocation11 + $0x80] sm:$0xf]  ;;  %v6721_v58 = vld [vmem:[#allocation11 + $0x8c] sm:$0xf0] }
 0x193   :  { %3056 = vmatpush.bf16.msrb.mxu0 %v5358_v32  ;;  %3069 = vmatpush.bf16.msrb.mxu1 %v5486_v36  ;;  %v6644_v36 = vld [vmem:[#allocation8 + $0x22c] sm:$0xf] }
 0x195   :  { %3079 = vmatpush.bf16.msrb.mxu2 %v5662_v9  ;;  %v6678_v9 = vld [vmem:[#allocation8 + $0x334] sm:$0xf0] }
 0x196   :  { %v5706_v25 = vor.u32 %v6678_v9, %v5705_v3 }
 0x197   :  { %3057 = vmatpush.bf16.msrb.mxu0 %v5342_v34  ;;  %3070 = vmatpush.bf16.msrb.mxu1 %v5470_v50  ;;  %v5785_v50 = vld [vmem:[#allocation8 + $0x3c8] sm:$0xf] }
 0x198   :  { %v5786_v52 = vor.u32 %v6698_v51, %v5785_v50  ;;  %v5691_v50 = vld [vmem:[#allocation8 + $0x318] sm:$0xf0] }
 0x199   :  { %3080 = vmatpush.bf16.msrb.mxu2 %v5646_v17 }
 0x19b   :  { %3058 = vmatpush.bf16.msrb.mxu0 %v5326_v60  ;;  %3071 = vmatpush.bf16.msrb.mxu1 %v5454_v8  ;;  %v5737_v60 = vld [vmem:[#allocation8 + $0x368] sm:$0xf] }
 0x19c   :  { %v5738_v62 = vor.u32 %v6686_v33, %v5737_v60  ;;  %v5721_v8 = vld [vmem:[#allocation8 + $0x348] sm:$0xf]  ;;  %v6049_v60 = vld [vmem:[#allocation11 + $0x1e0] sm:$0xf]  ;;  %v6765_v33 = vld [vmem:[#allocation11 + $0x1ec] sm:$0xf0] }
 0x19d   :  { %3081 = vmatpush.bf16.msrb.mxu2 %v5630_v20  ;;  %v5787_v20 = vld [vmem:[#allocation8 + $0x3d8] sm:$0xf0] }
 0x19e   :  { %v5790_v21 = vor.u32 %v6696_v39, %v5787_v20  ;;  %v6705_v39 = vld [vmem:[#allocation11 + $0xc] sm:$0xf0]  ;;  %v6001_v20 = vld [vmem:[#allocation11 + $0x180] sm:$0xf] }
 0x19f   :  { %3059 = vmatpush.bf16.msrb.mxu0 %v5310_v15  ;;  %3072 = vmatpush.bf16.msrb.mxu1 %v5438_v12  ;;  %v2071_v4 = vpop.f32.mrf.mxu0  ;;  %v2084_v32 = vpop.f32.mrf.mxu1  ;;  %v6700_v12 = vld [vmem:[#allocation8 + $0x3ec] sm:$0xf] }
 0x1a0   :  { %v2072_v7 = vadd.f32 %v2071_v4, %v2059_v30  ;;  %v5806_v6 = vor.u32 %v6700_v12, %v5803_v16  ;;  %v5758_v30 = vor.u32 %v6688_v14, %v5755_v29  ;;  %v6684_v4 = vld [vmem:[#allocation8 + $0x36c] sm:$0xf]  ;;  %v2250_v16 = vperm.slane %v7241_v48, 2  ;;  %v6731_v14 = vld [vmem:[#allocation11 + $0xe4] sm:$0xf] }
 0x1a1   :  { %3082 = vmatpush.bf16.msrb.mxu2 %v5614_v27  ;;  %v5774_v27 = vor.u32 %v6692_v22, %v5771_v23  ;;  %v5923_v29 = vld [vmem:[#allocation11 + $0xf0] sm:$0xf0] }
 0x1a2   :  { %3060 = vmatmul.bf16.vlgmr.msrb.gmra.mxu0 %v7203_v28  ;;  %3073 = vmatmul.bf16.vlgmr.msrb.gmra.mxu1 %v7199_v49  ;;  %v5582_v28 = vor.u32 %v6644_v36, %v5579_v35  ;;  %v2085_v49 = vadd.f32 %v2084_v32, %v2072_v7  ;;  %v2249_v32 = vperm.slane %v7241_v48, 1  ;;  %v6680_v35 = vld [vmem:[#allocation8 + $0x34c] sm:$0xf]  ;;  %v5723_v7 = vld [vmem:[#allocation8 + $0x358] sm:$0xf0] }
 0x1a5   :  { %3083 = vmatpush.bf16.msrb.mxu2 %v5598_v31  ;;  %v5739_v31 = vld [vmem:[#allocation8 + $0x378] sm:$0xf0] }
 0x1a6   :  { %v5742_v36 = vor.u32 %v6684_v4, %v5739_v31  ;;  %v5926_v4 = vor.u32 %v6731_v14, %v5923_v29  ;;  %v6707_v29 = vld [vmem:[#allocation11 + $0x24] sm:$0xf] }
 0x1a7   :  { %v2097_v42 = vpop.f32.mrf.mxu2  ;;  %v2110_v37 = vpop.f32.mrf.mxu3 }
 0x1a8   :  { %v2098_v24 = vadd.f32 %v2097_v42, %v2085_v49  ;;  %v2073_v43 = vpop.f32.mrf.mxu0  ;;  %v2086_v34 = vpop.f32.mrf.mxu1 }
 0x1a9   :  { %3084 = vmatpush.bf16.msrb.mxu2 %v5582_v28  ;;  %v6676_v43 = vld [vmem:[#allocation8 + $0x32c] sm:$0xf] }
 0x1aa   :  { %v2111_v46 = vadd.f32 %v2110_v37, %v2098_v24  ;;  %v5726_v24 = vor.u32 %v6680_v35, %v5723_v7  ;;  %v5922_v37 = vor.u32 %v6733_v41, %v5921_v13  ;;  %v6672_v34 = vld [vmem:[#allocation8 + $0x30c] sm:$0xf]  ;;  %v6177_v35 = vld [vmem:[#allocation11 + $0x2e0] sm:$0xf]  ;;  %v6797_v13 = vld [vmem:[#allocation11 + $0x2ec] sm:$0xf0] }
 0x1ab   :  { %v6727_v41 = vld [vmem:[#allocation11 + $0xc4] sm:$0xf] }
 0x1ac   :  { %v7237_v47 = vpack.c.bf16 %v2111_v46, %v2111_v46  ;;  %3890 = vmatpush.bf16.msra.mxu0 %v5922_v37  ;;  %v5905_v46 = vld [vmem:[#allocation11 + $0xc0] sm:$0xf] }
 0x1ad   :  { %3085 = vmatpush.bf16.msrb.mxu2 %v5566_v44  ;;  %v5707_v44 = vld [vmem:[#allocation8 + $0x338] sm:$0xf0]  ;;  %v5969_v37 = vld [vmem:[#allocation11 + $0x140] sm:$0xf] }
 0x1ae   :  { %2943 = vmatmul.bf16.vlgmr.msra.gmra.mxu3 %v7237_v47  ;;  %v5710_v40 = vor.u32 %v6676_v43, %v5707_v44  ;;  %v6745_v43 = vld [vmem:[#allocation11 + $0x14c] sm:$0xf0]  ;;  %v6161_v44 = vld [vmem:[#allocation11 + $0x2c0] sm:$0xf] }
 0x1af   :  { %3039 = vmatpush.bf16.msra.mxu3 %v5802_v38  ;;  %v2099_v26 = vpop.f32.mrf.mxu2  ;;  %v2112_v53 = vpop.f32.mrf.mxu3  ;;  %v6729_v38 = vld [vmem:[#allocation11 + $0xcc] sm:$0xf0] }
 0x1b0   :  { %3086 = vmatmul.bf16.vlgmr.msrb.gmra.mxu2 %v7221_v19  ;;  %v6682_v19 = vld [vmem:[#allocation8 + $0x354] sm:$0xf0]  ;;  %v5906_v51 = vor.u32 %v6729_v38, %v5905_v46  ;;  %v5889_v26 = vld [vmem:[#allocation11 + $0xa0] sm:$0xf] }
 0x1b1   :  { %v5722_v2 = vor.u32 %v6682_v19, %v5721_v8  ;;  %v6050_v8 = vor.u32 %v6765_v33, %v6049_v60  ;;  %v5891_v46 = vld [vmem:[#allocation11 + $0xb0] sm:$0xf0]  ;;  %v5937_v33 = vld [vmem:[#allocation11 + $0x100] sm:$0xf] }
 0x1b2   :  { %3891 = vmatpush.bf16.msra.mxu0 %v5906_v51 }
 0x1b3   :  { %3040 = vmatpush.bf16.msra.mxu3 %v5786_v52  ;;  %v6725_v52 = vld [vmem:[#allocation11 + $0xac] sm:$0xf0]  ;;  %3903 = vmatpush.bf16.msra.mxu1 %v6050_v8 }
 0x1b4   :  { %v5890_v54 = vor.u32 %v6725_v52, %v5889_v26  ;;  %v5953_v26 = vld [vmem:[#allocation11 + $0x120] sm:$0xf] }
 0x1b6   :  { %3892 = vmatpush.bf16.msra.mxu0 %v5890_v54  ;;  %v6741_v54 = vld [vmem:[#allocation11 + $0x12c] sm:$0xf0] }
 0x1b7   :  { %3041 = vmatpush.bf16.msra.mxu3 %v5770_v56  ;;  %v5694_v56 = vor.u32 %v6672_v34, %v5691_v50  ;;  %v6723_v34 = vld [vmem:[#allocation11 + $0xa4] sm:$0xf]  ;;  %v5970_v50 = vor.u32 %v6745_v43, %v5969_v37  ;;  %v5811_v37 = vld [vmem:[#allocation11 + $0x10] sm:$0xf0] }
 0x1b8   :  { %v6751_v43 = vld [vmem:[#allocation11 + $0x184] sm:$0xf] }
 0x1bb   :  { %3042 = vmatpush.bf16.msra.mxu3 %v5754_v59  ;;  %v5874_v59 = vor.u32 %v6721_v58, %v5873_v57  ;;  %v6719_v57 = vld [vmem:[#allocation11 + $0x84] sm:$0xf]  ;;  %v5875_v58 = vld [vmem:[#allocation11 + $0x90] sm:$0xf0] }
 0x1bc   :  { %v5878_v8 = vor.u32 %v6719_v57, %v5875_v58  ;;  %v6795_v58 = vld [vmem:[#allocation11 + $0x2e4] sm:$0xf] }
 0x1bd   :  { %3893 = vmatpush.bf16.msra.mxu0 %v5874_v59  ;;  %v5954_v59 = vor.u32 %v6741_v54, %v5953_v26  ;;  %v6305_v26 = vld [vmem:[#allocation11 + $0x3e0] sm:$0xf]  ;;  %v6747_v54 = vld [vmem:[#allocation11 + $0x164] sm:$0xf] }
 0x1be   :  { %2995 = vmatmul.bf16.vlgmr.msrb.gmra.mxu3 %v7237_v47 }
 0x1bf   :  { %v2905_v63 = vpop.f32.mrf.mxu0  ;;  %v2918_v1 = vpop.f32.mrf.mxu1  ;;  %3043 = vmatpush.bf16.msra.mxu3 %v5738_v62  ;;  %v6717_v62 = vld [vmem:[#allocation11 + $0x6c] sm:$0xf0] }
 0x1c0   :  { %v2906_v0 = vadd.f32 %v2905_v63, %v2248_v61  ;;  %v5857_v61 = vld [vmem:[#allocation11 + $0x60] sm:$0xf] }
 0x1c1   :  { %v5858_v19 = vor.u32 %v6717_v62, %v5857_v61  ;;  %v5841_v63 = vld [vmem:[#allocation11 + $0x40] sm:$0xf]  ;;  %v6737_v61 = vld [vmem:[#allocation11 + $0x10c] sm:$0xf0] }
 0x1c2   :  { %v7245_v15 = vadd.f32 %v2918_v1, %v2906_v0  ;;  %v6713_v0 = vld [vmem:[#allocation11 + $0x4c] sm:$0xf0]  ;;  %v6033_v1 = vld [vmem:[#allocation11 + $0x1c0] sm:$0xf] }
 0x1c3   :  { %3044 = vmatpush.bf16.msra.mxu3 %v5722_v2  ;;  %v6761_v2 = vld [vmem:[#allocation11 + $0x1cc] sm:$0xf0]  ;;  %3894 = vmatpush.bf16.msra.mxu0 %v5858_v19  ;;  %v5842_v3 = vor.u32 %v6713_v0, %v5841_v63  ;;  %v6129_v19 = vld [vmem:[#allocation11 + $0x280] sm:$0xf]  ;;  %v6715_v0 = vld [vmem:[#allocation11 + $0x64] sm:$0xf] }
 0x1c4   :  { %v6034_v9 = vor.u32 %v6761_v2, %v6033_v1  ;;  %v6785_v63 = vld [vmem:[#allocation11 + $0x28c] sm:$0xf0]  ;;  %v5859_v1 = vld [vmem:[#allocation11 + $0x70] sm:$0xf0]  ;;  %v6763_v2 = vld [vmem:[#allocation11 + $0x1e4] sm:$0xf] }
 0x1c6   :  { %3904 = vmatpush.bf16.msra.mxu1 %v6034_v9  ;;  %v5938_v9 = vor.u32 %v6737_v61, %v5937_v33  ;;  %v6289_v33 = vld [vmem:[#allocation11 + $0x3c0] sm:$0xf]  ;;  %v6825_v61 = vld [vmem:[#allocation11 + $0x3cc] sm:$0xf0] }
 0x1c7   :  { %v2907_v10 = vpop.f32.mrf.mxu0  ;;  %v2920_v17 = vpop.f32.mrf.mxu1  ;;  %3045 = vmatpush.bf16.msra.mxu3 %v5706_v25  ;;  %3895 = vmatpush.bf16.msra.mxu0 %v5842_v3  ;;  %v5825_v25 = vld [vmem:[#allocation11 + $0x20] sm:$0xf]  ;;  %v6051_v3 = vld [vmem:[#allocation11 + $0x1f0] sm:$0xf0] }
 0x1c8   :  { %v5826_v10 = vor.u32 %v6709_v5, %v5825_v25  ;;  %v6130_v25 = vor.u32 %v6785_v63, %v6129_v19  ;;  %v5862_v5 = vor.u32 %v6715_v0, %v5859_v1  ;;  %v6290_v63 = vor.u32 %v6825_v61, %v6289_v33  ;;  %v6743_v0 = vld [vmem:[#allocation11 + $0x144] sm:$0xf]  ;;  %v5971_v1 = vld [vmem:[#allocation11 + $0x150] sm:$0xf0] }
 0x1c9   :  { %v6067_v61 = vld [vmem:[#allocation11 + $0x210] sm:$0xf0] }
 0x1cb   :  { %3046 = vmatpush.bf16.msra.mxu3 %v5690_v18  ;;  %3896 = vmatpush.bf16.msra.mxu0 %v5826_v10  ;;  %v6781_v10 = vld [vmem:[#allocation11 + $0x26c] sm:$0xf0] }
 0x1ce   :  { %3047 = vmatmul.bf16.vlgmr.msra.gmra.mxu3 %v7237_v47 }
 0x1cf   :  { %3091 = vmatpush.bf16.msrb.mxu3 %v5806_v6  ;;  %v5809_v6 = vld [vmem:[#allocation11] sm:$0xf] }
 0x1d0   :  { %v5810_v23 = vor.u32 %v6705_v39, %v5809_v6  ;;  %v6035_v6 = vld [vmem:[#allocation11 + $0x1d0] sm:$0xf0] }
 0x1d2   :  { %3897 = vmatpush.bf16.msra.mxu0 %v5810_v23  ;;  %v6097_v23 = vld [vmem:[#allocation11 + $0x240] sm:$0xf] }
 0x1d3   :  { %3092 = vmatpush.bf16.msrb.mxu3 %v5790_v21 }
 0x1d6   :  { %3942 = vmatpush.bf16.msrb.mxu0 %v5926_v4  ;;  %v6755_v4 = vld [vmem:[#allocation11 + $0x1a4] sm:$0xf] }
 0x1d7   :  { %3093 = vmatpush.bf16.msrb.mxu3 %v5774_v27  ;;  %v6753_v27 = vld [vmem:[#allocation11 + $0x18c] sm:$0xf0] }
 0x1db   :  { %3094 = vmatpush.bf16.msrb.mxu3 %v5758_v30  ;;  %v6002_v30 = vor.u32 %v6753_v27, %v6001_v20  ;;  %v6777_v27 = vld [vmem:[#allocation11 + $0x24c] sm:$0xf0] }
 0x1dc   :  { %v6098_v14 = vor.u32 %v6777_v27, %v6097_v23  ;;  %v6735_v27 = vld [vmem:[#allocation11 + $0x104] sm:$0xf] }
 0x1df   :  { %v2957_v28 = vpop.f32.mrf.mxu0  ;;  %v2970_v42 = vpop.f32.mrf.mxu1  ;;  %3095 = vmatpush.bf16.msrb.mxu3 %v5742_v36  ;;  %v6749_v36 = vld [vmem:[#allocation11 + $0x16c] sm:$0xf0] }
 0x1e0   :  { %v2958_v49 = vadd.f32 %v2957_v28, %v2249_v32  ;;  %v5985_v32 = vld [vmem:[#allocation11 + $0x160] sm:$0xf] }
 0x1e1   :  { %v5986_v28 = vor.u32 %v6749_v36, %v5985_v32  ;;  %v2251_v32 = vperm.slane %v7241_v48, 3 }
 0x1e2   :  { %v7249_v45 = vadd.f32 %v2970_v42, %v2958_v49  ;;  %v5907_v49 = vld [vmem:[#allocation11 + $0xd0] sm:$0xf0]  ;;  %v6178_v42 = vor.u32 %v6797_v13, %v6177_v35  ;;  %v6773_v13 = vld [vmem:[#allocation11 + $0x22c] sm:$0xf0] }
 0x1e3   :  { %3096 = vmatpush.bf16.msrb.mxu3 %v5726_v24  ;;  %v5910_v24 = vor.u32 %v6727_v41, %v5907_v49  ;;  %v6019_v35 = vld [vmem:[#allocation11 + $0x1b0] sm:$0xf0] }
 0x1e4   :  { %3916 = vmatpush.bf16.msra.mxu2 %v6178_v42 }
 0x1e5   :  { %3943 = vmatpush.bf16.msrb.mxu0 %v5910_v24  ;;  %v6703_v24 = vld [vmem:[#allocation11 + $0x4] sm:$0xf] }
 0x1e7   :  { %v2959_v53 = vpop.f32.mrf.mxu0  ;;  %v2972_v55 = vpop.f32.mrf.mxu1  ;;  %3097 = vmatpush.bf16.msrb.mxu3 %v5710_v40  ;;  %v6793_v40 = vld [vmem:[#allocation11 + $0x2cc] sm:$0xf0] }
 0x1e8   :  { %v6162_v51 = vor.u32 %v6793_v40, %v6161_v44  ;;  %v5894_v53 = vor.u32 %v6723_v34, %v5891_v46  ;;  %v6145_v55 = vld [vmem:[#allocation11 + $0x2a0] sm:$0xf]  ;;  %v5814_v34 = vor.u32 %v6703_v24, %v5811_v37  ;;  %v6003_v46 = vld [vmem:[#allocation11 + $0x190] sm:$0xf0]  ;;  %v6809_v24 = vld [vmem:[#allocation11 + $0x34c] sm:$0xf0] }
 0x1e9   :  { %v6006_v48 = vor.u32 %v6751_v43, %v6003_v46  ;;  %v6775_v43 = vld [vmem:[#allocation11 + $0x244] sm:$0xf]  ;;  %v6209_v46 = vld [vmem:[#allocation11 + $0x320] sm:$0xf] }
 0x1ea   :  { %3917 = vmatpush.bf16.msra.mxu2 %v6162_v51  ;;  %3944 = vmatpush.bf16.msrb.mxu0 %v5894_v53  ;;  %v6769_v51 = vld [vmem:[#allocation11 + $0x20c] sm:$0xf0] }
 0x1eb   :  { %3098 = vmatpush.bf16.msrb.mxu3 %v5694_v56  ;;  %v6789_v56 = vld [vmem:[#allocation11 + $0x2ac] sm:$0xf0] }
 0x1ec   :  { %v6146_v60 = vor.u32 %v6789_v56, %v6145_v55  ;;  %v6829_v53 = vld [vmem:[#allocation11 + $0x3ec] sm:$0xf0]  ;;  %v5987_v55 = vld [vmem:[#allocation11 + $0x170] sm:$0xf0] }
 0x1ed   :  { %v6306_v56 = vor.u32 %v6829_v53, %v6305_v26  ;;  %v5990_v57 = vor.u32 %v6747_v54, %v5987_v55  ;;  %v6771_v26 = vld [vmem:[#allocation11 + $0x224] sm:$0xf]  ;;  %v5929_v55 = vld [vmem:[#allocation11 + $0xe8] sm:$0xf] }
 0x1ee   :  { %3099 = vmatmul.bf16.vlgmr.msrb.gmra.mxu3 %v7237_v47  ;;  %v6757_v47 = vld [vmem:[#allocation11 + $0x1ac] sm:$0xf0]  ;;  %3918 = vmatpush.bf16.msra.mxu2 %v6146_v60 }
 0x1ef   :  { %v6018_v17 = vor.u32 %v6757_v47, %v6017_v11  ;;  %3945 = vmatpush.bf16.msrb.mxu0 %v5878_v8  ;;  %v6054_v11 = vor.u32 %v6763_v2, %v6051_v3  ;;  %v6711_v47 = vld [vmem:[#allocation11 + $0x44] sm:$0xf]  ;;  %3929 = vmatpush.bf16.msra.mxu3 %v6306_v56  ;;  %v6734_v56 = vld [vmem:[#allocation11 + $0xf4] sm:$0xf0] }
 0x1f0   :  { %v6791_v2 = vld [vmem:[#allocation11 + $0x2c4] sm:$0xf]  ;;  %v5930_v33 = vor.u32 %v6734_v56, %v5929_v55  ;;  %v6227_v56 = vld [vmem:[#allocation11 + $0x350] sm:$0xf0] }
 0x1f1   :  { %3905 = vmatpush.bf16.msra.mxu1 %v6018_v17  ;;  %v5843_v17 = vld [vmem:[#allocation11 + $0x50] sm:$0xf0]  ;;  %v6807_v55 = vld [vmem:[#allocation11 + $0x344] sm:$0xf] }
 0x1f2   :  { %3919 = vmatpush.bf16.msra.mxu2 %v6130_v25  ;;  %v6163_v25 = vld [vmem:[#allocation11 + $0x2d0] sm:$0xf0] }
 0x1f3   :  { %v7252_v12 = vpop.f32.mrf.mxu2  ;;  %3946 = vmatpush.bf16.msrb.mxu0 %v5862_v5  ;;  %v6166_v5 = vor.u32 %v6791_v2, %v6163_v25  ;;  %3930 = vmatpush.bf16.msra.mxu3 %v6290_v63  ;;  %v5913_v63 = vld [vmem:[#allocation11 + $0xc8] sm:$0xf]  ;;  %v6307_v2 = vld [vmem:[#allocation11 + $0x3f0] sm:$0xf0] }
 0x1f5   :  { %3906 = vmatpush.bf16.msra.mxu1 %v6002_v30  ;;  %v5827_v30 = vld [vmem:[#allocation11 + $0x30] sm:$0xf0] }
 0x1f6   :  { %v5830_v36 = vor.u32 %v6707_v29, %v5827_v30  ;;  %v6783_v29 = vld [vmem:[#allocation11 + $0x284] sm:$0xf] }
 0x1f9   :  { %3907 = vmatpush.bf16.msra.mxu1 %v5986_v28  ;;  %v6081_v28 = vld [vmem:[#allocation11 + $0x220] sm:$0xf] }
 0x1fa   :  { %v6082_v42 = vor.u32 %v6773_v13, %v6081_v28  ;;  %v6779_v28 = vld [vmem:[#allocation11 + $0x264] sm:$0xf]  ;;  %v6115_v13 = vld [vmem:[#allocation11 + $0x270] sm:$0xf0] }
 0x1fb   :  { %v2933_v7 = vpop.f32.mrf.mxu2 }
 0x1fc   :  { %v6022_v7 = vor.u32 %v6755_v4, %v6019_v35  ;;  %v6131_v4 = vld [vmem:[#allocation11 + $0x290] sm:$0xf0]  ;;  %v6813_v35 = vld [vmem:[#allocation11 + $0x36c] sm:$0xf0] }
 0x1fd   :  { %3908 = vmatpush.bf16.msra.mxu1 %v5970_v50  ;;  %v6065_v50 = vld [vmem:[#allocation11 + $0x200] sm:$0xf] }
 0x1ff   :  { %v3009_v18 = vpop.f32.mrf.mxu0  ;;  %v3022_v22 = vpop.f32.mrf.mxu1 }
 0x200   :  { %v3010_v21 = vadd.f32 %v3009_v18, %v2250_v16  ;;  %v6113_v16 = vld [vmem:[#allocation11 + $0x260] sm:$0xf]  ;;  %v6759_v18 = vld [vmem:[#allocation11 + $0x1c4] sm:$0xf] }
 0x201   :  { %3909 = vmatpush.bf16.msra.mxu1 %v5954_v59  ;;  %v6114_v39 = vor.u32 %v6781_v10, %v6113_v16  ;;  %v6179_v59 = vld [vmem:[#allocation11 + $0x2f0] sm:$0xf0]  ;;  %v6821_v16 = vld [vmem:[#allocation11 + $0x3ac] sm:$0xf0] }
 0x202   :  { %v7255_v31 = vadd.f32 %v3022_v22, %v3010_v21  ;;  %v5846_v21 = vor.u32 %v6711_v47, %v5843_v17  ;;  %v6038_v22 = vor.u32 %v6759_v18, %v6035_v6  ;;  %v6182_v60 = vor.u32 %v6795_v58, %v6179_v59  ;;  %v6739_v47 = vld [vmem:[#allocation11 + $0x124] sm:$0xf]  ;;  %v5955_v17 = vld [vmem:[#allocation11 + $0x130] sm:$0xf0]  ;;  %v6193_v59 = vld [vmem:[#allocation11 + $0x300] sm:$0xf] }
 0x203   :  { %v7257_v62 = vpop.f32.mrf.mxu2  ;;  %3920 = vmatpush.bf16.msra.mxu2 %v6114_v39  ;;  %v6787_v18 = vld [vmem:[#allocation11 + $0x2a4] sm:$0xf]  ;;  %v5958_v6 = vor.u32 %v6739_v47, %v5955_v17  ;;  %v6147_v39 = vld [vmem:[#allocation11 + $0x2b0] sm:$0xf0] }
 0x204   :  { %3947 = vmatpush.bf16.msrb.mxu0 %v5846_v21  ;;  %v6257_v21 = vld [vmem:[#allocation11 + $0x380] sm:$0xf]  ;;  %v6291_v47 = vld [vmem:[#allocation11 + $0x3d0] sm:$0xf0] }
 0x205   :  { %3910 = vmatpush.bf16.msra.mxu1 %v5938_v9  ;;  %v5974_v9 = vor.u32 %v6743_v0, %v5971_v1  ;;  %v6730_v0 = vld [vmem:[#allocation11 + $0xd4] sm:$0xf0] }
 0x206   :  { %v5914_v25 = vor.u32 %v6730_v0, %v5913_v63  ;;  %v6732_v63 = vld [vmem:[#allocation11 + $0xec] sm:$0xf]  ;;  %v5931_v0 = vld [vmem:[#allocation11 + $0xf8] sm:$0xf0] }
 0x207   :  { %v3011_v38 = vpop.f32.mrf.mxu0  ;;  %v3024_v52 = vpop.f32.mrf.mxu1  ;;  %3921 = vmatpush.bf16.msra.mxu2 %v6098_v14  ;;  %v5939_v14 = vld [vmem:[#allocation11 + $0x110] sm:$0xf0] }
 0x208   :  { %3948 = vmatpush.bf16.msrb.mxu0 %v5830_v36  ;;  %v6066_v52 = vor.u32 %v6769_v51, %v6065_v50  ;;  %v5942_v30 = vor.u32 %v6735_v27, %v5939_v14  ;;  %v6241_v36 = vld [vmem:[#allocation11 + $0x360] sm:$0xf] }
 0x209   :  { %3955 = vmatpush.bf16.msrb.mxu1 %v6054_v11  ;;  %v6273_v11 = vld [vmem:[#allocation11 + $0x3a0] sm:$0xf] }
 0x20a   :  { %v6274_v10 = vor.u32 %v6821_v16, %v6273_v11  ;;  %v6726_v16 = vld [vmem:[#allocation11 + $0xb4] sm:$0xf0] }
 0x20b   :  { %v2985_v20 = vpop.f32.mrf.mxu2  ;;  %3922 = vmatpush.bf16.msra.mxu2 %v6082_v42  ;;  %v6225_v42 = vld [vmem:[#allocation11 + $0x340] sm:$0xf] }
 0x20c   :  { %3949 = vmatpush.bf16.msrb.mxu0 %v5814_v34  ;;  %v6150_v20 = vor.u32 %v6787_v18, %v6147_v39  ;;  %3931 = vmatpush.bf16.msra.mxu3 %v6274_v10  ;;  %v6226_v37 = vor.u32 %v6809_v24, %v6225_v42  ;;  %v2932_v34 = vadd.f32 %v7252_v12, %v7245_v15  ;;  %v6767_v12 = vld [vmem:[#allocation11 + $0x204] sm:$0xf]  ;;  %v6722_v39 = vld [vmem:[#allocation11 + $0x94] sm:$0xf0]  ;;  %v5849_v24 = vld [vmem:[#allocation11 + $0x48] sm:$0xf] }
 0x20d   :  { %3956 = vmatpush.bf16.msrb.mxu1 %v6038_v22  ;;  %v6817_v22 = vld [vmem:[#allocation11 + $0x38c] sm:$0xf0]  ;;  %v6070_v1 = vor.u32 %v6767_v12, %v6067_v61  ;;  %v6823_v10 = vld [vmem:[#allocation11 + $0x3c4] sm:$0xf]  ;;  %v6754_v12 = vld [vmem:[#allocation11 + $0x194] sm:$0xf0] }
 0x20e   :  { %v6258_v23 = vor.u32 %v6817_v22, %v6257_v21  ;;  %v6294_v17 = vor.u32 %v6823_v10, %v6291_v47  ;;  %v6275_v21 = vld [vmem:[#allocation11 + $0x3b0] sm:$0xf0]  ;;  %v6803_v61 = vld [vmem:[#allocation11 + $0x324] sm:$0xf]  ;;  %v5934_v10 = vor.u32 %v6732_v63, %v5931_v0  ;;  %v6185_v47 = vld [vmem:[#allocation11 + $0x2e8] sm:$0xf] }
 0x20f   :  { %3923 = vmatpush.bf16.msra.mxu2 %v6066_v52  ;;  %v6083_v52 = vld [vmem:[#allocation11 + $0x230] sm:$0xf0] }
 0x210   :  { %3932 = vmatpush.bf16.msra.mxu3 %v6258_v23  ;;  %v2984_v23 = vadd.f32 %v7257_v62, %v7249_v45  ;;  %v6762_v62 = vld [vmem:[#allocation11 + $0x1d4] sm:$0xf0] }
 0x211   :  { %3957 = vmatpush.bf16.msrb.mxu1 %v6022_v7  ;;  %v6242_v7 = vor.u32 %v6813_v35, %v6241_v36  ;;  %v6766_v36 = vld [vmem:[#allocation11 + $0x1f4] sm:$0xf0]  ;;  %v6815_v35 = vld [vmem:[#allocation11 + $0x384] sm:$0xf] }
 0x213   :  { %v7260_v49 = vpop.f32.mrf.mxu2  ;;  %3968 = vmatpush.bf16.msrb.mxu2 %v6182_v60  ;;  %v6801_v60 = vld [vmem:[#allocation11 + $0x30c] sm:$0xf0] }
 0x214   :  { %3933 = vmatpush.bf16.msra.mxu3 %v6242_v7  ;;  %v6194_v15 = vor.u32 %v6801_v60, %v6193_v59  ;;  %v6259_v7 = vld [vmem:[#allocation11 + $0x390] sm:$0xf0]  ;;  %v5817_v60 = vld [vmem:[#allocation11 + $0x8] sm:$0xf] }
 0x215   :  { %3958 = vmatpush.bf16.msrb.mxu1 %v6006_v48  ;;  %v6805_v48 = vld [vmem:[#allocation11 + $0x32c] sm:$0xf0] }
 0x216   :  { %v6210_v51 = vor.u32 %v6805_v48, %v6209_v46 }
 0x217   :  { %3969 = vmatpush.bf16.msrb.mxu2 %v6166_v5  ;;  %v5897_v5 = vld [vmem:[#allocation11 + $0xa8] sm:$0xf] }
 0x218   :  { %3934 = vmatpush.bf16.msra.mxu3 %v6226_v37  ;;  %v5898_v18 = vor.u32 %v6726_v16, %v5897_v5  ;;  %v6714_v37 = vld [vmem:[#allocation11 + $0x54] sm:$0xf0]  ;;  %v5993_v5 = vld [vmem:[#allocation11 + $0x168] sm:$0xf] }
 0x219   :  { %3959 = vmatpush.bf16.msrb.mxu1 %v5990_v57  ;;  %v6086_v57 = vor.u32 %v6771_v26, %v6083_v52  ;;  %v5850_v48 = vor.u32 %v6714_v37, %v5849_v24  ;;  %v6710_v26 = vld [vmem:[#allocation11 + $0x34] sm:$0xf0]  ;;  %v6025_v52 = vld [vmem:[#allocation11 + $0x1a8] sm:$0xf] }
 0x21a   :  { %v6153_v24 = vld [vmem:[#allocation11 + $0x2a8] sm:$0xf]  ;;  %v6790_v37 = vld [vmem:[#allocation11 + $0x2b4] sm:$0xf0] }
 0x21b   :  { %v3037_v19 = vpop.f32.mrf.mxu2  ;;  %3970 = vmatpush.bf16.msrb.mxu2 %v6150_v20  ;;  %v6819_v20 = vld [vmem:[#allocation11 + $0x3a4] sm:$0xf] }
 0x21c   :  { %3935 = vmatpush.bf16.msra.mxu3 %v6210_v51  ;;  %v6278_v22 = vor.u32 %v6819_v20, %v6275_v21  ;;  %v5833_v51 = vld [vmem:[#allocation11 + $0x28] sm:$0xf]  ;;  %v5915_v20 = vld [vmem:[#allocation11 + $0xd8] sm:$0xf0] }
 0x21d   :  { %3960 = vmatpush.bf16.msrb.mxu1 %v5974_v9 }
 0x21f   :  { %v3061_v41 = vpop.f32.mrf.mxu0  ;;  %v3074_v40 = vpop.f32.mrf.mxu1 }
 0x220   :  { %v3062_v44 = vadd.f32 %v3061_v41, %v2251_v32  ;;  %v6134_v32 = vor.u32 %v6783_v29, %v6131_v4  ;;  %v6118_v41 = vor.u32 %v6779_v28, %v6115_v13  ;;  %3936 = vmatpush.bf16.msra.mxu3 %v6194_v15  ;;  %v5865_v29 = vld [vmem:[#allocation11 + $0x68] sm:$0xf]  ;;  %v6262_v28 = vor.u32 %v6815_v35, %v6259_v7 }
 0x221   :  { %3961 = vmatpush.bf16.msrb.mxu1 %v5958_v6  ;;  %v5881_v6 = vld [vmem:[#allocation11 + $0x88] sm:$0xf] }
 0x222   :  { %v7262_v38 = vadd.f32 %v3074_v40, %v3062_v44  ;;  %3971 = vmatpush.bf16.msrb.mxu2 %v6134_v32  ;;  %v6099_v44 = vld [vmem:[#allocation11 + $0x250] sm:$0xf0]  ;;  %v5882_v14 = vor.u32 %v6722_v39, %v5881_v6  ;;  %v6057_v4 = vld [vmem:[#allocation11 + $0x1e8] sm:$0xf]  ;;  %v6798_v6 = vld [vmem:[#allocation11 + $0x2f4] sm:$0xf0] }
 0x223   :  { %v6102_v40 = vor.u32 %v6775_v43, %v6099_v44  ;;  %v6058_v42 = vor.u32 %v6766_v36, %v6057_v4  ;;  %v6041_v43 = vld [vmem:[#allocation11 + $0x1c8] sm:$0xf]  ;;  %v6811_v44 = vld [vmem:[#allocation11 + $0x364] sm:$0xf]  ;;  %v6728_v39 = vld [vmem:[#allocation11 + $0xcc] sm:$0xf] }
 0x224   :  { %v6009_v15 = vld [vmem:[#allocation11 + $0x188] sm:$0xf]  ;;  %v6794_v4 = vld [vmem:[#allocation11 + $0x2d4] sm:$0xf0]  ;;  %v5899_v36 = vld [vmem:[#allocation11 + $0xb8] sm:$0xf0] }
 0x225   :  { %3962 = vmatpush.bf16.msrb.mxu1 %v5942_v30  ;;  %v6718_v30 = vld [vmem:[#allocation11 + $0x74] sm:$0xf0] }
 0x226   :  { %3972 = vmatpush.bf16.msrb.mxu2 %v6118_v41  ;;  %v5866_v41 = vor.u32 %v6718_v30, %v5865_v29  ;;  %v6746_v29 = vld [vmem:[#allocation11 + $0x154] sm:$0xf0]  ;;  %v6169_v30 = vld [vmem:[#allocation11 + $0x2c8] sm:$0xf] }
 0x227   :  { %v3063_v8 = vpop.f32.mrf.mxu0  ;;  %v3076_v3 = vpop.f32.mrf.mxu1 }
 0x228   :  { %v6827_v8 = vld [vmem:[#allocation11 + $0x3e4] sm:$0xf] }
 0x229   :  { %v6310_v3 = vor.u32 %v6827_v8, %v6307_v2  ;;  %v6211_v8 = vld [vmem:[#allocation11 + $0x330] sm:$0xf0]  ;;  %v3036_v2 = vadd.f32 %v7260_v49, %v7255_v31 }
 0x22a   :  { %3973 = vmatpush.bf16.msrb.mxu2 %v6102_v40  ;;  %v6243_v40 = vld [vmem:[#allocation11 + $0x370] sm:$0xf0] }
 0x22b   :  { %3981 = vmatpush.bf16.msrb.mxu3 %v6310_v3 }
 0x22e   :  { %3974 = vmatpush.bf16.msrb.mxu2 %v6086_v57  ;;  %v6230_v57 = vor.u32 %v6807_v55, %v6227_v56  ;;  %v6059_v55 = vld [vmem:[#allocation11 + $0x1f8] sm:$0xf0] }
 0x22f   :  { %3982 = vmatpush.bf16.msrb.mxu3 %v6294_v17  ;;  %v6799_v17 = vld [vmem:[#allocation11 + $0x304] sm:$0xf] }
 0x231   :  { %v2944_v50 = vpop.f32.mrf.mxu3 }
 0x232   :  { %v2945_v53 = vadd.f32 %v2944_v50, %v2932_v34  ;;  %3975 = vmatpush.bf16.msrb.mxu2 %v6070_v1  ;;  %v6246_v34 = vor.u32 %v6811_v44, %v6243_v40  ;;  %v6042_v50 = vor.u32 %v6762_v62, %v6041_v43  ;;  %v6214_v1 = vor.u32 %v6803_v61, %v6211_v8  ;;  %v6720_v43 = vld [vmem:[#allocation11 + $0x8c] sm:$0xf]  ;;  %v5883_v62 = vld [vmem:[#allocation11 + $0x98] sm:$0xf0] }
 0x233   :  { %v7266_v54 = vpop.f32.mrf.mxu2  ;;  %3983 = vmatpush.bf16.msrb.mxu3 %v6278_v22  ;;  %v6154_v40 = vor.u32 %v6790_v37, %v6153_v24  ;;  %v6760_v61 = vld [vmem:[#allocation11 + $0x1cc] sm:$0xf]  ;;  %v6043_v8 = vld [vmem:[#allocation11 + $0x1d8] sm:$0xf0] }
 0x234   :  { %v3104_v58 = vmax.f32 %v2945_v53, 0.0  ;;  %v6758_v53 = vld [vmem:[#allocation11 + $0x1b4] sm:$0xf0] }
 0x235   :  { %v6026_v59 = vor.u32 %v6758_v53, %v6025_v52  ;;  %v5867_v52 = vld [vmem:[#allocation11 + $0x78] sm:$0xf0]  ;;  %v6764_v53 = vld [vmem:[#allocation11 + $0x1ec] sm:$0xf] }
 0x236   :  { %v7268_v19 = vpack.c.bf16 %v3104_v58, %v3104_v58  ;;  %v5834_v58 = vor.u32 %v6710_v26, %v5833_v51  ;;  %v6786_v51 = vld [vmem:[#allocation11 + $0x294] sm:$0xf0]  ;;  %v6716_v26 = vld [vmem:[#allocation11 + $0x6c] sm:$0xf] }
 0x237   :  { %3984 = vmatpush.bf16.msrb.mxu3 %v6262_v28  ;;  %v6170_v28 = vor.u32 %v6794_v4, %v6169_v30 }
 0x238   :  { %3898 = vmatmul.bf16.vlgmr.msra.gmra.mxu0 %v7268_v19 }
 0x239   :  { %3994 = vmatpush.bf16.msra.mxu0 %v5930_v33  ;;  %v2946_v9 = vpop.f32.mrf.mxu3  ;;  %v6706_v33 = vld [vmem:[#allocation11 + $0x14] sm:$0xf0] }
 0x23a   :  { %v5818_v9 = vor.u32 %v6706_v33, %v5817_v60  ;;  %v6062_v60 = vor.u32 %v6764_v53, %v6059_v55  ;;  %v6782_v33 = vld [vmem:[#allocation11 + $0x274] sm:$0xf0]  ;;  %v6740_v55 = vld [vmem:[#allocation11 + $0x12c] sm:$0xf] }
 0x23b   :  { %v3089_v11 = vpop.f32.mrf.mxu2  ;;  %3985 = vmatpush.bf16.msrb.mxu3 %v6246_v34  ;;  %v5886_v34 = vor.u32 %v6720_v43, %v5883_v62  ;;  %v6297_v43 = vld [vmem:[#allocation11 + $0x3c8] sm:$0xf]  ;;  %v6826_v62 = vld [vmem:[#allocation11 + $0x3d4] sm:$0xf0] }
 0x23c   :  { %v6750_v11 = vld [vmem:[#allocation11 + $0x174] sm:$0xf0] }
 0x23d   :  { %3995 = vmatpush.bf16.msra.mxu0 %v5914_v25  ;;  %v6010_v25 = vor.u32 %v6754_v12, %v6009_v15  ;;  %v5994_v31 = vor.u32 %v6750_v11, %v5993_v5  ;;  %v6712_v15 = vld [vmem:[#allocation11 + $0x4c] sm:$0xf]  ;;  %v5851_v12 = vld [vmem:[#allocation11 + $0x58] sm:$0xf0]  ;;  %v6822_v53 = vld [vmem:[#allocation11 + $0x3b4] sm:$0xf0] }
 0x23e   :  { %v5854_v0 = vor.u32 %v6712_v15, %v5851_v12  ;;  %v6756_v5 = vld [vmem:[#allocation11 + $0x1ac] sm:$0xf]  ;;  %v6027_v11 = vld [vmem:[#allocation11 + $0x1b8] sm:$0xf0]  ;;  %v6818_v15 = vld [vmem:[#allocation11 + $0x394] sm:$0xf0] }
 0x23f   :  { %3986 = vmatpush.bf16.msrb.mxu3 %v6230_v57  ;;  %v6736_v12 = vld [vmem:[#allocation11 + $0x10c] sm:$0xf] }
 0x241   :  { %3996 = vmatpush.bf16.msra.mxu0 %v5898_v18  ;;  %v2996_v27 = vpop.f32.mrf.mxu3  ;;  %v6195_v18 = vld [vmem:[#allocation11 + $0x310] sm:$0xf0] }
 0x242   :  { %v2997_v32 = vadd.f32 %v2996_v27, %v2984_v23  ;;  %v6198_v21 = vor.u32 %v6799_v17, %v6195_v18  ;;  %v6186_v23 = vor.u32 %v6798_v6, %v6185_v47  ;;  %v5918_v27 = vor.u32 %v6728_v39, %v5915_v20  ;;  %v6089_v47 = vld [vmem:[#allocation11 + $0x228] sm:$0xf]  ;;  %v6774_v18 = vld [vmem:[#allocation11 + $0x234] sm:$0xf0]  ;;  %v6704_v6 = vld [vmem:[#allocation11 + $0xc] sm:$0xf] }
 0x243   :  { %3987 = vmatpush.bf16.msrb.mxu3 %v6214_v1  ;;  %v6105_v1 = vld [vmem:[#allocation11 + $0x248] sm:$0xf]  ;;  %v6030_v17 = vor.u32 %v6756_v5, %v6027_v11  ;;  %v5819_v39 = vld [vmem:[#allocation11 + $0x18] sm:$0xf0]  ;;  %v6752_v20 = vld [vmem:[#allocation11 + $0x18c] sm:$0xf] }
 0x244   :  { %v3105_v13 = vmax.f32 %v2997_v32, 0.0  ;;  %v6724_v32 = vld [vmem:[#allocation11 + $0xac] sm:$0xf]  ;;  %v6123_v5 = vld [vmem:[#allocation11 + $0x278] sm:$0xf0] }
 0x245   :  { %3997 = vmatpush.bf16.msra.mxu0 %v5882_v14  ;;  %v5977_v14 = vld [vmem:[#allocation11 + $0x148] sm:$0xf] }
 0x246   :  { %v7273_v45 = vpack.c.bf16 %v3105_v13, %v3105_v13  ;;  %v5978_v7 = vor.u32 %v6746_v29, %v5977_v14  ;;  %v5902_v13 = vor.u32 %v6724_v32, %v5899_v36  ;;  %v6073_v14 = vld [vmem:[#allocation11 + $0x208] sm:$0xf]  ;;  %v6770_v29 = vld [vmem:[#allocation11 + $0x214] sm:$0xf0] }
 0x247   :  { %3988 = vmatpush.bf16.msrb.mxu3 %v6198_v21  ;;  %v6011_v21 = vld [vmem:[#allocation11 + $0x198] sm:$0xf0]  ;;  %v6313_v32 = vld [vmem:[#allocation11 + $0x3e8] sm:$0xf]  ;;  %v6830_v36 = vld [vmem:[#allocation11 + $0x3f4] sm:$0xf0] }
 0x248   :  { %3911 = vmatmul.bf16.vlgmr.msra.gmra.mxu1 %v7273_v45  ;;  %3950 = vmatmul.bf16.vlgmr.msrb.gmra.mxu0 %v7268_v19  ;;  %v6014_v4 = vor.u32 %v6752_v20, %v6011_v21  ;;  %v6217_v20 = vld [vmem:[#allocation11 + $0x328] sm:$0xf]  ;;  %v6806_v21 = vld [vmem:[#allocation11 + $0x334] sm:$0xf0] }
 0x249   :  { %3998 = vmatpush.bf16.msra.mxu0 %v5866_v41  ;;  %4007 = vmatpush.bf16.msra.mxu1 %v6058_v42  ;;  %v2998_v46 = vpop.f32.mrf.mxu3  ;;  %v5961_v41 = vld [vmem:[#allocation11 + $0x128] sm:$0xf]  ;;  %v6742_v42 = vld [vmem:[#allocation11 + $0x134] sm:$0xf0] }
 0x24a   :  { %v5962_v44 = vor.u32 %v6742_v42, %v5961_v41  ;;  %v5945_v46 = vld [vmem:[#allocation11 + $0x108] sm:$0xf] }
 0x24d   :  { %3999 = vmatpush.bf16.msra.mxu0 %v5850_v48  ;;  %4008 = vmatpush.bf16.msra.mxu1 %v6042_v50  ;;  %v6738_v48 = vld [vmem:[#allocation11 + $0x114] sm:$0xf0]  ;;  %v6137_v50 = vld [vmem:[#allocation11 + $0x288] sm:$0xf] }
 0x24e   :  { %v5946_v56 = vor.u32 %v6738_v48, %v5945_v46  ;;  %v6138_v57 = vor.u32 %v6786_v51, %v6137_v50  ;;  %v6171_v46 = vld [vmem:[#allocation11 + $0x2d8] sm:$0xf0]  ;;  %v6298_v50 = vor.u32 %v6826_v62, %v6297_v43 }
 0x24f   :  { %v6267_v43 = vld [vmem:[#allocation11 + $0x398] sm:$0xf0] }
 0x251   :  { %4000 = vmatpush.bf16.msra.mxu0 %v5834_v58  ;;  %4009 = vmatpush.bf16.msra.mxu1 %v6026_v59  ;;  %v3048_v3 = vpop.f32.mrf.mxu3  ;;  %v5870_v58 = vor.u32 %v6716_v26, %v5867_v52  ;;  %v6121_v59 = vld [vmem:[#allocation11 + $0x268] sm:$0xf] }
 0x252   :  { %v3049_v16 = vadd.f32 %v3048_v3, %v3036_v2  ;;  %v6122_v63 = vor.u32 %v6782_v33, %v6121_v59  ;;  %v6046_v2 = vor.u32 %v6760_v61, %v6043_v8  ;;  %v6778_v3 = vld [vmem:[#allocation11 + $0x254] sm:$0xf0]  ;;  %v6281_v52 = vld [vmem:[#allocation11 + $0x3a8] sm:$0xf]  ;;  %v5947_v61 = vld [vmem:[#allocation11 + $0x118] sm:$0xf0] }
 0x253   :  { %v6282_v59 = vor.u32 %v6822_v53, %v6281_v52  ;;  %v6265_v33 = vld [vmem:[#allocation11 + $0x388] sm:$0xf]  ;;  %v6784_v8 = vld [vmem:[#allocation11 + $0x28c] sm:$0xf] }
 0x254   :  { %v3106_v22 = vmax.f32 %v3049_v16, 0.0  ;;  %v6106_v16 = vor.u32 %v6778_v3, %v6105_v1  ;;  %v5950_v1 = vor.u32 %v6736_v12, %v5947_v61  ;;  %v6249_v3 = vld [vmem:[#allocation11 + $0x368] sm:$0xf]  ;;  %v6800_v53 = vld [vmem:[#allocation11 + $0x30c] sm:$0xf]  ;;  %v4113_v12 = vld [vmem:[#allocation13 + $0x58] sm:$0xff] }
 0x255   :  { %4001 = vmatpush.bf16.msra.mxu0 %v5818_v9  ;;  %4010 = vmatpush.bf16.msra.mxu1 %v6010_v25  ;;  %v6708_v9 = vld [vmem:[#allocation11 + $0x2c] sm:$0xf]  ;;  %v5835_v25 = vld [vmem:[#allocation11 + $0x38] sm:$0xf0]  ;;  %v4112_v61 = vld [vmem:[#allocation13 + $0x50] sm:$0xff] }
 0x256   :  { %v7279_v49 = vpack.c.bf16 %v3106_v22, %v3106_v22  ;;  %v3088_v22 = vadd.f32 %v7266_v54, %v7262_v38  ;;  %v6074_v38 = vor.u32 %v6770_v29, %v6073_v14  ;;  %v6314_v54 = vor.u32 %v6830_v36, %v6313_v32  ;;  %v6201_v14 = vld [vmem:[#allocation11 + $0x308] sm:$0xf]  ;;  %v6802_v29 = vld [vmem:[#allocation11 + $0x314] sm:$0xf0]  ;;  %v6828_v32 = vld [vmem:[#allocation11 + $0x3ec] sm:$0xf] }
 0x257   :  { %v6315_v36 = vld [vmem:[#allocation11 + $0x3f8] sm:$0xf0] }
 0x258   :  { %3924 = vmatmul.bf16.vlgmr.msra.gmra.mxu2 %v7279_v49  ;;  %3963 = vmatmul.bf16.vlgmr.msrb.gmra.mxu1 %v7273_v45 }
 0x259   :  { %4046 = vmatpush.bf16.msrb.mxu0 %v5934_v10  ;;  %4011 = vmatpush.bf16.msra.mxu1 %v5994_v31  ;;  %v3050_v35 = vpop.f32.mrf.mxu3  ;;  %v5838_v10 = vor.u32 %v6708_v9, %v5835_v25  ;;  %v6814_v9 = vld [vmem:[#allocation11 + $0x374] sm:$0xf0]  ;;  %v6780_v25 = vld [vmem:[#allocation11 + $0x26c] sm:$0xf] }
 0x25a   :  { %4002 = vmatmul.bf16.vlgmr.msra.gmra.mxu0 %v7268_v19  ;;  %4020 = vmatpush.bf16.msra.mxu2 %v6186_v23  ;;  %v6090_v23 = vor.u32 %v6774_v18, %v6089_v47  ;;  %v6748_v35 = vld [vmem:[#allocation11 + $0x16c] sm:$0xf]  ;;  %v6250_v11 = vor.u32 %v6814_v9, %v6249_v3  ;;  %v6810_v47 = vld [vmem:[#allocation11 + $0x354] sm:$0xf0]  ;;  %v6107_v18 = vld [vmem:[#allocation11 + $0x258] sm:$0xf0] }
 0x25b   :  { %v4108_v3 = vld [vmem:[#allocation13 + $0x30] sm:$0xff] }
 0x25c   :  { %v4132_v9 = vld [vmem:[#allocation13 + $0xf0] sm:$0xff] }
 0x25d   :  { %4047 = vmatpush.bf16.msrb.mxu0 %v5918_v27  ;;  %4012 = vmatpush.bf16.msra.mxu1 %v5978_v7  ;;  %v5822_v27 = vor.u32 %v6704_v6, %v5819_v39  ;;  %v5995_v7 = vld [vmem:[#allocation11 + $0x178] sm:$0xf0] }
 0x25e   :  { %4021 = vmatpush.bf16.msra.mxu2 %v6170_v28  ;;  %v6796_v28 = vld [vmem:[#allocation11 + $0x2ec] sm:$0xf]  ;;  %v5998_v24 = vor.u32 %v6748_v35, %v5995_v7  ;;  %v6202_v35 = vor.u32 %v6802_v29, %v6201_v14  ;;  %v6318_v7 = vor.u32 %v6828_v32, %v6315_v36  ;;  %v4125_v14 = vld [vmem:[#allocation13 + $0xb8] sm:$0xff]  ;;  %v4148_v32 = vld [vmem:[#allocation13 + $0x170] sm:$0xff] }
 0x25f   :  { %v4149_v29 = vld [vmem:[#allocation13 + $0x178] sm:$0xff]  ;;  %v4123_v36 = vld [vmem:[#allocation13 + $0xa8] sm:$0xff] }
 0x261   :  { %4048 = vmatpush.bf16.msrb.mxu0 %v5902_v13  ;;  %4013 = vmatpush.bf16.msra.mxu1 %v5962_v44  ;;  %v6187_v13 = vld [vmem:[#allocation11 + $0x2f8] sm:$0xf0]  ;;  %v6744_v44 = vld [vmem:[#allocation11 + $0x14c] sm:$0xf] }
 0x262   :  { %4022 = vmatpush.bf16.msra.mxu2 %v6154_v40  ;;  %v6190_v37 = vor.u32 %v6796_v28, %v6187_v13  ;;  %v5979_v40 = vld [vmem:[#allocation11 + $0x158] sm:$0xf0]  ;;  %v6824_v28 = vld [vmem:[#allocation11 + $0x3cc] sm:$0xf] }
 0x263   :  { %v5982_v51 = vor.u32 %v6744_v44, %v5979_v40  ;;  %v6299_v13 = vld [vmem:[#allocation11 + $0x3d8] sm:$0xf0]  ;;  %v6812_v44 = vld [vmem:[#allocation11 + $0x36c] sm:$0xf] }
 0x264   :  { %v6251_v40 = vld [vmem:[#allocation11 + $0x378] sm:$0xf0] }
 0x265   :  { %4049 = vmatpush.bf16.msrb.mxu0 %v5886_v34  ;;  %4014 = vmatpush.bf16.msra.mxu1 %v5946_v56  ;;  %v6792_v34 = vld [vmem:[#allocation11 + $0x2cc] sm:$0xf]  ;;  %v5963_v56 = vld [vmem:[#allocation11 + $0x138] sm:$0xf0] }
 0x266   :  { %4023 = vmatpush.bf16.msra.mxu2 %v6138_v57  ;;  %v6174_v26 = vor.u32 %v6792_v34, %v6171_v46  ;;  %v6788_v57 = vld [vmem:[#allocation11 + $0x2ac] sm:$0xf]  ;;  %v6254_v34 = vor.u32 %v6812_v44, %v6251_v40  ;;  %v4118_v44 = vld [vmem:[#allocation13 + $0x80] sm:$0xff] }
 0x267   :  { %v6808_v46 = vld [vmem:[#allocation11 + $0x34c] sm:$0xf]  ;;  %v4142_v40 = vld [vmem:[#allocation13 + $0x140] sm:$0xff] }
 0x268   :  { %3976 = vmatmul.bf16.vlgmr.msrb.gmra.mxu2 %v7279_v49  ;;  %4015 = vmatmul.bf16.vlgmr.msra.gmra.mxu1 %v7273_v45 }
 0x269   :  { %4050 = vmatpush.bf16.msrb.mxu0 %v5870_v58  ;;  %4059 = vmatpush.bf16.msrb.mxu1 %v6062_v60  ;;  %v6155_v58 = vld [vmem:[#allocation11 + $0x2b8] sm:$0xf0] }
 0x26a   :  { %4024 = vmatpush.bf16.msra.mxu2 %v6122_v63  ;;  %v6158_v60 = vor.u32 %v6788_v57, %v6155_v58  ;;  %v6139_v63 = vld [vmem:[#allocation11 + $0x298] sm:$0xf0] }
 0x26b   :  { %v4117_v58 = vld [vmem:[#allocation13 + $0x78] sm:$0xff] }
 0x26d   :  { %4051 = vmatpush.bf16.msrb.mxu0 %v5854_v0  ;;  %4060 = vmatpush.bf16.msrb.mxu1 %v6046_v2  ;;  %v6266_v0 = vor.u32 %v6818_v15, %v6265_v33  ;;  %v6142_v2 = vor.u32 %v6784_v8, %v6139_v63  ;;  %v4111_v8 = vld [vmem:[#allocation13 + $0x48] sm:$0xff] }
 0x26e   :  { %4025 = vmatpush.bf16.msra.mxu2 %v6106_v16  ;;  %v6126_v16 = vor.u32 %v6780_v25, %v6123_v5  ;;  %v4107_v25 = vld [vmem:[#allocation13 + $0x28] sm:$0xff] }
 0x26f   :  { %v4131_v5 = vld [vmem:[#allocation13 + $0xe8] sm:$0xff] }
 0x271   :  { %v3100_v31 = vpop.f32.mrf.mxu3  ;;  %4052 = vmatpush.bf16.msrb.mxu0 %v5838_v10  ;;  %4061 = vmatpush.bf16.msrb.mxu1 %v6030_v17  ;;  %v6233_v10 = vld [vmem:[#allocation11 + $0x348] sm:$0xf]  ;;  %v6776_v17 = vld [vmem:[#allocation11 + $0x24c] sm:$0xf] }
 0x272   :  { %v3101_v30 = vadd.f32 %v3100_v31, %v3088_v22  ;;  %4026 = vmatpush.bf16.msra.mxu2 %v6090_v23  ;;  %v6234_v6 = vor.u32 %v6810_v47, %v6233_v10  ;;  %v6110_v39 = vor.u32 %v6776_v17, %v6107_v18  ;;  %v6772_v22 = vld [vmem:[#allocation11 + $0x22c] sm:$0xf]  ;;  %v6091_v31 = vld [vmem:[#allocation11 + $0x238] sm:$0xf0]  ;;  %v6218_v23 = vor.u32 %v6806_v21, %v6217_v20 }
 0x273   :  { %v4105_v10 = vld [vmem:[#allocation13 + $0x18] sm:$0xff]  ;;  %v4103_v20 = vld [vmem:[#allocation13 + $0x8] sm:$0xff] }
 0x274   :  { %v3107_v41 = vmax.f32 %v3101_v30, 0.0  ;;  %v6768_v30 = vld [vmem:[#allocation11 + $0x20c] sm:$0xf]  ;;  %v4129_v47 = vld [vmem:[#allocation13 + $0xd8] sm:$0xff] }
 0x275   :  { %4053 = vmatpush.bf16.msrb.mxu0 %v5822_v27  ;;  %4062 = vmatpush.bf16.msrb.mxu1 %v6014_v4  ;;  %v6094_v27 = vor.u32 %v6772_v22, %v6091_v31  ;;  %v6075_v4 = vld [vmem:[#allocation11 + $0x218] sm:$0xf0]  ;;  %v4127_v21 = vld [vmem:[#allocation13 + $0xc8] sm:$0xff]  ;;  %v4102_v31 = vld [vmem:[#allocation13] sm:$0xff] }
 0x276   :  { %v7288_v42 = vpack.c.bf16 %v3107_v41, %v3107_v41  ;;  %4027 = vmatpush.bf16.msra.mxu2 %v6074_v38  ;;  %v6302_v41 = vor.u32 %v6824_v28, %v6299_v13  ;;  %v6820_v38 = vld [vmem:[#allocation11 + $0x3ac] sm:$0xf]  ;;  %v4146_v28 = vld [vmem:[#allocation13 + $0x160] sm:$0xff]  ;;  %v4121_v13 = vld [vmem:[#allocation13 + $0x98] sm:$0xff] }
 0x278   :  { %3937 = vmatmul.bf16.vlgmr.msra.gmra.mxu3 %v7288_v42  ;;  %4054 = vmatmul.bf16.vlgmr.msrb.gmra.mxu0 %v7268_v19  ;;  %v5966_v19 = vor.u32 %v6740_v55, %v5963_v56 }
 0x279   :  { %4033 = vmatpush.bf16.msra.mxu3 %v6314_v54  ;;  %v3102_v48 = vpop.f32.mrf.mxu3  ;;  %4063 = vmatpush.bf16.msrb.mxu1 %v5998_v24  ;;  %v6283_v54 = vld [vmem:[#allocation11 + $0x3b8] sm:$0xf0] }
 0x27a   :  { %4072 = vmatpush.bf16.msrb.mxu2 %v6190_v37  ;;  %v6286_v24 = vor.u32 %v6820_v38, %v6283_v54  ;;  %v6816_v37 = vld [vmem:[#allocation11 + $0x38c] sm:$0xf]  ;;  %v6235_v48 = vld [vmem:[#allocation11 + $0x358] sm:$0xf0]  ;;  %4170 = vmatpush.msra.mxu0 %v4117_v58  ;;  %v4120_v54 = vld [vmem:[#allocation13 + $0x90] sm:$0xff] }
 0x27b   :  { %4028 = vmatmul.bf16.vlgmr.msra.gmra.mxu2 %v7279_v49  ;;  %v6270_v62 = vor.u32 %v6816_v37, %v6267_v43  ;;  %v4145_v38 = vld [vmem:[#allocation13 + $0x158] sm:$0xff]  ;;  %v4119_v37 = vld [vmem:[#allocation13 + $0x88] sm:$0xff] }
 0x27c   :  { %v4143_v43 = vld [vmem:[#allocation13 + $0x148] sm:$0xff] }
 0x27d   :  { %4034 = vmatpush.bf16.msra.mxu3 %v6298_v50  ;;  %4064 = vmatpush.bf16.msrb.mxu1 %v5982_v51  ;;  %v6238_v50 = vor.u32 %v6808_v46, %v6235_v48  ;;  %v6804_v51 = vld [vmem:[#allocation11 + $0x32c] sm:$0xf]  ;;  %v4141_v48 = vld [vmem:[#allocation13 + $0x138] sm:$0xff] }
 0x27e   :  { %4073 = vmatpush.bf16.msrb.mxu2 %v6174_v26  ;;  %v6219_v26 = vld [vmem:[#allocation11 + $0x338] sm:$0xf0] }
 0x27f   :  { %v6222_v52 = vor.u32 %v6804_v51, %v6219_v26  ;;  %v4140_v51 = vld [vmem:[#allocation13 + $0x130] sm:$0xff]  ;;  %v4139_v26 = vld [vmem:[#allocation13 + $0x128] sm:$0xff] }
 0x281   :  { %4035 = vmatpush.bf16.msra.mxu3 %v6282_v59  ;;  %4065 = vmatpush.bf16.msrb.mxu1 %v5966_v19  ;;  %v4116_v59 = vld [vmem:[#allocation13 + $0x70] sm:$0xff]  ;;  %v4115_v19 = vld [vmem:[#allocation13 + $0x68] sm:$0xff] }
 0x282   :  { %4074 = vmatpush.bf16.msrb.mxu2 %v6158_v60  ;;  %4171 = vmatpush.msra.mxu0 %v4116_v59  ;;  %v4114_v60 = vld [vmem:[#allocation13 + $0x60] sm:$0xff] }
 0x284   :  { %4172 = vmatpush.msra.mxu0 %v4115_v19 }
 0x285   :  { %4036 = vmatpush.bf16.msra.mxu3 %v6266_v0  ;;  %4066 = vmatpush.bf16.msrb.mxu1 %v5950_v1  ;;  %v4109_v1 = vld [vmem:[#allocation13 + $0x38] sm:$0xff] }
 0x286   :  { %4075 = vmatpush.bf16.msrb.mxu2 %v6142_v2  ;;  %4173 = vmatpush.msra.mxu0 %v4114_v60  ;;  %v4133_v2 = vld [vmem:[#allocation13 + $0xf8] sm:$0xff]  ;;  %v4136_v60 = vld [vmem:[#allocation13 + $0x110] sm:$0xff] }
 0x288   :  { %3989 = vmatmul.bf16.vlgmr.msrb.gmra.mxu3 %v7288_v42  ;;  %4067 = vmatmul.bf16.vlgmr.msrb.gmra.mxu1 %v7273_v45  ;;  %v6078_v45 = vor.u32 %v6768_v30, %v6075_v4  ;;  %v4124_v4 = vld [vmem:[#allocation13 + $0xb0] sm:$0xff] }
 0x289   :  { %4037 = vmatpush.bf16.msra.mxu3 %v6250_v11  ;;  %4174 = vmatpush.msra.mxu0 %v4113_v12  ;;  %v4106_v11 = vld [vmem:[#allocation13 + $0x20] sm:$0xff] }
 0x28a   :  { %4076 = vmatpush.bf16.msrb.mxu2 %v6126_v16  ;;  %4190 = vmatpush.msra.mxu1 %v4133_v2  ;;  %v4130_v16 = vld [vmem:[#allocation13 + $0xe0] sm:$0xff]  ;;  %v4163_v2 = vld [vmem:[#allocation13 + $0x1e8] sm:$0xff] }
 0x28b   :  { %4175 = vmatpush.msra.mxu0 %v4112_v61 }
 0x28c   :  { %4191 = vmatpush.msra.mxu1 %v4132_v9  ;;  %v4162_v9 = vld [vmem:[#allocation13 + $0x1e0] sm:$0xff] }
 0x28d   :  { %4038 = vmatpush.bf16.msra.mxu3 %v6234_v6  ;;  %4176 = vmatpush.msra.mxu0 %v4111_v8  ;;  %v4104_v6 = vld [vmem:[#allocation13 + $0x10] sm:$0xff]  ;;  %v4135_v8 = vld [vmem:[#allocation13 + $0x108] sm:$0xff] }
 0x28e   :  { %4077 = vmatpush.bf16.msrb.mxu2 %v6110_v39  ;;  %4192 = vmatpush.msra.mxu1 %v4131_v5  ;;  %v4128_v39 = vld [vmem:[#allocation13 + $0xd0] sm:$0xff] }
 0x290   :  { %4193 = vmatpush.msra.mxu1 %v4130_v16  ;;  %v4160_v16 = vld [vmem:[#allocation13 + $0x1d0] sm:$0xff] }
 0x291   :  { %4039 = vmatpush.bf16.msra.mxu3 %v6218_v23  ;;  %v4126_v23 = vld [vmem:[#allocation13 + $0xc0] sm:$0xff] }
 0x292   :  { %4078 = vmatpush.bf16.msrb.mxu2 %v6094_v27  ;;  %4194 = vmatpush.msra.mxu1 %v4129_v47 }
 0x294   :  { %4195 = vmatpush.msra.mxu1 %v4128_v39 }
 0x295   :  { %4040 = vmatpush.bf16.msra.mxu3 %v6202_v35  ;;  %v4147_v35 = vld [vmem:[#allocation13 + $0x168] sm:$0xff] }
 0x296   :  { %4079 = vmatpush.bf16.msrb.mxu2 %v6078_v45  ;;  %4196 = vmatpush.msra.mxu1 %v4127_v21 }
 0x298   :  { %4041 = vmatmul.bf16.vlgmr.msra.gmra.mxu3 %v7288_v42  ;;  %4197 = vmatpush.msra.mxu1 %v4126_v23 }
 0x299   :  { %4085 = vmatpush.bf16.msrb.mxu3 %v6318_v7  ;;  %4080 = vmatmul.bf16.vlgmr.msrb.gmra.mxu2 %v7279_v49  ;;  %v6203_v49 = vld [vmem:[#allocation11 + $0x318] sm:$0xf0]  ;;  %v4122_v7 = vld [vmem:[#allocation13 + $0xa0] sm:$0xff] }
 0x29a   :  { %v6206_v55 = vor.u32 %v6800_v53, %v6203_v49  ;;  %4210 = vmatpush.msra.mxu2 %v4149_v29  ;;  %4198 = vmatpush.msra.mxu1 %v4125_v14  ;;  %v4138_v53 = vld [vmem:[#allocation13 + $0x120] sm:$0xff]  ;;  %v4156_v14 = vld [vmem:[#allocation13 + $0x1b0] sm:$0xff] }
 0x29c   :  { %4199 = vmatpush.msra.mxu1 %v4124_v4  ;;  %4211 = vmatpush.msra.mxu2 %v4148_v32  ;;  %v4153_v4 = vld [vmem:[#allocation13 + $0x198] sm:$0xff] }
 0x29d   :  { %4086 = vmatpush.bf16.msrb.mxu3 %v6302_v41 }
 0x29e   :  { %4200 = vmatpush.msra.mxu1 %v4123_v36  ;;  %4212 = vmatpush.msra.mxu2 %v4147_v35  ;;  %v4152_v36 = vld [vmem:[#allocation13 + $0x190] sm:$0xff] }
 0x2a0   :  { %4201 = vmatpush.msra.mxu1 %v4122_v7  ;;  %4213 = vmatpush.msra.mxu2 %v4146_v28 }
 0x2a1   :  { %4087 = vmatpush.bf16.msrb.mxu3 %v6286_v24  ;;  %v4144_v24 = vld [vmem:[#allocation13 + $0x150] sm:$0xff] }
 0x2a2   :  { %4202 = vmatpush.msra.mxu1 %v4121_v13  ;;  %4214 = vmatpush.msra.mxu2 %v4145_v38  ;;  %v4150_v13 = vld [vmem:[#allocation13 + $0x180] sm:$0xff] }
 0x2a4   :  { %4203 = vmatpush.msra.mxu1 %v4120_v54  ;;  %4215 = vmatpush.msra.mxu2 %v4144_v24 }
 0x2a5   :  { %4088 = vmatpush.bf16.msrb.mxu3 %v6270_v62 }
 0x2a6   :  { %4204 = vmatpush.msra.mxu1 %v4119_v37  ;;  %4216 = vmatpush.msra.mxu2 %v4143_v43 }
 0x2a8   :  { %4205 = vmatpush.msra.mxu1 %v4118_v44  ;;  %4217 = vmatpush.msra.mxu2 %v4142_v40 }
 0x2a9   :  { %4089 = vmatpush.bf16.msrb.mxu3 %v6254_v34  ;;  %v7313_v34 = vld [vmem:[%s7340_s6] sm:$0xf] }
 0x2aa   :  { %4218 = vmatpush.msra.mxu2 %v4141_v48  ;;  %v3244_v29 = vperm.slane %v7313_v34, 2 }
 0x2ac   :  { %4219 = vmatpush.msra.mxu2 %v4140_v51  ;;  %v6843_v51 = vld [vmem:[%s7342_s8] ss:$0 sm:$0xff] }
 0x2ad   :  { %4090 = vmatpush.bf16.msrb.mxu3 %v6238_v50  ;;  %v3242_v50 = vperm.slane %v7313_v34, 0 }
 0x2ae   :  { %4220 = vmatpush.msra.mxu2 %v4139_v26 }
 0x2b0   :  { %4221 = vmatpush.msra.mxu2 %v4138_v53 }
 0x2b1   :  { %4091 = vmatpush.bf16.msrb.mxu3 %v6222_v52 }
 0x2b5   :  { %4092 = vmatpush.bf16.msrb.mxu3 %v6206_v55  ;;  %v7298_v56 = vpop.f32.mrf.mxu0 }
 0x2b6   :  { %v3900_v49 = vadd.f32 %v7298_v56, %v3242_v50  ;;  %v4164_v56 = vld [vmem:[#allocation13 + $0x1f0] sm:$0xff] }
 0x2b8   :  { %4093 = vmatmul.bf16.vlgmr.msrb.gmra.mxu3 %v7288_v42  ;;  %v4110_v42 = vld [vmem:[#allocation13 + $0x40] sm:$0xff] }
 0x2b9   :  { %4177 = vmatpush.msra.mxu0 %v4110_v42  ;;  %v4165_v42 = vld [vmem:[#allocation13 + $0x1f8] sm:$0xff] }
 0x2ba   :  { %4230 = vmatpush.msra.mxu3 %v4165_v42 }
 0x2bb   :  { %4178 = vmatpush.msra.mxu0 %v4109_v1 }
 0x2bc   :  { %4231 = vmatpush.msra.mxu3 %v4164_v56 }
 0x2bd   :  { %v3901_v57 = vpop.f32.mrf.mxu0  ;;  %4179 = vmatpush.msra.mxu0 %v4108_v3 }
 0x2be   :  { %v4137_v57 = vld [vmem:[#allocation13 + $0x118] sm:$0xff]  ;;  %4232 = vmatpush.msra.mxu3 %v4163_v2 }
 0x2bf   :  { %4180 = vmatpush.msra.mxu0 %v4107_v25  ;;  %4222 = vmatpush.msra.mxu2 %v4137_v57  ;;  %v4161_v25 = vld [vmem:[#allocation13 + $0x1d8] sm:$0xff] }
 0x2c0   :  { %4233 = vmatpush.msra.mxu3 %v4162_v9 }
 0x2c1   :  { %4181 = vmatpush.msra.mxu0 %v4106_v11  ;;  %4223 = vmatpush.msra.mxu2 %v4136_v60 }
 0x2c2   :  { %4234 = vmatpush.msra.mxu3 %v4161_v25 }
 0x2c3   :  { %4182 = vmatpush.msra.mxu0 %v4105_v10  ;;  %4224 = vmatpush.msra.mxu2 %v4135_v8 }
 0x2c4   :  { %4235 = vmatpush.msra.mxu3 %v4160_v16 }
 0x2c5   :  { %v7300_v33 = vpop.f32.mrf.mxu1  ;;  %v7302_v15 = vpop.f32.mrf.mxu0  ;;  %4183 = vmatpush.msra.mxu0 %v4104_v6  ;;  %v4159_v6 = vld [vmem:[#allocation13 + $0x1c8] sm:$0xff] }
 0x2c6   :  { %v3913_v58 = vadd.f32 %v7300_v33, %v3900_v49  ;;  %v3243_v33 = vperm.slane %v7313_v34, 1  ;;  %4236 = vmatpush.msra.mxu3 %v4159_v6 }
 0x2c7   :  { %4184 = vmatpush.msra.mxu0 %v4103_v20  ;;  %v4158_v20 = vld [vmem:[#allocation13 + $0x1c0] sm:$0xff] }
 0x2c8   :  { %v3952_v5 = vadd.f32 %v7302_v15, %v3243_v33  ;;  %4237 = vmatpush.msra.mxu3 %v4158_v20  ;;  %v4155_v15 = vld [vmem:[#allocation13 + $0x1a8] sm:$0xff] }
 0x2c9   :  { %4185 = vmatpush.msra.mxu0 %v4102_v31  ;;  %v4157_v31 = vld [vmem:[#allocation13 + $0x1b8] sm:$0xff] }
 0x2ca   :  { %4238 = vmatpush.msra.mxu3 %v4157_v31 }
 0x2cc   :  { %4239 = vmatpush.msra.mxu3 %v4156_v14 }
 0x2cd   :  { %v3914_v63 = vpop.f32.mrf.mxu1  ;;  %v3953_v0 = vpop.f32.mrf.mxu0 }
 0x2ce   :  { %v4134_v0 = vld [vmem:[#allocation13 + $0x100] sm:$0xff]  ;;  %4240 = vmatpush.msra.mxu3 %v4155_v15 }
 0x2cf   :  { %4225 = vmatpush.msra.mxu2 %v4134_v0 }
 0x2d5   :  { %v7304_v17 = vpop.f32.mrf.mxu1 }
 0x2d6   :  { %v3965_v47 = vadd.f32 %v7304_v17, %v3952_v5 }
 0x2d7   :  { %v7306_v18 = vpop.f32.mrf.mxu0 }
 0x2d8   :  { %v4004_v32 = vadd.f32 %v7306_v18, %v3244_v29 }
 0x2db   :  { %v3925_v22 = vpop.f32.mrf.mxu2 }
 0x2dc   :  { %v3926_v59 = vadd.f32 %v3925_v22, %v3913_v58 }
 0x2dd   :  { %v3966_v27 = vpop.f32.mrf.mxu1 }
 0x2df   :  { %v4005_v30 = vpop.f32.mrf.mxu0 }
 0x2e0   :  { %v4154_v30 = vld [vmem:[#allocation13 + $0x1a0] sm:$0xff] }
 0x2e1   :  { %4241 = vmatpush.msra.mxu3 %v4154_v30 }
 0x2e3   :  { %v3927_v45 = vpop.f32.mrf.mxu2  ;;  %4242 = vmatpush.msra.mxu3 %v4153_v4 }
 0x2e4   :  { %v4151_v45 = vld [vmem:[#allocation13 + $0x188] sm:$0xff] }
 0x2e5   :  { %v7308_v41 = vpop.f32.mrf.mxu1  ;;  %4243 = vmatpush.msra.mxu3 %v4152_v36 }
 0x2e6   :  { %v4017_v35 = vadd.f32 %v7308_v41, %v4004_v32 }
 0x2e7   :  { %4244 = vmatpush.msra.mxu3 %v4151_v45 }
 0x2e9   :  { %4245 = vmatpush.msra.mxu3 %v4150_v13 }
 0x2eb   :  { %v3977_v62 = vpop.f32.mrf.mxu2 }
 0x2ec   :  { %v3978_v39 = vadd.f32 %v3977_v62, %v3965_v47  ;;  %v3245_v62 = vperm.slane %v7313_v34, 3 }
 0x2ed   :  { %v4018_v46 = vpop.f32.mrf.mxu1 }
 0x2f3   :  { %v3979_v55 = vpop.f32.mrf.mxu2 }
 0x2f5   :  { %v7316_v52 = vpop.f32.mrf.mxu0 }
 0x2f6   :  { %v4056_v18 = vadd.f32 %v7316_v52, %v3245_v62 }
 0x2fb   :  { %v3938_v19 = vpop.f32.mrf.mxu3 }
 0x2fc   :  { %v3939_v12 = vadd.f32 %v3938_v19, %v3926_v59 }
 0x2fd   :  { %v4057_v61 = vpop.f32.mrf.mxu0 }
 0x2fe   :  { %v4098_v63 = vmax.f32 %v3939_v12, 0.0  ;;  %v4029_v1 = vpop.f32.mrf.mxu2 }
 0x2ff   :  { %v4030_v7 = vadd.f32 %v4029_v1, %v4017_v35 }
 0x300   :  { %4186 = vmatmul.f32.vlgmr.msra.gmra.mxu0 %v4098_v63 }
 0x303   :  { %v3940_v3 = vpop.f32.mrf.mxu3 }
 0x305   :  { %v4068_v11 = vpop.f32.mrf.mxu1 }
 0x306   :  { %v4031_v10 = vpop.f32.mrf.mxu2  ;;  %v4069_v44 = vadd.f32 %v4068_v11, %v4056_v18 }
 0x30b   :  { %v3990_v21 = vpop.f32.mrf.mxu3 }
 0x30c   :  { %v3991_v22 = vadd.f32 %v3990_v21, %v3978_v39 }
 0x30d   :  { %v4070_v27 = vpop.f32.mrf.mxu1 }
 0x30e   :  { %v4099_v23 = vmax.f32 %v3991_v22, 0.0 }
 0x310   :  { %4206 = vmatmul.f32.vlgmr.msra.gmra.mxu1 %v4099_v23 }
 0x313   :  { %v3992_v17 = vpop.f32.mrf.mxu3 }
 0x31b   :  { %v4042_v28 = vpop.f32.mrf.mxu3 }
 0x31c   :  { %v4043_v38 = vadd.f32 %v4042_v28, %v4030_v7  ;;  %v4081_v54 = vpop.f32.mrf.mxu2 }
 0x31d   :  { %v4082_v40 = vadd.f32 %v4081_v54, %v4069_v44 }
 0x31e   :  { %v4100_v24 = vmax.f32 %v4043_v38, 0.0 }
 0x320   :  { %4226 = vmatmul.f32.vlgmr.msra.gmra.mxu2 %v4100_v24 }
 0x323   :  { %v4044_v37 = vpop.f32.mrf.mxu3 }
 0x324   :  { %v4083_v43 = vpop.f32.mrf.mxu2 }
 0x33b   :  { %v4094_v41 = vpop.f32.mrf.mxu3 }
 0x33c   :  { %v4095_v46 = vadd.f32 %v4094_v41, %v4082_v40 }
 0x33e   :  { %v4101_v48 = vmax.f32 %v4095_v46, 0.0 }
 0x340   :  { %4246 = vmatmul.f32.vlgmr.msra.gmra.mxu3 %v4101_v48 }
 0x343   :  { %v4096_v50 = vpop.f32.mrf.mxu3 }
 0x37d   :  { %v4187_v26 = vpop.f32.mrf.mxu0 }
 0x37e   :  { %v4188_v49 = vadd.f32 %v6843_v51, %v4187_v26 }
 0x38d   :  { %v4207_v53 = vpop.f32.mrf.mxu1 }
 0x38e   :  { %v4208_v57 = vadd.f32 %v4207_v53, %v4188_v49 }
 0x3a3   :  { %v4227_v55 = vpop.f32.mrf.mxu2 }
 0x3a4   :  { %v4228_v34 = vadd.f32 %v4227_v55, %v4208_v57 }
 0x3c3   :  { %v4247_v52 = vpop.f32.mrf.mxu3 }
 0x3c4   :  { %v4248_v58 = vadd.f32 %v4247_v52, %v4228_v34 }
 0x3c6   :  { %4250 = vst [vmem:[#allocation14] sm:$0xff] %v4248_v58 }
 0x3c7   :  { %4261 = dma.vmem_to_hbm [thread:$0]  %s4257_s1, 128, %s4259_s26, [#allocation4]  }
 0x3c8   :  { %7045 = dma.done.wait [#allocation4], 128  }
 0x3c9   :  { %7046 = vsyncadd [#allocation4], 4294967168 }
 0x3ca   :  { %4266 = vsyncpa [#allocation3], 1 }
 0x3cb   :  { %4267 = vsyncpa [#allocation6], 1 }
 0x3cc   :  { %4268 = vsyncpa [#allocation9], 1 }
 0x3cd   :  { %4269 = vsyncpa [#allocation12], 1 }
 0x3ce   :  { %4270 = vsyncpa [#allocation4], 1 }

</bundles_post_ra>
